<compile_context>
chip_gen: v6e
topology: v6e:2x2x1
jax: 0.10.0
libtpu: 0.0.40
codegen_flags: <defaults>
</compile_context>

<pallas_src>
import functools

import numpy as np

import jax
import jax.numpy as jnp
from jax.experimental import pallas as pl
from jax.experimental.pallas import tpu as pltpu


# ----------------------------------------------------------------------------
# Pallas kernel: fused [optional bilinear upsample] + elementwise combine
#                + 3x3 same-pad conv (folded-BN bias) (+ ReLU)
# ----------------------------------------------------------------------------
def _make_conv_kernel(H, W, cout, needs_up, combine, relu):
    N = H * W
    n_in = len(needs_up)
    n_up = sum(needs_up)
    taps = [(dy - 1, dx - 1) for dy in range(3) for dx in range(3)]
    pow2_w = (W & (W - 1)) == 0
    use_roll = (N % 8 == 0)            # sublane-aligned roll path

    def _shift_rows(tap, s):
        # shifted[p] = tap[p + s]; rows with p+s outside [0, N) are masked later.
        if s == 0:
            return tap
        if use_roll:
            return pltpu.roll(tap, shift=(-s) % N, axis=0)
        # Tiny-N fallback (only the 2x2 map, N=4): do the row shift as a small
        # on-MXU matmul with an iota-built selection matrix instead of a
        # sub-tile sublane shuffle.
        rows = jax.lax.broadcasted_iota(jnp.int32, (N, N), 0)
        cols = jax.lax.broadcasted_iota(jnp.int32, (N, N), 1)
        sel = (cols == rows + s).astype(jnp.float32)
        return jax.lax.dot_general(
            sel, tap, dimension_numbers=(((1,), (0,)), ((), ())),
            preferred_element_type=jnp.float32)

    def kernel(*refs):
        x_refs = refs[:n_in]
        u_refs = refs[n_in:n_in + n_up]
        w_ref = refs[n_in + n_up]          # (Cin, 9*cout) bf16, BN-folded
        b_ref = refs[n_in + n_up + 1]      # (1, cout) f32
        o_ref = refs[n_in + n_up + 2]      # (1, N, cout) bf16 (f32 for output1)

        # --- Prologue: fused bilinear upsample (constant interp matrix on the
        # MXU) + elementwise combine (identity / abs-diff / n-way sum) in f32.
        vals = []
        ui = 0
        for i in range(n_in):
            xi = x_refs[i][0]                                   # (n_i, Cin)
            if needs_up[i]:
                xi = jax.lax.dot_general(                       # (N, Cin) f32
                    u_refs[ui][...], xi.astype(jnp.bfloat16),
                    dimension_numbers=(((1,), (0,)), ((), ())),
                    preferred_element_type=jnp.float32)
                ui += 1
            else:
                xi = xi.astype(jnp.float32)
            vals.append(xi)
        x = combine(vals).astype(jnp.bfloat16)                  # (N, Cin) bf16

        # --- One lane-dense matmul produces all 9 taps at once. ---------------
        y_all = jax.lax.dot_general(                             # (N, 9*cout) f32
            x, w_ref[...], dimension_numbers=(((1,), (0,)), ((), ())),
            preferred_element_type=jnp.float32)

        # --- Row / column validity masks, indexed by the output pixel. --------
        pidx = jax.lax.broadcasted_iota(jnp.int32, (N, 1), 0)
        xcol = (pidx & (W - 1)) if pow2_w else (pidx % W)
        m_left = (xcol != 0).astype(jnp.float32)        # tap offset ox == -1
        m_right = (xcol != W - 1).astype(jnp.float32)   # tap offset ox == +1
        m_top = (pidx >= W).astype(jnp.float32)         # tap offset oy == -1
        m_bot = (pidx < N - W).astype(jnp.float32)      # tap offset oy == +1

        # --- Tap scatter: roll + mask, accumulated as values; bias init; one
        # full-tile lane-dense store at the end. -------------------------------
        acc = jnp.broadcast_to(b_ref[...], (N, cout))
        for t, (oy, ox) in enumerate(taps):
            s = oy * W + ox                 # output pixel p reads input p + s
            tap = _shift_rows(y_all[:, t * cout:(t + 1) * cout], s)
            mask = None
            if ox == -1:
                mask = m_left
            elif ox == 1:
                mask = m_right
            if oy == -1:
                mask = m_top if mask is None else mask * m_top
            elif oy == 1:
                mask = m_bot if mask is None else mask * m_bot
            acc = acc + (tap if mask is None else tap * mask)

        if relu:
            acc = jnp.maximum(acc, 0.0)
        o_ref[0] = acc.astype(o_ref.dtype)

    return kernel


# ----------------------------------------------------------------------------
# Constant bilinear (align_corners=False / half-pixel) interpolation matrices
# ----------------------------------------------------------------------------
@functools.lru_cache(maxsize=None)
def _interp_matrix_1d(out_size, in_size):
    src = (np.arange(out_size) + 0.5) * (in_size / out_size) - 0.5
    src = np.clip(src, 0.0, in_size - 1)
    lo = np.clip(np.floor(src).astype(np.int64), 0, in_size - 1)
    hi = np.minimum(lo + 1, in_size - 1)
    frac = (src - lo).astype(np.float32)
    m = np.zeros((out_size, in_size), np.float32)
    m[np.arange(out_size), lo] += 1.0 - frac
    m[np.arange(out_size), hi] += frac
    return m


@functools.lru_cache(maxsize=None)
def _interp_matrix_2d(H, W, h, w):
    # (H*W, h*w) flattened bilinear-resize matrix. 2x-upsample weights are
    # multiples of 1/16 -> exact in bf16.
    m = np.kron(_interp_matrix_1d(H, h), _interp_matrix_1d(W, w))
    return jnp.asarray(m, dtype=jnp.bfloat16)


# ----------------------------------------------------------------------------
# Wrapper
# ----------------------------------------------------------------------------
_IDENT = lambda xs: xs[0]
_ABSDIFF = lambda xs: jnp.abs(xs[0] - xs[1])
_ADDN = lambda xs: functools.reduce(jnp.add, xs)


def conv3x3_fused(inputs, params, combine=_IDENT, relu=True,
                  out_dtype=jnp.bfloat16):
    """inputs: list of (B, h_i, w_i, C) NHWC maps.  Any input smaller than the
    largest one is bilinearly upsampled *inside the kernel* (constant interp
    matrix on the MXU), then all inputs are elementwise combined and fed to a
    3x3 same-pad conv with BN folded into the bf16 weights.  Returns
    (B, H, W, Cout=128) in `out_dtype`."""
    w_mat, bias = params                         # (C, 9*Cout) bf16, (1, Cout) f32
    B, _, _, C = inputs[0].shape
    H = max(x.shape[1] for x in inputs)
    W = max(x.shape[2] for x in inputs)
    N = H * W
    cin_pad, wcols = w_mat.shape
    cout = wcols // 9
    assert cin_pad == C, (cin_pad, C)

    flats, ups, needs_up = [], [], []
    for x in inputs:
        b_, h, w, c = x.shape
        assert (b_, c) == (B, C)
        flats.append(x.reshape(B, h * w, C))
        if (h, w) != (H, W):
            ups.append(_interp_matrix_2d(H, W, h, w))
            needs_up.append(True)
        else:
            needs_up.append(False)

    kernel = _make_conv_kernel(H, W, cout, tuple(needs_up), combine, relu)

    in_specs = [pl.BlockSpec((1, f.shape[1], C), lambda b: (b, 0, 0))
                for f in flats]
    in_specs += [pl.BlockSpec(u.shape, lambda b: (0, 0)) for u in ups]
    in_specs += [pl.BlockSpec(w_mat.shape, lambda b: (0, 0)),   # weights: DMA once
                 pl.BlockSpec(bias.shape, lambda b: (0, 0))]

    out = pl.pallas_call(
        kernel,
        out_shape=jax.ShapeDtypeStruct((B, N, cout), out_dtype),
        grid=(B,),
        in_specs=in_specs,
        out_specs=pl.BlockSpec((1, N, cout), lambda b: (b, 0, 0)),
        compiler_params=pltpu.CompilerParams(
            dimension_semantics=("parallel",),          # feeds v7x's 2nd TC
            vmem_limit_bytes=48 * 1024 * 1024),         # under v7x 64 MiB physical
    )(*flats, *ups, w_mat, bias)
    return out.reshape(B, H, W, cout)


# ----------------------------------------------------------------------------
# Parameters (deterministic; Conv+BN folded for inference, padded & bf16)
# ----------------------------------------------------------------------------
def _make_conv_bn(key, cin, cout, with_bn=True, cin_pad=None, cout_pad=128):
    k1, k2, k3, k4, k5, k6 = jax.random.split(key, 6)
    w = jax.random.normal(k1, (cout, cin, 3, 3), jnp.float32) / jnp.sqrt(9.0 * cin)
    b = 0.01 * jax.random.normal(k2, (cout,), jnp.float32)
    if with_bn:
        gamma = 1.0 + 0.1 * jax.random.normal(k3, (cout,), jnp.float32)
        beta = 0.1 * jax.random.normal(k4, (cout,), jnp.float32)
        mean = 0.1 * jax.random.normal(k5, (cout,), jnp.float32)
        var = jnp.abs(jax.random.normal(k6, (cout,), jnp.float32)) + 0.5
        scale = gamma / jnp.sqrt(var + 1e-5)
        bias = beta + (b - mean) * scale
    else:
        scale = jnp.ones((cout,), jnp.float32)
        bias = b

    cin_pad = cin if cin_pad is None else cin_pad
    w_f = w * scale[:, None, None, None]                          # fold BN scale
    w_f = jnp.pad(w_f, ((0, cout_pad - cout), (0, cin_pad - cin), (0, 0), (0, 0)))
    # (cout_pad, cin_pad, 3, 3) -> (cin_pad, ky, kx, cout_pad) -> (cin_pad, 9*cout_pad)
    # column index = (ky*3 + kx) * cout_pad + co  ==  tap-major layout.
    w_mat = jnp.transpose(w_f, (1, 2, 3, 0)).reshape(cin_pad, 9 * cout_pad)
    bias_p = jnp.pad(bias, (0, cout_pad - cout))[None, :]
    return (w_mat.astype(jnp.bfloat16), bias_p.astype(jnp.float32))


def make_fusnet_params(key):
    dem_cin = {"x5_dem_1": 2816, "x4_dem_1": 1408, "x3_dem_1": 704, "x2_dem_1": 352}
    deco_names = [
        "x5_x4", "x4_x3", "x3_x2", "x2_x1",
        "x5_x4_x3", "x4_x3_x2", "x3_x2_x1",
        "x5_x4_x3_x2", "x4_x3_x2_x1",
        "x5_dem_4", "x5_x4_x3_x2_x1",
        "level3", "level2", "level1",
        "x5_dem_5", "output4", "output3", "output2",
    ]
    keys = jax.random.split(key, len(dem_cin) + len(deco_names) + 1)
    params = {}
    i = 0
    for name, cin in dem_cin.items():
        params[name] = _make_conv_bn(keys[i], cin, 96, with_bn=True, cin_pad=cin)
        i += 1
    for name in deco_names:
        # Torch conv has Cin=96; our feature maps carry 128 ch (96 real + 32 zero).
        params[name] = _make_conv_bn(keys[i], 96, 96, with_bn=True, cin_pad=128)
        i += 1
    params["output1"] = _make_conv_bn(keys[i], 96, 1, with_bn=False, cin_pad=128)
    return params


# ----------------------------------------------------------------------------
# FusNet fusion/decoder forward (mirrors the PyTorch forward after the backbones)
# ----------------------------------------------------------------------------
def fusnet_forward(params, x1, x2, x3, x4, input_hw):
    def cbr(name, inputs, combine=_IDENT, relu=True, out_dtype=jnp.bfloat16):
        return conv3x3_fused(inputs, params[name], combine=combine, relu=relu,
                             out_dtype=out_dtype)

    x5_dem_1 = cbr("x5_dem_1", [x4])
    x4_dem_1 = cbr("x4_dem_1", [x3])
    x3_dem_1 = cbr("x3_dem_1", [x2])
    x2_dem_1 = cbr("x2_dem_1", [x1])

    # Coarser input listed first; the 2x bilinear upsample is fused in-kernel.
    x5_4 = cbr("x5_x4", [x5_dem_1, x4_dem_1], _ABSDIFF)
    x4_3 = cbr("x4_x3", [x4_dem_1, x3_dem_1], _ABSDIFF)
    x3_2 = cbr("x3_x2", [x3_dem_1, x2_dem_1], _ABSDIFF)
    x2_1 = cbr("x2_x1", [x2_dem_1])                     # already at target size

    x5_4_3 = cbr("x5_x4_x3", [x5_4, x4_3], _ABSDIFF)
    x4_3_2 = cbr("x4_x3_x2", [x4_3, x3_2], _ABSDIFF)
    x3_2_1 = cbr("x3_x2_x1", [x3_2, x2_1], _ABSDIFF)

    x5_4_3_2 = cbr("x5_x4_x3_x2", [x5_4_3, x4_3_2], _ABSDIFF)
    x4_3_2_1 = cbr("x4_x3_x2_x1", [x4_3_2, x3_2_1], _ABSDIFF)

    x5_dem_4 = cbr("x5_dem_4", [x5_4_3_2])
    x5_4_3_2_1 = cbr("x5_x4_x3_x2_x1", [x5_dem_4, x4_3_2_1], _ABSDIFF)

    level4 = x5_4
    level3 = cbr("level3", [x4_3, x5_4_3], _ADDN)
    level2 = cbr("level2", [x3_2, x4_3_2, x5_4_3_2], _ADDN)
    level1 = cbr("level1", [x2_1, x3_2_1, x4_3_2_1, x5_4_3_2_1], _ADDN)

    x5_dem_5 = cbr("x5_dem_5", [x5_4])
    output4 = cbr("output4", [x5_dem_5, level4], _ADDN)
    output3 = cbr("output3", [output4, level3], _ADDN)
    output2 = cbr("output2", [output3, level2], _ADDN)
    output1 = cbr("output1", [output2, level1], _ADDN, relu=False,
                  out_dtype=jnp.float32)

    out = output1[..., :1]               # channel 0 holds the real Cout=1 map
    out = jax.image.resize(out, (out.shape[0], input_hw[0], input_hw[1], 1),
                           method="bilinear")           # upsample BEFORE sigmoid
    out = jax.nn.sigmoid(out)                           # fused by XLA
    return jnp.transpose(out, (0, 3, 1, 2))             # NCHW (B, 1, H_in, W_in)


# ----------------------------------------------------------------------------
# Main
# ----------------------------------------------------------------------------
if __name__ == "__main__":
    key = jax.random.PRNGKey(0)
    k_par, k1r, k1s, k2r, k2s, k3r, k3s, k4r, k4s = jax.random.split(key, 9)

    B = 2
    # Scaled-down backbone feature maps (original: 56/28/14/7 spatial, input 224).
    x2r = jax.random.normal(k1r, (B, 256, 16, 16), jnp.float32)   # resnet layer1
    x1s = jax.random.normal(k1s, (B, 96, 16, 16), jnp.float32)    # swin stage 0
    x3r = jax.random.normal(k2r, (B, 512, 8, 8), jnp.float32)     # resnet layer2
    x2s = jax.random.normal(k2s, (B, 192, 8, 8), jnp.float32)     # swin stage 1
    x4r = jax.random.normal(k3r, (B, 1024, 4, 4), jnp.float32)    # resnet layer3
    x3s = jax.random.normal(k3s, (B, 384, 4, 4), jnp.float32)     # swin stage 2
    x5r = jax.random.normal(k4r, (B, 2048, 2, 2), jnp.float32)    # resnet layer4
    x4s = jax.random.normal(k4s, (B, 768, 2, 2), jnp.float32)     # swin stage 3

    # torch.cat([...], dim=1) in NCHW, then to NHWC for the kernels.
    to_nhwc = lambda t: jnp.transpose(t, (0, 2, 3, 1))
    x1 = to_nhwc(jnp.concatenate([x2r, x1s], axis=1))   # (B, 16, 16, 352)
    x2 = to_nhwc(jnp.concatenate([x3r, x2s], axis=1))   # (B,  8,  8, 704)
    x3 = to_nhwc(jnp.concatenate([x4r, x3s], axis=1))   # (B,  4,  4, 1408)
    x4 = to_nhwc(jnp.concatenate([x5r, x4s], axis=1))   # (B,  2,  2, 2816)

    input_hw = (64, 64)  # original network input size (for the final upsample)
    params = make_fusnet_params(k_par)

    # --- Sanity checks: Pallas conv vs XLA conv on bf16-rounded operands. ---
    def _ref_cbr(x_nhwc, p, relu=True):
        w_mat, bias = p
        cin = w_mat.shape[0]
        w4 = jnp.transpose(
            w_mat.astype(jnp.float32).reshape(cin, 3, 3, -1), (1, 2, 0, 3))
        xr = x_nhwc.astype(jnp.bfloat16).astype(jnp.float32)
        y = jax.lax.conv_general_dilated(
            xr, w4, (1, 1), "SAME",
            dimension_numbers=("NHWC", "HWIO", "NHWC")) + bias
        return jnp.maximum(y, 0.0) if relu else y

    # 1) roll path (16x16), identity combine.
    chk = conv3x3_fused([x1], params["x2_dem_1"]).astype(jnp.float32)
    ref = _ref_cbr(x1, params["x2_dem_1"])
    assert jnp.allclose(chk, ref, atol=5e-2, rtol=5e-2), "conv kernel mismatch"

    # 2) tiny-N fallback path (2x2), plus fused 2x upsample + abs-diff path.
    d_lo = conv3x3_fused([x4], params["x5_dem_1"])          # (B, 2, 2, 128) bf16
    ref_lo = _ref_cbr(x4, params["x5_dem_1"])
    assert jnp.allclose(d_lo.astype(jnp.float32), ref_lo,
                        atol=5e-2, rtol=5e-2), "tiny-N conv mismatch"
    d_hi = conv3x3_fused([x3], params["x4_dem_1"])          # (B, 4, 4, 128) bf16
    chk2 = conv3x3_fused([d_lo, d_hi], params["x5_x4"],
                         _ABSDIFF).astype(jnp.float32)
    up_ref = jax.image.resize(d_lo.astype(jnp.float32), (B, 4, 4, 128), "bilinear")
    ref2 = _ref_cbr(jnp.abs(up_ref - d_hi.astype(jnp.float32)), params["x5_x4"])
    assert jnp.allclose(chk2, ref2, atol=5e-2, rtol=5e-2), "upsample path mismatch"

    fwd = jax.jit(functools.partial(fusnet_forward, input_hw=input_hw))
    out = fwd(params, x1, x2, x3, x4)
    jax.block_until_ready(out)

    assert out.shape == (B, 1, input_hw[0], input_hw[1])
    assert bool(jnp.all((out >= 0.0) & (out <= 1.0)))
    print("KERNEL_OK")
</pallas_src>

<mosaic_0001>
module attributes {stable_mosaic.version = 11 : i64} {
  func.func @kernel(%arg0: i32, %arg1: memref<1x256x352xf32, #tpu.memory_space<vmem>>, %arg2: memref<352x1152xbf16, #tpu.memory_space<vmem>>, %arg3: memref<1x128xf32, #tpu.memory_space<vmem>>, %arg4: memref<1x256x128xbf16, #tpu.memory_space<vmem>>) attributes {dimension_semantics = [#tpu.dimension_semantics<parallel>], iteration_bounds = array<i64: 2>, scalar_prefetch = 0 : i64, scratch_operands = 0 : i64, tpu.core_type = #tpu.core_type<tc>, window_params = [{transform_indices = @transform_0, window_bounds = array<i64: 1, 256, 352>}, {pipeline_mode = #tpu.pipeline_mode<synchronous>, transform_indices = @transform_1, window_bounds = array<i64: 352, 1152>}, {pipeline_mode = #tpu.pipeline_mode<synchronous>, transform_indices = @transform_2, window_bounds = array<i64: 1, 128>}, {transform_indices = @transform_3, window_bounds = array<i64: 1, 256, 128>}]} {
    %c0 = arith.constant 0 : index
    %c0_0 = arith.constant 0 : index
    %c0_1 = arith.constant 0 : index
    %0 = vector.load %arg1[%c0, %c0_0, %c0_1] : memref<1x256x352xf32, #tpu.memory_space<vmem>>, vector<1x256x352xf32>
    %1 = vector.shape_cast %0 : vector<1x256x352xf32> to vector<256x352xf32>
    %2 = arith.truncf %1 : vector<256x352xf32> to vector<256x352xbf16>
    %c0_2 = arith.constant 0 : index
    %c0_3 = arith.constant 0 : index
    %3 = vector.load %arg2[%c0_2, %c0_3] : memref<352x1152xbf16, #tpu.memory_space<vmem>>, vector<352x1152xbf16>
    %cst = arith.constant dense<0.000000e+00> : vector<256x1152xf32>
    %4 = tpu.matmul %2, %3, %cst {dimension_numbers = #tpu.dot_dimension_numbers<[1], [0], [0], [1], [0, 0, 1, 1], [], []>} : vector<256x352xbf16>, vector<352x1152xbf16>, vector<256x1152xf32> -> vector<256x1152xf32>
    %5 = tpu.iota {dimensions = array<i32: 0>} : vector<256x1xi32>
    %c15_i32 = arith.constant 15 : i32
    %6 = vector.broadcast %c15_i32 : i32 to vector<256x1xi32>
    %7 = arith.andi %5, %6 : vector<256x1xi32>
    %c0_i32 = arith.constant 0 : i32
    %8 = vector.broadcast %c0_i32 : i32 to vector<256x1xi32>
    %9 = arith.cmpi ne, %7, %8 : vector<256x1xi32>
    %10 = arith.extui %9 : vector<256x1xi1> to vector<256x1xi32>
    %11 = arith.sitofp %10 : vector<256x1xi32> to vector<256x1xf32>
    %c15_i32_4 = arith.constant 15 : i32
    %12 = vector.broadcast %c15_i32_4 : i32 to vector<256x1xi32>
    %13 = arith.cmpi ne, %7, %12 : vector<256x1xi32>
    %14 = arith.extui %13 : vector<256x1xi1> to vector<256x1xi32>
    %15 = arith.sitofp %14 : vector<256x1xi32> to vector<256x1xf32>
    %c16_i32 = arith.constant 16 : i32
    %16 = vector.broadcast %c16_i32 : i32 to vector<256x1xi32>
    %17 = arith.cmpi sge, %5, %16 : vector<256x1xi32>
    %18 = arith.extui %17 : vector<256x1xi1> to vector<256x1xi32>
    %19 = arith.sitofp %18 : vector<256x1xi32> to vector<256x1xf32>
    %c240_i32 = arith.constant 240 : i32
    %20 = vector.broadcast %c240_i32 : i32 to vector<256x1xi32>
    %21 = arith.cmpi slt, %5, %20 : vector<256x1xi32>
    %22 = arith.extui %21 : vector<256x1xi1> to vector<256x1xi32>
    %23 = arith.sitofp %22 : vector<256x1xi32> to vector<256x1xf32>
    %c0_5 = arith.constant 0 : index
    %c0_6 = arith.constant 0 : index
    %24 = vector.load %arg3[%c0_5, %c0_6] : memref<1x128xf32, #tpu.memory_space<vmem>>, vector<1x128xf32>
    %25 = vector.shape_cast %24 : vector<1x128xf32> to vector<1x128xf32>
    %26 = vector.broadcast %25 : vector<1x128xf32> to vector<256x128xf32>
    %27 = vector.extract_strided_slice %4 {offsets = [0, 0], sizes = [256, 128], strides = [1, 1]} : vector<256x1152xf32> to vector<256x128xf32>
    %c17_i32 = arith.constant 17 : i32
    %28 = tpu.dynamic_rotate %27 by %c17_i32 dim 0 : vector<256x128xf32>, i32 -> vector<256x128xf32>
    %29 = arith.mulf %11, %19 : vector<256x1xf32>
    %30 = vector.broadcast %29 : vector<256x1xf32> to vector<256x128xf32>
    %31 = arith.mulf %28, %30 : vector<256x128xf32>
    %32 = arith.addf %26, %31 : vector<256x128xf32>
    %33 = vector.extract_strided_slice %4 {offsets = [0, 128], sizes = [256, 128], strides = [1, 1]} : vector<256x1152xf32> to vector<256x128xf32>
    %c16_i32_7 = arith.constant 16 : i32
    %34 = tpu.dynamic_rotate %33 by %c16_i32_7 dim 0 : vector<256x128xf32>, i32 -> vector<256x128xf32>
    %35 = vector.broadcast %19 : vector<256x1xf32> to vector<256x128xf32>
    %36 = arith.mulf %34, %35 : vector<256x128xf32>
    %37 = arith.addf %32, %36 : vector<256x128xf32>
    %38 = vector.extract_strided_slice %4 {offsets = [0, 256], sizes = [256, 128], strides = [1, 1]} : vector<256x1152xf32> to vector<256x128xf32>
    %c15_i32_8 = arith.constant 15 : i32
    %39 = tpu.dynamic_rotate %38 by %c15_i32_8 dim 0 : vector<256x128xf32>, i32 -> vector<256x128xf32>
    %40 = arith.mulf %15, %19 : vector<256x1xf32>
    %41 = vector.broadcast %40 : vector<256x1xf32> to vector<256x128xf32>
    %42 = arith.mulf %39, %41 : vector<256x128xf32>
    %43 = arith.addf %37, %42 : vector<256x128xf32>
    %44 = vector.extract_strided_slice %4 {offsets = [0, 384], sizes = [256, 128], strides = [1, 1]} : vector<256x1152xf32> to vector<256x128xf32>
    %c1_i32 = arith.constant 1 : i32
    %45 = tpu.dynamic_rotate %44 by %c1_i32 dim 0 : vector<256x128xf32>, i32 -> vector<256x128xf32>
    %46 = vector.broadcast %11 : vector<256x1xf32> to vector<256x128xf32>
    %47 = arith.mulf %45, %46 : vector<256x128xf32>
    %48 = arith.addf %43, %47 : vector<256x128xf32>
    %49 = vector.extract_strided_slice %4 {offsets = [0, 512], sizes = [256, 128], strides = [1, 1]} : vector<256x1152xf32> to vector<256x128xf32>
    %50 = arith.addf %48, %49 : vector<256x128xf32>
    %51 = vector.extract_strided_slice %4 {offsets = [0, 640], sizes = [256, 128], strides = [1, 1]} : vector<256x1152xf32> to vector<256x128xf32>
    %c255_i32 = arith.constant 255 : i32
    %52 = tpu.dynamic_rotate %51 by %c255_i32 dim 0 : vector<256x128xf32>, i32 -> vector<256x128xf32>
    %53 = vector.broadcast %15 : vector<256x1xf32> to vector<256x128xf32>
    %54 = arith.mulf %52, %53 : vector<256x128xf32>
    %55 = arith.addf %50, %54 : vector<256x128xf32>
    %56 = vector.extract_strided_slice %4 {offsets = [0, 768], sizes = [256, 128], strides = [1, 1]} : vector<256x1152xf32> to vector<256x128xf32>
    %c241_i32 = arith.constant 241 : i32
    %57 = tpu.dynamic_rotate %56 by %c241_i32 dim 0 : vector<256x128xf32>, i32 -> vector<256x128xf32>
    %58 = arith.mulf %11, %23 : vector<256x1xf32>
    %59 = vector.broadcast %58 : vector<256x1xf32> to vector<256x128xf32>
    %60 = arith.mulf %57, %59 : vector<256x128xf32>
    %61 = arith.addf %55, %60 : vector<256x128xf32>
    %62 = vector.extract_strided_slice %4 {offsets = [0, 896], sizes = [256, 128], strides = [1, 1]} : vector<256x1152xf32> to vector<256x128xf32>
    %c240_i32_9 = arith.constant 240 : i32
    %63 = tpu.dynamic_rotate %62 by %c240_i32_9 dim 0 : vector<256x128xf32>, i32 -> vector<256x128xf32>
    %64 = vector.broadcast %23 : vector<256x1xf32> to vector<256x128xf32>
    %65 = arith.mulf %63, %64 : vector<256x128xf32>
    %66 = arith.addf %61, %65 : vector<256x128xf32>
    %67 = vector.extract_strided_slice %4 {offsets = [0, 1024], sizes = [256, 128], strides = [1, 1]} : vector<256x1152xf32> to vector<256x128xf32>
    %c239_i32 = arith.constant 239 : i32
    %68 = tpu.dynamic_rotate %67 by %c239_i32 dim 0 : vector<256x128xf32>, i32 -> vector<256x128xf32>
    %69 = arith.mulf %15, %23 : vector<256x1xf32>
    %70 = vector.broadcast %69 : vector<256x1xf32> to vector<256x128xf32>
    %71 = arith.mulf %68, %70 : vector<256x128xf32>
    %72 = arith.addf %66, %71 : vector<256x128xf32>
    %cst_10 = arith.constant 0.000000e+00 : f32
    %73 = vector.broadcast %cst_10 : f32 to vector<256x128xf32>
    %74 = arith.maximumf %72, %73 : vector<256x128xf32>
    %75 = arith.truncf %74 : vector<256x128xf32> to vector<256x128xbf16>
    %c0_11 = arith.constant 0 : index
    %c0_12 = arith.constant 0 : index
    %c0_13 = arith.constant 0 : index
    %76 = vector.load %arg4[%c0_11, %c0_12, %c0_13] : memref<1x256x128xbf16, #tpu.memory_space<vmem>>, vector<1x256x128xbf16>
    %77 = vector.shape_cast %76 : vector<1x256x128xbf16> to vector<256x128xbf16>
    %78 = vector.shape_cast %75 : vector<256x128xbf16> to vector<1x256x128xbf16>
    tpu.vector_store %arg4[%c0_11, %c0_12, %c0_13], %78 {strides = array<i32>} : memref<1x256x128xbf16, #tpu.memory_space<vmem>>, vector<1x256x128xbf16>,
    return
  }
  func.func @transform_0(%arg0: i32) -> (i32, i32, i32) {
    %c0_i32 = arith.constant 0 : i32
    %c0_i32_0 = arith.constant 0 : i32
    %c0_i32_1 = arith.constant 0 : i32
    return %arg0, %c0_i32, %c0_i32_0 : i32, i32, i32
  }
  func.func @transform_1(%arg0: i32) -> (i32, i32) {
    %c0_i32 = arith.constant 0 : i32
    %c0_i32_0 = arith.constant 0 : i32
    %c0_i32_1 = arith.constant 0 : i32
    return %c0_i32, %c0_i32_0 : i32, i32
  }
  func.func @transform_2(%arg0: i32) -> (i32, i32) {
    %c0_i32 = arith.constant 0 : i32
    %c0_i32_0 = arith.constant 0 : i32
    %c0_i32_1 = arith.constant 0 : i32
    return %c0_i32, %c0_i32_0 : i32, i32
  }
  func.func @transform_3(%arg0: i32) -> (i32, i32, i32) {
    %c0_i32 = arith.constant 0 : i32
    %c0_i32_0 = arith.constant 0 : i32
    %c0_i32_1 = arith.constant 0 : i32
    return %arg0, %c0_i32, %c0_i32_0 : i32, i32, i32
  }
}

</mosaic_0001>

<bundles_post_ra>
// kernel: tpu_custom_call.1
= control target key start
LH: loop header
LB: loop body
LE: loop exit
PB: predicated region body
PF: predicated region fallthrough
CT: control target
= control target key end

     0   :  { %8 = vsyncpa [#allocation3], 0  ;;  %s9615_s0 = inlined_call_operand.vmem [shape: f32[2,256,352], index: 0, kind: input, shape index: {}]   ;;  %s9616_s1 = inlined_call_operand.vmem [shape: bf16[352,1152], index: 1, kind: input, shape index: {}]   ;;  %s9617_s2 = inlined_call_operand.vmem [shape: f32[1,128], index: 2, kind: input, shape index: {}]   ;;  %s9618_s3 = inlined_call_operand.hbm [shape: bf16[2,256,128], index: 3, kind: output, shape index: {}]  }
   0x1   :  { %10 = vsyncpa [#allocation3 + $0x1], 0  ;;  %s6321_s12 = smov 0   ;;  %s6323_s13 = smov 0  }
   0x2   :  { %s6325_s14 = smov 0   ;;  %s6327_s15 = smov 0  }
   0x3 LB: > { %s6342_s16 = sadd.s32 4294967295, %s6294_s15   ;;  %s5243_s17 = sadd.s32 4294967294, %s6294_s15   ;;  %s6294_s15 = sphi %s6327_s15, %s10197_s15   ;;  %s6290_s14 = sphi %s6325_s14, %s10196_s14   ;;  %s6286_s13 = sphi %s6323_s13, %s10195_s13   ;;  %s6282_s12 = sphi %s6321_s12, %s10194_s12  }
   0x4   : > { %s6346_s18 = sadd.s32 1, %s6294_s15   ;;  %s91_s19 = sadd.s32 1, %s6290_s14 }
   0x5   : > { %s88_s20 = ssub.s32 %s6294_s15, %s6346_s18  ;;  %p101_p0 = scmp.ne.s32.totalorder %s6290_s14, %s6286_s13 }
   0x6   : > { %p89_p1 = scmp.eq.s32.totalorder %s88_s20, 0  ;;  %p102_p2 = scmp.eq.s32.totalorder %s6342_s16, 1 }
   0x7   : > { %p107_p3 = scmp.ne.s32.totalorder %s6286_s13, %s6282_s12  ;;  %p108_p4 = scmp.eq.s32.totalorder %s5243_s17, 1 }
   0x8   : > { %s6357_s21 = scalar_select %p89_p1, %s6290_s14, %s91_s19  }
   0x9   : > { %p6359_p5 = por %p102_p2, %p101_p0  ;;  %p6363_p6 = por %p108_p4, %p107_p3 }
   0xa   : > { %p5246_p7 = scmp.ge.s32.totalorder %s6294_s15, 1  ;;  %p140_p8 = scmp.lt.s32.totalorder %s6294_s15, 3 }
   0xc   : > { %p141_p9 = pnand %p5246_p7, %p140_p8 }
   0xe   : > { %144 = sbr.rel (%p141_p9) target bundleno = 905 (0x389), region = 32 }
  0x13   : > { %v5947_v0 = vld [vmem:[%s9616_s1 + $0x1fc] ss:$36 sps:$4 sm:$0xff]   ;;  %v5949_v1 = vld [vmem:[%s9616_s1 + $0x5ec] ss:$36 sps:$4 sm:$0xff]   ;;  %v9659_v2 = vmov 0   ;;  %p164_p10 = scmp.lt.s32.totalorder %s6342_s16, 1 }
  0x14   : > { %1820 = vmatprep.mubr.bf16.mxu1 %v9659_v2  ;;  %1595 = vmatprep.subr.bf16.mxu0 %v5947_v0  ;;  %v5951_v3 = vld [vmem:[%s9616_s1 + $0x1f8] ss:$36 sps:$4 sm:$0xff]   ;;  %v5952_v4 = vld [vmem:[%s9616_s1 + $0x5e8] ss:$36 sps:$4 sm:$0xff]   ;;  %v5957_v7 = vld [vmem:[%s9616_s1 + $0x1b0] ss:$36 sps:$4 sm:$0xff]  }
  0x15   : > { %1792 = vmatprep.subr.bf16.mxu1 %v5949_v1  ;;  %v5953_v5 = vld [vmem:[%s9616_s1 + $0x1b4] ss:$36 sps:$4 sm:$0xff]   ;;  %1596 = vmatpush1.bf16.msra.mxu0 %v5951_v3  ;;  %v5955_v6 = vld [vmem:[%s9616_s1 + $0x5a4] ss:$36 sps:$4 sm:$0xff]   ;;  %v5959_v9 = vld [vmem:[%s9616_s1 + $0x16c] ss:$36 sps:$4 sm:$0xff]  }
  0x16   : > { %1793 = vmatpush1.bf16.msra.mxu1 %v5952_v4  ;;  %1597 = vmatprep.subr.bf16.mxu0 %v5953_v5  ;;  %v5958_v8 = vld [vmem:[%s9616_s1 + $0x5a0] ss:$36 sps:$4 sm:$0xff]   ;;  %v5963_v11 = vld [vmem:[%s9616_s1 + $0x168] ss:$36 sps:$4 sm:$0xff]   ;;  %v5964_v12 = vld [vmem:[%s9616_s1 + $0x558] ss:$36 sps:$4 sm:$0xff]  }
  0x17   : > { %1794 = vmatprep.subr.bf16.mxu1 %v5955_v6  ;;  %v5961_v10 = vld [vmem:[%s9616_s1 + $0x55c] ss:$36 sps:$4 sm:$0xff]   ;;  %v5965_v13 = vld [vmem:[%s9616_s1 + $0x124] ss:$36 sps:$4 sm:$0xff]   ;;  %v5967_v14 = vld [vmem:[%s9616_s1 + $0x514] ss:$36 sps:$4 sm:$0xff]  }
  0x18   : > { %s165_s7 = scalar_select %p164_p10, %s6342_s16, 1  ;;  %v5969_v15 = vld [vmem:[%s9616_s1 + $0x120] ss:$36 sps:$4 sm:$0xff]   ;;  %v5970_v16 = vld [vmem:[%s9616_s1 + $0x510] ss:$36 sps:$4 sm:$0xff]   ;;  %vm1546_vm0 = vcmask 785408  }
  0x19   : > { %1598 = vmatpush1.bf16.msra.mxu0 %v5957_v7  ;;  %v5971_v17 = vld [vmem:[%s9616_s1 + $0xdc] ss:$36 sps:$4 sm:$0xff]   ;;  %v5973_v18 = vld [vmem:[%s9616_s1 + $0x4cc] ss:$36 sps:$4 sm:$0xff]   ;;  %v5977_v21 = vld [vmem:[%s9616_s1 + $0x94] ss:$36 sps:$4 sm:$0xff]  }
  0x1a   : > { %1795 = vmatpush1.bf16.msra.mxu1 %v5958_v8  ;;  %1599 = vmatprep.subr.bf16.mxu0 %v5959_v9  ;;  %s5903_s25 = smul.u32 768, %s165_s7  ;;  %v5975_v19 = vld [vmem:[%s9616_s1 + $0xd8] ss:$36 sps:$4 sm:$0xff]   ;;  %v5976_v20 = vld [vmem:[%s9616_s1 + $0x4c8] ss:$36 sps:$4 sm:$0xff]   ;;  %s161_s24 = sand.u32 1, %s6286_s13  }
  0x1b   : > { %1796 = vmatprep.subr.bf16.mxu1 %v5961_v10  ;;  %v5979_v22 = vld [vmem:[%s9616_s1 + $0x484] ss:$36 sps:$4 sm:$0xff]   ;;  %v5981_v23 = vld [vmem:[%s9616_s1 + $0x90] ss:$36 sps:$4 sm:$0xff]   ;;  %v5996_v34 = vld [vmem:[%s9616_s1 + $0x1bc] ss:$36 sps:$4 sm:$0xff]  }
  0x1c   : > { %s6441_s9 = scalar_lea.vmem %s9615_s0, %s5903_s25  ;;  %v5982_v24 = vld [vmem:[%s9616_s1 + $0x480] ss:$36 sps:$4 sm:$0xff]   ;;  %v5983_v27 = vld [vmem:[%s9616_s1 + $0x4c] ss:$36 sps:$4 sm:$0xff]   ;;  %v5994_v37 = vld [vmem:[%s9616_s1 + $0x1b8] ss:$36 sps:$4 sm:$0xff]  }
  0x1d   : > { %1600 = vmatpush1.bf16.msra.mxu0 %v5963_v11  ;;  %v172_v25 = vld [vmem:[%s6441_s9 + $0x10] sm:$0xff]  ;;  %v175_v26 = vld [vmem:[%s6441_s9 + $0x28] sm:$0xff]  ;;  %v5985_v30 = vld [vmem:[%s9616_s1 + $0x200] ss:$36 sps:$4 sm:$0xff]   ;;  %s5247_s25 = sshll.u32 %s161_s24, 7  ;;  %s5629_s27 = sshll.u32 %s6342_s16, 11 }
  0x1e   : > { %1797 = vmatpush1.bf16.msra.mxu1 %v5964_v12  ;;  %1601 = vmatprep.subr.bf16.mxu0 %v5965_v13  ;;  %v5987_v28 = vld [vmem:[%s9616_s1 + $0x204] ss:$36 sps:$4 sm:$0xff]   ;;  %v6457_v29 = vpack.c.bf16 %v175_v26, %v172_v25  ;;  %v181_v36 = vld [vmem:[%s6441_s9 + $0x58] sm:$0xff]  ;;  %v6003_v43 = vld [vmem:[%s9616_s1 + $0x170] ss:$36 sps:$4 sm:$0xff]   ;;  %s9444_s26 = scalar_lea.vmem [#allocation2], %s5247_s25  ;;  %s9568_s4 = scalar_lea.hbm %s9618_s3, %s5629_s27 }
  0x1f   : > { %1798 = vmatprep.subr.bf16.mxu1 %v5967_v14  ;;  %v5988_v31 = vld [vmem:[%s9616_s1 + $0x48] ss:$36 sps:$4 sm:$0xff]   ;;  %v5991_v33 = vld [vmem:[%s9616_s1] ss:$36 sps:$4 sm:$0xff]   ;;  %v6005_v39 = vld [vmem:[%s9616_s1 + $0x174] ss:$36 sps:$4 sm:$0xff]  }
  0x20   : > { %9779 = vst [vmem:[#allocation5_spill] sm:$0xff] %v6457_v29  ;;  %v5989_v32 = vld [vmem:[%s9616_s1 + $0x4] ss:$36 sps:$4 sm:$0xff]   ;;  %v5992_v38 = vld [vmem:[%s9616_s1 + $0x43c] ss:$36 sps:$4 sm:$0xff]   ;;  %v184_v46 = vld [vmem:[%s6441_s9 + $0x70] sm:$0xff] }
  0x21   : > { %1602 = vmatpush1.bf16.msra.mxu0 %v5969_v15  ;;  %v178_v35 = vld [vmem:[%s6441_s9 + $0x40] sm:$0xff]  ;;  %v5997_v41 = vld [vmem:[%s9616_s1 + $0x438] ss:$36 sps:$4 sm:$0xff]   ;;  %v6014_v44 = vld [vmem:[%s9616_s1 + $0x12c] ss:$36 sps:$4 sm:$0xff]   ;;  %s5181_s28 = sshll.u32 %s9444_s26, 4  ;;  %s9570_s28 = int_to_ptr.vmem [resolvable:$true] %s5181_s28 }
  0x22   : > { %1799 = vmatpush1.bf16.msra.mxu1 %v5970_v16  ;;  %1603 = vmatprep.subr.bf16.mxu0 %v5971_v17  ;;  %v6488_v40 = vpack.c.bf16 %v181_v36, %v178_v35  ;;  %v5998_v42 = vld [vmem:[%s9616_s1 + $0x3f4] ss:$36 sps:$4 sm:$0xff]   ;;  %v187_v47 = vld [vmem:[%s6441_s9 + $0x88] sm:$0xff]  ;;  %v174_v53 = vld [vmem:[%s6441_s9 + $0x20] sm:$0xff]  ;;  %s9575_s5 = scalar_lea.sflag [#allocation3], %s161_s24  ;;  %s6234_s16 = scalar_lea.vmem %s9570_s28, 2048 }
  0x23   : > { %1800 = vmatprep.subr.bf16.mxu1 %v5973_v18  ;;  %v6000_v45 = vld [vmem:[%s9616_s1 + $0x3f0] ss:$36 sps:$4 sm:$0xff]   ;;  %v6012_v49 = vld [vmem:[%s9616_s1 + $0x128] ss:$36 sps:$4 sm:$0xff]   ;;  %v6519_v51 = vpack.c.bf16 %v187_v47, %v184_v46  ;;  %v6021_v57 = vld [vmem:[%s9616_s1 + $0xe0] ss:$36 sps:$4 sm:$0xff]   ;;  %p6235_p11 = scmp.ne.s32.totalorder %s9570_s28, %s6234_s16 }
  0x24   : > { %9780 = vst [vmem:[#allocation6_spill] sm:$0xff] %v6488_v40  ;;  %v6001_v48 = vld [vmem:[%s9616_s1 + $0x3ac] ss:$36 sps:$4 sm:$0xff]   ;;  %v6023_v50 = vld [vmem:[%s9616_s1 + $0xe4] ss:$36 sps:$4 sm:$0xff]   ;;  %v193_v61 = vld [vmem:[%s6441_s9 + $0xb8] sm:$0xff] }
  0x25   : > { %1604 = vmatpush1.bf16.msra.mxu0 %v5975_v19  ;;  %9781 = vst [vmem:[#allocation7_spill] sm:$0xff] %v6519_v51  ;;  %v171_v52 = vld [vmem:[%s6441_s9 + $0x8] sm:$0xff]  ;;  %v6030_v58 = vld [vmem:[%s9616_s1 + $0x9c] ss:$36 sps:$4 sm:$0xff]   ;;  %v6033_v0 = vld [vmem:[%s9616_s1 + $0x54] ss:$36 sps:$4 sm:$0xff]   ;;  %p6236_p12 = pnand %p6235_p11, %p6359_p5 }
  0x26   : > { %1801 = vmatpush1.bf16.msra.mxu1 %v5976_v20  ;;  %1605 = vmatprep.subr.bf16.mxu0 %v5977_v21  ;;  %v6006_v54 = vld [vmem:[%s9616_s1 + $0x3a8] ss:$36 sps:$4 sm:$0xff]   ;;  %v6529_v56 = vpack.c.bf16 %v174_v53, %v171_v52  ;;  %v6009_v59 = vld [vmem:[%s9616_s1 + $0x360] ss:$36 sps:$4 sm:$0xff]   ;;  %v6028_v63 = vld [vmem:[%s9616_s1 + $0x98] ss:$36 sps:$4 sm:$0xff]  }
  0x27   : > { %1802 = vmatprep.subr.bf16.mxu1 %v5979_v22  ;;  %v6007_v55 = vld [vmem:[%s9616_s1 + $0x364] ss:$36 sps:$4 sm:$0xff]   ;;  %v6010_v62 = vld [vmem:[%s9616_s1 + $0x31c] ss:$36 sps:$4 sm:$0xff]   ;;  %v6016_v4 = vld [vmem:[%s9616_s1 + $0x2d4] ss:$36 sps:$4 sm:$0xff]   ;;  %p6237_p13 = pneg %p6236_p12 }
  0x28   : > { %9782 = vst [vmem:[#allocation8_spill] sm:$0xff] %v6529_v56  ;;  %1627 = vmatprep.mubr.bf16.mxu0 %v6529_v56  ;;  %v190_v60 = vld [vmem:[%s6441_s9 + $0xa0] sm:$0xff]  ;;  %v6015_v3 = vld [vmem:[%s9616_s1 + $0x318] ss:$36 sps:$4 sm:$0xff]   ;;  %v6031_v5 = vld [vmem:[%s9616_s1 + $0x50] ss:$36 sps:$4 sm:$0xff]  }
  0x29   : > { %1606 = vmatpush1.bf16.msra.mxu0 %v5981_v23  ;;  %v6555_v1 = vpack.c.bf16 %v193_v61, %v190_v60  ;;  %v6036_v6 = vld [vmem:[%s9616_s1 + $0xc] ss:$36 sps:$4 sm:$0xff]   ;;  %v6039_v12 = vld [vmem:[%s9616_s1 + $0x444] ss:$36 sps:$4 sm:$0xff]   ;;  %v6045_v19 = vld [vmem:[%s9616_s1 + $0x3fc] ss:$36 sps:$4 sm:$0xff]  }
  0x2a   : > { %1803 = vmatpush1.bf16.msra.mxu1 %v5982_v24  ;;  %1607 = vmatprep.subr.bf16.mxu0 %v5983_v27  ;;  %v6018_v7 = vld [vmem:[%s9616_s1 + $0x2d0] ss:$36 sps:$4 sm:$0xff]   ;;  %v199_v9 = vld [vmem:[%s6441_s9 + $0xe8] sm:$0xff]  ;;  %v6037_v16 = vld [vmem:[%s9616_s1 + $0x440] ss:$36 sps:$4 sm:$0xff]   ;;  %s6298_s6 = smov [#allocation2]  }
  0x2b   : > { %1981 = vmatprep.subr.bf16.mxu1 %v5987_v28  ;;  %9783 = vst [vmem:[#allocation9_spill] sm:$0xff] %v6555_v1  ;;  %v196_v8 = vld [vmem:[%s6441_s9 + $0xd0] sm:$0xff]  ;;  %v6034_v11 = vld [vmem:[%s9616_s1 + $0x8] ss:$36 sps:$4 sm:$0xff]   ;;  %v6027_v17 = vld [vmem:[%s9616_s1 + $0x240] ss:$36 sps:$4 sm:$0xff]  }
  0x2c   : > { %v6019_v10 = vld [vmem:[%s9616_s1 + $0x28c] ss:$36 sps:$4 sm:$0xff]   ;;  %v6586_v13 = vpack.c.bf16 %v199_v9, %v196_v8  ;;  %v6025_v15 = vld [vmem:[%s9616_s1 + $0x244] ss:$36 sps:$4 sm:$0xff]   ;;  %v173_v20 = vld [vmem:[%s6441_s9 + $0x18] sm:$0xff]  ;;  %s6238_s7 = sshll.u32 %s6298_s6, 4  ;;  %s6239_s7 = int_to_ptr.vmem [resolvable:$false] %s6238_s7 }
  0x2d   : > { %5447 = vmatmul.mubr.msk.bf16.vlgmr.msra.gmra.mxu1 %vm1546_vm0, %v6457_v29  ;;  %1608 = vmatpush1.bf16.msra.mxu0 %v5988_v31  ;;  %v6024_v14 = vld [vmem:[%s9616_s1 + $0x288] ss:$36 sps:$4 sm:$0xff]   ;;  %v170_v18 = vld [vmem:[%s6441_s9] sm:$0xff]  ;;  %v205_v22 = vld [vmem:[%s6441_s9 + $0x118] sm:$0xff]  ;;  %s6240_s8 = scalar_lea.vmem %s6239_s7, 4096  ;;  %p6241_p0 = scmp.lt.s32.totalorder %s9570_s28, %s6239_s7 }
  0x2e   : > { %1982 = vmatpush1.bf16.msra.mxu1 %v5985_v30  ;;  %1609 = vmatprep.subr.bf16.mxu0 %v5989_v32  ;;  %9784 = vst [vmem:[#allocation10_spill] sm:$0xff] %v6586_v13  ;;  %v202_v21 = vld [vmem:[%s6441_s9 + $0x100] sm:$0xff]  ;;  %v177_v23 = vld [vmem:[%s6441_s9 + $0x38] sm:$0xff]  ;;  %v180_v24 = vld [vmem:[%s6441_s9 + $0x50] sm:$0xff]  ;;  %v6621_v28 = vpack.c.bf16 %v173_v20, %v170_v18  ;;  %p6242_p1 = scmp.lt.s32.totalorder %s6240_s8, %s6234_s16 }
  0x2f   : > { %1830 = vmatprep.mubr.bf16.mxu1 %v9659_v2  ;;  %1983 = vmatprep.subr.bf16.mxu1 %v5996_v34  ;;  %v6042_v25 = vld [vmem:[%s9616_s1 + $0x5f4] ss:$36 sps:$4 sm:$0xff]   ;;  %v6623_v30 = vpack.c.bf16 %v205_v22, %v202_v21  ;;  %v6625_v31 = vpack.c.bf16 %v180_v24, %v177_v23  ;;  %v6051_v35 = vld [vmem:[%s9616_s1 + $0x36c] ss:$36 sps:$4 sm:$0xff]   ;;  %v6060_v52 = vld [vmem:[%s9616_s1 + $0x2dc] ss:$36 sps:$4 sm:$0xff]  }
  0x30   : > { %v6043_v26 = vld [vmem:[%s9616_s1 + $0x3f8] ss:$36 sps:$4 sm:$0xff]   ;;  %9785 = vst [vmem:[#allocation11_spill] sm:$0xff] %v6621_v28  ;;  %v6040_v32 = vld [vmem:[%s9616_s1 + $0x5f0] ss:$36 sps:$4 sm:$0xff]   ;;  %v194_v20 = vld [vmem:[%s6441_s9 + $0xc0] sm:$0xff]  ;;  %p6243_p2 = por %p6242_p1, %p6241_p0 }
  0x31   : > { %1610 = vmatpush1.bf16.msra.mxu0 %v5991_v33  ;;  %v6048_v27 = vld [vmem:[%s9616_s1 + $0x3b4] ss:$36 sps:$4 sm:$0xff]   ;;  %9786 = vst [vmem:[#allocation12_spill] sm:$0xff] %v6623_v30  ;;  %9787 = vst [vmem:[#allocation13_spill] sm:$0xff] %v6625_v31  ;;  %v6054_v36 = vld [vmem:[%s9616_s1 + $0x5ac] ss:$36 sps:$4 sm:$0xff]  }
  0x32   : > { %1984 = vmatpush1.bf16.msra.mxu1 %v5994_v37  ;;  %1611 = vmatprep.subr.bf16.mxu0 %v5992_v38  ;;  %v6046_v33 = vld [vmem:[%s9616_s1 + $0x3b0] ss:$36 sps:$4 sm:$0xff]   ;;  %v179_v37 = vld [vmem:[%s6441_s9 + $0x48] sm:$0xff]  ;;  %v6061_v53 = vld [vmem:[%s9616_s1 + $0x560] ss:$36 sps:$4 sm:$0xff]   ;;  %p6244_p3 = pnand %p6243_p2, %p6237_p13 }
  0x33   : > { %1985 = vmatprep.subr.bf16.mxu1 %v6005_v39  ;;  %v176_v34 = vld [vmem:[%s6441_s9 + $0x30] sm:$0xff]  ;;  %v211_v39 = vld [vmem:[%s6441_s9 + $0x148] sm:$0xff]  ;;  %v6058_v61 = vld [vmem:[%s9616_s1 + $0x2d8] ss:$36 sps:$4 sm:$0xff]  }
  0x34   : > { %v208_v38 = vld [vmem:[%s6441_s9 + $0x130] sm:$0xff]  ;;  %v6659_v46 = vpack.c.bf16 %v179_v37, %v176_v34  ;;  %v6073_v9 = vld [vmem:[%s9616_s1 + $0x518] ss:$36 sps:$4 sm:$0xff]   ;;  %v226_v22 = vld [vmem:[%s6441_s9 + $0x1c0] sm:$0xff] }
  0x35   : > { %5448 = vmatmul.mubr.msk.bf16.gmra.mxu1 %vm1546_vm0, %v6488_v40  ;;  %1612 = vmatpush2.bf16.msra.mxu0 %v5997_v41  ;;  %v183_v41 = vld [vmem:[%s6441_s9 + $0x68] sm:$0xff]  ;;  %v6661_v47 = vpack.c.bf16 %v211_v39, %v208_v38  ;;  %v192_v60 = vld [vmem:[%s6441_s9 + $0xb0] sm:$0xff]  ;;  %v197_v21 = vld [vmem:[%s6441_s9 + $0xd8] sm:$0xff] }
  0x36   : > { %1840 = vmatprep.mubr.bf16.mxu1 %v9659_v2  ;;  %1613 = vmatprep.subr.bf16.mxu0 %v5998_v42  ;;  %v186_v42 = vld [vmem:[%s6441_s9 + $0x80] sm:$0xff]  ;;  %v6069_v8 = vld [vmem:[%s9616_s1 + $0x24c] ss:$36 sps:$4 sm:$0xff]   ;;  %v6084_v24 = vld [vmem:[%s9616_s1 + $0x4d4] ss:$36 sps:$4 sm:$0xff]  }
  0x37   : > { %1986 = vmatpush1.bf16.msra.mxu1 %v6003_v43  ;;  %v6049_v43 = vld [vmem:[%s9616_s1 + $0x368] ss:$36 sps:$4 sm:$0xff]   ;;  %9788 = vst [vmem:[#allocation14_spill] sm:$0xff] %v6661_v47  ;;  %v6082_v23 = vld [vmem:[%s9616_s1 + $0x4d0] ss:$36 sps:$4 sm:$0xff]  }
  0x38   : > { %1987 = vmatprep.subr.bf16.mxu1 %v6014_v44  ;;  %v6052_v44 = vld [vmem:[%s9616_s1 + $0x5a8] ss:$36 sps:$4 sm:$0xff]   ;;  %v232_v39 = vld [vmem:[%s6441_s9 + $0x1f0] sm:$0xff] }
  0x39   : > { %1614 = vmatpush2.bf16.msra.mxu0 %v6000_v45  ;;  %v6057_v45 = vld [vmem:[%s9616_s1 + $0x324] ss:$36 sps:$4 sm:$0xff]  }
  0x3a   : > { %1615 = vmatprep.subr.bf16.mxu0 %v6001_v48  ;;  %v6663_v48 = vpack.c.bf16 %v186_v42, %v183_v41  ;;  %v203_v37 = vld [vmem:[%s6441_s9 + $0x108] sm:$0xff] }
  0x3b   : > { %1988 = vmatpush1.bf16.msra.mxu1 %v6012_v49  ;;  %v6055_v49 = vld [vmem:[%s9616_s1 + $0x320] ss:$36 sps:$4 sm:$0xff]   ;;  %v6091_v38 = vld [vmem:[%s9616_s1 + $0x488] ss:$36 sps:$4 sm:$0xff]  }
  0x3c   : > { %1989 = vmatprep.subr.bf16.mxu1 %v6023_v50  ;;  %9789 = vst [vmem:[#allocation15_spill] sm:$0xff] %v6663_v48  ;;  %v6063_v50 = vld [vmem:[%s9616_s1 + $0x564] ss:$36 sps:$4 sm:$0xff]  }
  0x3d   : > { %5449 = vmatmul.mubr.msk.bf16.gmra.mxu1 %vm1546_vm0, %v6519_v51  ;;  %1616 = vmatpush2.bf16.msra.mxu0 %v6006_v54  ;;  %v182_v54 = vld [vmem:[%s6441_s9 + $0x60] sm:$0xff]  ;;  %v235_v41 = vld [vmem:[%s6441_s9 + $0x208] sm:$0xff] }
  0x3e   : > { %1850 = vmatprep.mubr.bf16.mxu1 %v9659_v2  ;;  %1617 = vmatprep.subr.bf16.mxu0 %v6007_v55  ;;  %v185_v55 = vld [vmem:[%s6441_s9 + $0x78] sm:$0xff]  ;;  %v207_v42 = vld [vmem:[%s6441_s9 + $0x128] sm:$0xff] }
  0x3f   : > { %1990 = vmatpush1.bf16.msra.mxu1 %v6021_v57  ;;  %v214_v57 = vld [vmem:[%s6441_s9 + $0x160] sm:$0xff] }
  0x40   : > { %1991 = vmatprep.subr.bf16.mxu1 %v6030_v58  ;;  %v217_v58 = vld [vmem:[%s6441_s9 + $0x178] sm:$0xff] }
  0x41   : > { %1618 = vmatpush2.bf16.msra.mxu0 %v6009_v59  ;;  %v189_v59 = vld [vmem:[%s6441_s9 + $0x98] sm:$0xff] }
  0x42   : > { %1619 = vmatprep.subr.bf16.mxu0 %v6010_v62  ;;  %v6066_v62 = vld [vmem:[%s9616_s1 + $0x294] ss:$36 sps:$4 sm:$0xff]  }
  0x43   : > { %1992 = vmatpush1.bf16.msra.mxu1 %v6028_v63  ;;  %v6694_v63 = vpack.c.bf16 %v185_v55, %v182_v54  ;;  %v238_v54 = vld [vmem:[%s6441_s9 + $0x220] sm:$0xff]  ;;  %v241_v55 = vld [vmem:[%s6441_s9 + $0x238] sm:$0xff] }
  0x44   : > { %1993 = vmatprep.subr.bf16.mxu1 %v6033_v0  ;;  %v6696_v0 = vpack.c.bf16 %v217_v58, %v214_v57  ;;  %v213_v57 = vld [vmem:[%s6441_s9 + $0x158] sm:$0xff]  ;;  %v216_v58 = vld [vmem:[%s6441_s9 + $0x170] sm:$0xff] }
  0x45   : > { %5450 = vmatmul.mubr.msk.bf16.gmra.mxu1 %vm1546_vm0, %v6555_v1  ;;  %1620 = vmatpush2.bf16.msra.mxu0 %v6015_v3  ;;  %v6698_v3 = vpack.c.bf16 %v192_v60, %v189_v59  ;;  %v6797_v60 = vpack.c.bf16 %v241_v55, %v238_v54  ;;  %v240_v54 = vld [vmem:[%s6441_s9 + $0x230] sm:$0xff] }
  0x46   : > { %1860 = vmatprep.mubr.bf16.mxu1 %v9659_v2  ;;  %1621 = vmatprep.subr.bf16.mxu0 %v6016_v4  ;;  %9790 = vst [vmem:[#allocation16_spill] sm:$0xff] %v6696_v0  ;;  %v6064_v4 = vld [vmem:[%s9616_s1 + $0x290] ss:$36 sps:$4 sm:$0xff]  }
  0x47   : > { %1994 = vmatpush1.bf16.msra.mxu1 %v6031_v5  ;;  %9791 = vst [vmem:[#allocation17_spill] sm:$0xff] %v6698_v3  ;;  %v188_v5 = vld [vmem:[%s6441_s9 + $0x90] sm:$0xff]  ;;  %9802 = vst [vmem:[#allocation28_spill] sm:$0xff] %v6797_v60 }
  0x48   : > { %1995 = vmatprep.subr.bf16.mxu1 %v6036_v6  ;;  %v191_v6 = vld [vmem:[%s6441_s9 + $0xa8] sm:$0xff] }
  0x49   : > { %1622 = vmatpush2.bf16.msra.mxu0 %v6018_v7  ;;  %v220_v7 = vld [vmem:[%s6441_s9 + $0x190] sm:$0xff] }
  0x4a   : > { %1623 = vmatprep.subr.bf16.mxu0 %v6019_v10  ;;  %v6075_v10 = vld [vmem:[%s9616_s1 + $0x51c] ss:$36 sps:$4 sm:$0xff]  }
  0x4b   : > { %1996 = vmatpush1.bf16.msra.mxu1 %v6034_v11  ;;  %v223_v11 = vld [vmem:[%s6441_s9 + $0x1a8] sm:$0xff] }
  0x4c   : > { %1997 = vmatprep.subr.bf16.mxu1 %v6039_v12  ;;  %v195_v12 = vld [vmem:[%s6441_s9 + $0xc8] sm:$0xff]  ;;  %v6731_v18 = vpack.c.bf16 %v223_v11, %v220_v7 }
  0x4d   : > { %5451 = vmatmul.mubr.msk.bf16.gmra.mxu1 %vm1546_vm0, %v6586_v13  ;;  %1624 = vmatpush2.bf16.msra.mxu0 %v6024_v14  ;;  %v198_v14 = vld [vmem:[%s6441_s9 + $0xe0] sm:$0xff]  ;;  %v219_v7 = vld [vmem:[%s6441_s9 + $0x188] sm:$0xff] }
  0x4e   : > { %1870 = vmatprep.mubr.bf16.mxu1 %v9659_v2  ;;  %1625 = vmatprep.subr.bf16.mxu0 %v6025_v15  ;;  %v6067_v15 = vld [vmem:[%s9616_s1 + $0x248] ss:$36 sps:$4 sm:$0xff]   ;;  %9793 = vst [vmem:[#allocation19_spill] sm:$0xff] %v6731_v18 }
  0x4f   : > { %1998 = vmatpush2.bf16.msra.mxu1 %v6037_v16  ;;  %v6072_v16 = vld [vmem:[%s9616_s1 + $0x20c] ss:$36 sps:$4 sm:$0xff]  }
  0x50   : > { %1999 = vmatprep.subr.bf16.mxu1 %v6045_v19  ;;  %v6733_v19 = vpack.c.bf16 %v198_v14, %v195_v12  ;;  %v218_v12 = vld [vmem:[%s6441_s9 + $0x180] sm:$0xff]  ;;  %v221_v14 = vld [vmem:[%s6441_s9 + $0x198] sm:$0xff] }
  0x51   : > { %1626 = vmatpush2.bf16.msra.mxu0 %v6027_v17  ;;  %v6729_v17 = vpack.c.bf16 %v191_v6, %v188_v5  ;;  %v244_v5 = vld [vmem:[%s6441_s9 + $0x250] sm:$0xff]  ;;  %v247_v6 = vld [vmem:[%s6441_s9 + $0x268] sm:$0xff] }
  0x52   : > { %2178 = vmatprep.subr.bf16.mxu0 %v6042_v25  ;;  %9794 = vst [vmem:[#allocation20_spill] sm:$0xff] %v6733_v19  ;;  %v229_v25 = vld [vmem:[%s6441_s9 + $0x1d8] sm:$0xff] }
  0x53   : > { %2000 = vmatpush2.bf16.msra.mxu1 %v6043_v26  ;;  %9792 = vst [vmem:[#allocation18_spill] sm:$0xff] %v6729_v17  ;;  %v201_v26 = vld [vmem:[%s6441_s9 + $0xf8] sm:$0xff] }
  0x54   : > { %2001 = vmatprep.subr.bf16.mxu1 %v6048_v27  ;;  %1628 = vmatmul.mubr.bf16.vlgmr.msra.gmra.mxu0 %v6621_v28  ;;  %v204_v27 = vld [vmem:[%s6441_s9 + $0x110] sm:$0xff] }
  0x55   : > { %5452 = vmatmul.mubr.msk.bf16.gmra.mxu1 %vm1546_vm0, %v6623_v30  ;;  %1637 = vmatprep.mubr.bf16.mxu0 %v6625_v31  ;;  %v6756_v34 = vpack.c.bf16 %v204_v27, %v201_v26  ;;  %v227_v26 = vld [vmem:[%s6441_s9 + $0x1c8] sm:$0xff]  ;;  %v256_v27 = vld [vmem:[%s6441_s9 + $0x2b0] sm:$0xff] }
  0x56   : > { %1880 = vmatprep.mubr.bf16.mxu1 %v9659_v2  ;;  %2179 = vmatpush1.bf16.msra.mxu0 %v6040_v32  ;;  %v6752_v32 = vpack.c.bf16 %v197_v21, %v194_v20  ;;  %v225_v20 = vld [vmem:[%s6441_s9 + $0x1b8] sm:$0xff]  ;;  %v228_v21 = vld [vmem:[%s6441_s9 + $0x1d0] sm:$0xff] }
  0x57   : > { %2002 = vmatpush2.bf16.msra.mxu1 %v6046_v33  ;;  %2180 = vmatprep.subr.bf16.mxu0 %v6054_v36  ;;  %v6754_v33 = vpack.c.bf16 %v229_v25, %v226_v22  ;;  %9797 = vst [vmem:[#allocation23_spill] sm:$0xff] %v6756_v34  ;;  %v200_v36 = vld [vmem:[%s6441_s9 + $0xf0] sm:$0xff]  ;;  %v6829_v22 = vpack.c.bf16 %v221_v14, %v218_v12  ;;  %v6078_v14 = vld [vmem:[%s9616_s1 + $0x1c4] ss:$36 sps:$4 sm:$0xff]  }
  0x58   : > { %2003 = vmatprep.subr.bf16.mxu1 %v6051_v35  ;;  %9795 = vst [vmem:[#allocation21_spill] sm:$0xff] %v6752_v32  ;;  %v6093_v35 = vld [vmem:[%s9616_s1 + $0x48c] ss:$36 sps:$4 sm:$0xff]  }
  0x59   : > { %9796 = vst [vmem:[#allocation22_spill] sm:$0xff] %v6754_v33  ;;  %9806 = vst [vmem:[#allocation32_spill] sm:$0xff] %v6829_v22  ;;  %v224_v25 = vld [vmem:[%s6441_s9 + $0x1b0] sm:$0xff] }
  0x5a   : > { %2181 = vmatpush1.bf16.msra.mxu0 %v6052_v44  ;;  %v6775_v44 = vpack.c.bf16 %v203_v37, %v200_v36  ;;  %v231_v36 = vld [vmem:[%s6441_s9 + $0x1e8] sm:$0xff]  ;;  %v234_v37 = vld [vmem:[%s6441_s9 + $0x200] sm:$0xff] }
  0x5b   : > { %2004 = vmatpush2.bf16.msra.mxu1 %v6049_v43  ;;  %2182 = vmatprep.subr.bf16.mxu0 %v6063_v50  ;;  %v210_v43 = vld [vmem:[%s6441_s9 + $0x140] sm:$0xff] }
  0x5c   : > { %2005 = vmatprep.subr.bf16.mxu1 %v6057_v45  ;;  %1638 = vmatmul.mubr.bf16.gmra.mxu0 %v6659_v46  ;;  %9798 = vst [vmem:[#allocation24_spill] sm:$0xff] %v6775_v44  ;;  %v6777_v45 = vpack.c.bf16 %v235_v41, %v232_v39  ;;  %v6782_v50 = vpack.c.bf16 %v210_v43, %v207_v42  ;;  %v230_v42 = vld [vmem:[%s6441_s9 + $0x1e0] sm:$0xff]  ;;  %v233_v43 = vld [vmem:[%s6441_s9 + $0x1f8] sm:$0xff] }
  0x5d   : > { %5453 = vmatmul.mubr.msk.bf16.gmra.mxu1 %vm1546_vm0, %v6661_v47  ;;  %1647 = vmatprep.mubr.bf16.mxu0 %v6663_v48  ;;  %v6850_v41 = vpack.c.bf16 %v234_v37, %v231_v36  ;;  %v6863_v55 = vpack.c.bf16 %v233_v43, %v230_v42  ;;  %v6079_v36 = vld [vmem:[%s9616_s1 + $0x178] ss:$36 sps:$4 sm:$0xff]   ;;  %v248_v42 = vld [vmem:[%s6441_s9 + $0x270] sm:$0xff]  ;;  %v251_v43 = vld [vmem:[%s6441_s9 + $0x288] sm:$0xff] }
  0x5e   : > { %1890 = vmatprep.mubr.bf16.mxu1 %v9659_v2  ;;  %2183 = vmatpush1.bf16.msra.mxu0 %v6061_v53  ;;  %9799 = vst [vmem:[#allocation25_spill] sm:$0xff] %v6777_v45  ;;  %9800 = vst [vmem:[#allocation26_spill] sm:$0xff] %v6782_v50  ;;  %v209_v53 = vld [vmem:[%s6441_s9 + $0x138] sm:$0xff] }
  0x5f   : > { %2006 = vmatpush2.bf16.msra.mxu1 %v6055_v49  ;;  %2184 = vmatprep.subr.bf16.mxu0 %v6075_v10  ;;  %v6108_v49 = vld [vmem:[%s9616_s1 + $0x5fc] ss:$36 sps:$4 sm:$0xff]   ;;  %v6814_v10 = vpack.c.bf16 %v247_v6, %v244_v5  ;;  %9811 = vst [vmem:[#allocation37_spill] sm:$0xff] %v6850_v41  ;;  %9812 = vst [vmem:[#allocation38_spill] sm:$0xff] %v6863_v55  ;;  %v243_v5 = vld [vmem:[%s6441_s9 + $0x248] sm:$0xff] }
  0x60   : > { %2007 = vmatprep.subr.bf16.mxu1 %v6060_v52  ;;  %v206_v52 = vld [vmem:[%s6441_s9 + $0x120] sm:$0xff]  ;;  %v6087_v37 = vld [vmem:[%s9616_s1 + $0x134] ss:$36 sps:$4 sm:$0xff]  }
  0x61   : > { %v6795_v59 = vpack.c.bf16 %v209_v53, %v206_v52  ;;  %v265_v52 = vld [vmem:[%s6441_s9 + $0x2f8] sm:$0xff]  ;;  %v246_v6 = vld [vmem:[%s6441_s9 + $0x260] sm:$0xff] }
  0x62   : > { %2185 = vmatpush1.bf16.msra.mxu0 %v6073_v9  ;;  %v237_v53 = vld [vmem:[%s6441_s9 + $0x218] sm:$0xff]  ;;  %v6883_v12 = vpack.c.bf16 %v246_v6, %v243_v5  ;;  %v6088_v5 = vld [vmem:[%s9616_s1 + $0xe8] ss:$36 sps:$4 sm:$0xff]  }
  0x63   : > { %2008 = vmatpush2.bf16.msra.mxu1 %v6058_v61  ;;  %2186 = vmatprep.subr.bf16.mxu0 %v6084_v24  ;;  %9801 = vst [vmem:[#allocation27_spill] sm:$0xff] %v6795_v59  ;;  %v6799_v61 = vpack.c.bf16 %v216_v58, %v213_v57  ;;  %v6833_v24 = vpack.c.bf16 %v228_v21, %v225_v20  ;;  %v6076_v20 = vld [vmem:[%s9616_s1 + $0x1c0] ss:$36 sps:$4 sm:$0xff]   ;;  %v249_v21 = vld [vmem:[%s6441_s9 + $0x278] sm:$0xff] }
  0x64   : > { %2009 = vmatprep.subr.bf16.mxu1 %v6066_v62  ;;  %1648 = vmatmul.mubr.bf16.gmra.mxu0 %v6694_v63  ;;  %v212_v62 = vld [vmem:[%s6441_s9 + $0x150] sm:$0xff]  ;;  %v6867_v58 = vpack.c.bf16 %v240_v54, %v237_v53  ;;  %9816 = vst [vmem:[#allocation42_spill] sm:$0xff] %v6883_v12  ;;  %v6096_v6 = vld [vmem:[%s9616_s1 + $0xa4] ss:$36 sps:$4 sm:$0xff]  }
  0x65   : > { %5454 = vmatmul.mubr.msk.bf16.gmra.mxu1 %vm1546_vm0, %v6696_v0  ;;  %1657 = vmatprep.mubr.bf16.mxu0 %v6698_v3  ;;  %9803 = vst [vmem:[#allocation29_spill] sm:$0xff] %v6799_v61  ;;  %9808 = vst [vmem:[#allocation34_spill] sm:$0xff] %v6833_v24  ;;  %v6085_v53 = vld [vmem:[%s9616_s1 + $0x130] ss:$36 sps:$4 sm:$0xff]  }
  0x66   : > { %1900 = vmatprep.mubr.bf16.mxu1 %v9659_v2  ;;  %2187 = vmatpush1.bf16.msra.mxu0 %v6082_v23  ;;  %9814 = vst [vmem:[#allocation40_spill] sm:$0xff] %v6867_v58  ;;  %v6090_v54 = vld [vmem:[%s9616_s1 + $0xec] ss:$36 sps:$4 sm:$0xff]  }
  0x67   : > { %2010 = vmatpush2.bf16.msra.mxu1 %v6064_v4  ;;  %2188 = vmatprep.subr.bf16.mxu0 %v6093_v35  ;;  %v215_v4 = vld [vmem:[%s6441_s9 + $0x168] sm:$0xff] }
  0x68   : > { %2011 = vmatprep.subr.bf16.mxu1 %v6069_v8  ;;  %v222_v8 = vld [vmem:[%s6441_s9 + $0x1a0] sm:$0xff]  ;;  %v6812_v9 = vpack.c.bf16 %v215_v4, %v212_v62  ;;  %v259_v35 = vld [vmem:[%s6441_s9 + $0x2c8] sm:$0xff]  ;;  %v236_v62 = vld [vmem:[%s6441_s9 + $0x210] sm:$0xff] }
  0x69   : > { %v6816_v11 = vpack.c.bf16 %v222_v8, %v219_v7  ;;  %v6848_v39 = vpack.c.bf16 %v259_v35, %v256_v27  ;;  %v239_v4 = vld [vmem:[%s6441_s9 + $0x228] sm:$0xff] }
  0x6a   : > { %2189 = vmatpush1.bf16.msra.mxu0 %v6091_v38  ;;  %9804 = vst [vmem:[#allocation30_spill] sm:$0xff] %v6812_v9  ;;  %v6846_v38 = vpack.c.bf16 %v227_v26, %v224_v25  ;;  %v6878_v7 = vpack.c.bf16 %v239_v4, %v236_v62  ;;  %v6070_v8 = vld [vmem:[%s9616_s1 + $0x208] ss:$36 sps:$4 sm:$0xff]   ;;  %v252_v25 = vld [vmem:[%s6441_s9 + $0x290] sm:$0xff]  ;;  %v6081_v26 = vld [vmem:[%s9616_s1 + $0x17c] ss:$36 sps:$4 sm:$0xff]   ;;  %v6926_v62 = vpack.c.bf16 %v251_v43, %v248_v42 }
  0x6b   : > { %2012 = vmatpush2.bf16.msra.mxu1 %v6067_v15  ;;  %2564 = vmatprep.subr.bf16.mxu0 %v6108_v49  ;;  %9805 = vst [vmem:[#allocation31_spill] sm:$0xff] %v6816_v11  ;;  %v250_v15 = vld [vmem:[%s6441_s9 + $0x280] sm:$0xff]  ;;  %9810 = vst [vmem:[#allocation36_spill] sm:$0xff] %v6848_v39  ;;  %v6904_v35 = vpack.c.bf16 %v252_v25, %v249_v21  ;;  %v260_v42 = vld [vmem:[%s6441_s9 + $0x2d0] sm:$0xff] }
  0x6c   : > { %2367 = vmatprep.subr.bf16.mxu1 %v6072_v16  ;;  %1658 = vmatmul.mubr.bf16.gmra.mxu0 %v6729_v17  ;;  %v253_v16 = vld [vmem:[%s6441_s9 + $0x298] sm:$0xff]  ;;  %9809 = vst [vmem:[#allocation35_spill] sm:$0xff] %v6846_v38  ;;  %v262_v49 = vld [vmem:[%s6441_s9 + $0x2e0] sm:$0xff]  ;;  %9815 = vst [vmem:[#allocation41_spill] sm:$0xff] %v6878_v7 }
  0x6d   : > { %5455 = vmatmul.mubr.msk.bf16.gmra.mxu1 %vm1546_vm0, %v6731_v18  ;;  %1667 = vmatprep.mubr.bf16.mxu0 %v6733_v19  ;;  %v6831_v23 = vpack.c.bf16 %v253_v16, %v250_v15  ;;  %v6865_v57 = vpack.c.bf16 %v265_v52, %v262_v49  ;;  %v242_v15 = vld [vmem:[%s6441_s9 + $0x240] sm:$0xff]  ;;  %v245_v16 = vld [vmem:[%s6441_s9 + $0x258] sm:$0xff]  ;;  %9818 = vst [vmem:[#allocation44_spill] sm:$0xff] %v6904_v35  ;;  %v255_v49 = vld [vmem:[%s6441_s9 + $0x2a8] sm:$0xff] }
  0x6e   : > { %1910 = vmatprep.mubr.bf16.mxu1 %v9659_v2  ;;  %v6902_v27 = vpack.c.bf16 %v245_v16, %v242_v15  ;;  %v258_v52 = vld [vmem:[%s6441_s9 + $0x2c0] sm:$0xff]  ;;  %9819 = vst [vmem:[#allocation45_spill] sm:$0xff] %v6926_v62  ;;  %v261_v15 = vld [vmem:[%s6441_s9 + $0x2d8] sm:$0xff]  ;;  %v264_v16 = vld [vmem:[%s6441_s9 + $0x2f0] sm:$0xff] }
  0x6f   : > { %9807 = vst [vmem:[#allocation33_spill] sm:$0xff] %v6831_v23  ;;  %9813 = vst [vmem:[#allocation39_spill] sm:$0xff] %v6865_v57  ;;  %v6928_v4 = vpack.c.bf16 %v258_v52, %v255_v49  ;;  %v6099_v21 = vld [vmem:[%s9616_s1 + $0x5c] ss:$36 sps:$4 sm:$0xff]   ;;  %v263_v43 = vld [vmem:[%s6441_s9 + $0x2e8] sm:$0xff] }
  0x70   : > { %9817 = vst [vmem:[#allocation43_spill] sm:$0xff] %v6902_v27  ;;  %v6100_v49 = vld [vmem:[%s9616_s1 + $0x10] ss:$36 sps:$4 sm:$0xff]  }
  0x71   : > { %9820 = vst [vmem:[#allocation46_spill] sm:$0xff] %v6928_v4  ;;  %v6105_v52 = vld [vmem:[%s9616_s1 + $0x44c] ss:$36 sps:$4 sm:$0xff]  }
  0x74   : > { %1668 = vmatmul.mubr.bf16.gmra.mxu0 %v6752_v32 }
  0x75   : > { %5456 = vmatmul.mubr.msk.bf16.gmra.mxu1 %vm1546_vm0, %v6754_v33  ;;  %1677 = vmatprep.mubr.bf16.mxu0 %v6756_v34 }
  0x76   : > { %1920 = vmatprep.mubr.bf16.mxu1 %v9659_v2 }
  0x7c   : > { %1678 = vmatmul.mubr.bf16.gmra.mxu0 %v6775_v44 }
  0x7d   : > { %5457 = vmatmul.mubr.msk.bf16.gmra.mxu1 %vm1546_vm0, %v6777_v45  ;;  %1687 = vmatprep.mubr.bf16.mxu0 %v6782_v50 }
  0x7e   : > { %1930 = vmatprep.mubr.bf16.mxu1 %v9659_v2 }
  0x84   : > { %1688 = vmatmul.mubr.bf16.gmra.mxu0 %v6795_v59 }
  0x85   : > { %5458 = vmatmul.mubr.msk.bf16.gmra.mxu1 %vm1546_vm0, %v6797_v60  ;;  %1697 = vmatprep.mubr.bf16.mxu0 %v6799_v61 }
  0x86   : > { %1940 = vmatprep.mubr.bf16.mxu1 %v9659_v2 }
  0x8c   : > { %1698 = vmatmul.mubr.bf16.gmra.mxu0 %v6812_v9 }
  0x8d   : > { %5459 = vmatmul.mubr.msk.bf16.gmra.mxu1 %vm1546_vm0, %v6814_v10  ;;  %1707 = vmatprep.mubr.bf16.mxu0 %v6816_v11 }
  0x8e   : > { %1950 = vmatprep.mubr.bf16.mxu1 %v9659_v2 }
  0x94   : > { %1708 = vmatmul.mubr.bf16.gmra.mxu0 %v6829_v22 }
  0x95   : > { %5460 = vmatmul.mubr.msk.bf16.gmra.mxu1 %vm1546_vm0, %v6831_v23  ;;  %1717 = vmatprep.mubr.bf16.mxu0 %v6833_v24 }
  0x96   : > { %1960 = vmatprep.mubr.bf16.mxu1 %v9659_v2 }
  0x9c   : > { %1718 = vmatmul.mubr.bf16.gmra.mxu0 %v6846_v38 }
  0x9d   : > { %5461 = vmatmul.mubr.msk.bf16.gmra.mxu1 %vm1546_vm0, %v6848_v39  ;;  %1727 = vmatprep.mubr.bf16.mxu0 %v6850_v41 }
  0x9e   : > { %1970 = vmatprep.mubr.bf16.mxu1 %v9659_v2 }
  0xa4   : > { %1728 = vmatmul.mubr.bf16.gmra.mxu0 %v6863_v55 }
  0xa5   : > { %5462 = vmatmul.mubr.msk.bf16.gmra.mxu1 %vm1546_vm0, %v6865_v57  ;;  %1737 = vmatprep.mubr.bf16.mxu0 %v6867_v58 }
  0xa6   : > { %2013 = vmatprep.mubr.bf16.mxu1 %v6529_v56 }
  0xac   : > { %1738 = vmatmul.mubr.bf16.gmra.mxu0 %v6878_v7 }
  0xad   : > { %2014 = vmatmul.mubr.bf16.vlgmr.msra.gmra.mxu1 %v6621_v28  ;;  %1747 = vmatprep.mubr.bf16.mxu0 %v6883_v12 }
  0xae   : > { %2368 = vmatpush1.bf16.msra.mxu1 %v6070_v8  ;;  %2023 = vmatprep.mubr.bf16.mxu1 %v6625_v31  ;;  %v254_v8 = vld [vmem:[%s6441_s9 + $0x2a0] sm:$0xff] }
  0xaf   : > { %2369 = vmatprep.subr.bf16.mxu1 %v6078_v14  ;;  %v257_v14 = vld [vmem:[%s6441_s9 + $0x2b8] sm:$0xff] }
  0xb0   : > { %v6950_v25 = vpack.c.bf16 %v257_v14, %v254_v8  ;;  %v6114_v8 = vld [vmem:[%s9616_s1 + $0x3bc] ss:$36 sps:$4 sm:$0xff]  }
  0xb1   : > { %v6106_v14 = vld [vmem:[%s9616_s1 + $0x5f8] ss:$36 sps:$4 sm:$0xff]  }
  0xb2   : > { %2370 = vmatpush1.bf16.msra.mxu1 %v6076_v20  ;;  %v6094_v20 = vld [vmem:[%s9616_s1 + $0xa0] ss:$36 sps:$4 sm:$0xff]   ;;  %9821 = vst [vmem:[#allocation47_spill] sm:$0xff] %v6950_v25 }
  0xb3   : > { %2371 = vmatprep.subr.bf16.mxu1 %v6081_v26  ;;  %v6952_v26 = vpack.c.bf16 %v264_v16, %v261_v15  ;;  %v6112_v15 = vld [vmem:[%s9616_s1 + $0x3b8] ss:$36 sps:$4 sm:$0xff]  }
  0xb4   : > { %1748 = vmatmul.mubr.bf16.gmra.mxu0 %v6902_v27  ;;  %v6117_v16 = vld [vmem:[%s9616_s1 + $0x374] ss:$36 sps:$4 sm:$0xff]  }
  0xb5   : > { %2024 = vmatmul.mubr.bf16.gmra.mxu1 %v6659_v46  ;;  %1757 = vmatprep.mubr.bf16.mxu0 %v6904_v35  ;;  %9822 = vst [vmem:[#allocation48_spill] sm:$0xff] %v6952_v26 }
  0xb6   : > { %2033 = vmatprep.mubr.bf16.mxu1 %v6663_v48  ;;  %2372 = vmatpush1.bf16.msra.mxu1 %v6079_v36  ;;  %v6097_v36 = vld [vmem:[%s9616_s1 + $0x58] ss:$36 sps:$4 sm:$0xff]  }
  0xb7   : > { %2373 = vmatprep.subr.bf16.mxu1 %v6087_v37  ;;  %v6102_v37 = vld [vmem:[%s9616_s1 + $0x14] ss:$36 sps:$4 sm:$0xff]  }
  0xba   : > { %2374 = vmatpush1.bf16.msra.mxu1 %v6085_v53  ;;  %v6972_v53 = vpack.c.bf16 %v263_v43, %v260_v42  ;;  %v6129_v42 = vld [vmem:[%s9616_s1 + $0x56c] ss:$36 sps:$4 sm:$0xff]  }
  0xbb   : > { %2375 = vmatprep.subr.bf16.mxu1 %v6090_v54  ;;  %v6103_v54 = vld [vmem:[%s9616_s1 + $0x448] ss:$36 sps:$4 sm:$0xff]  }
  0xbc   : > { %1758 = vmatmul.mubr.bf16.gmra.mxu0 %v6926_v62  ;;  %9823 = vst [vmem:[#allocation49_spill] sm:$0xff] %v6972_v53  ;;  %v6121_v43 = vld [vmem:[%s9616_s1 + $0x328] ss:$36 sps:$4 sm:$0xff]  }
  0xbd   : > { %2034 = vmatmul.mubr.bf16.gmra.mxu1 %v6694_v63  ;;  %1767 = vmatprep.mubr.bf16.mxu0 %v6928_v4 }
  0xbe   : > { %2043 = vmatprep.mubr.bf16.mxu1 %v6698_v3  ;;  %2376 = vmatpush1.bf16.msra.mxu1 %v6088_v5  ;;  %v6111_v5 = vld [vmem:[%s9616_s1 + $0x404] ss:$36 sps:$4 sm:$0xff]  }
  0xbf   : > { %2377 = vmatprep.subr.bf16.mxu1 %v6096_v6  ;;  %v6109_v6 = vld [vmem:[%s9616_s1 + $0x400] ss:$36 sps:$4 sm:$0xff]  }
  0xc2   : > { %2378 = vmatpush1.bf16.msra.mxu1 %v6094_v20  ;;  %v6120_v20 = vld [vmem:[%s9616_s1 + $0x5b4] ss:$36 sps:$4 sm:$0xff]  }
  0xc3   : > { %2379 = vmatprep.subr.bf16.mxu1 %v6099_v21  ;;  %v6115_v21 = vld [vmem:[%s9616_s1 + $0x370] ss:$36 sps:$4 sm:$0xff]  }
  0xc4   : > { %1768 = vmatmul.mubr.bf16.gmra.mxu0 %v6950_v25 }
  0xc5   : > { %2044 = vmatmul.mubr.bf16.gmra.mxu1 %v6729_v17  ;;  %1777 = vmatprep.mubr.bf16.mxu0 %v6952_v26 }
  0xc6   : > { %2053 = vmatprep.mubr.bf16.mxu1 %v6733_v19  ;;  %2380 = vmatpush1.bf16.msra.mxu1 %v6097_v36  ;;  %v6118_v36 = vld [vmem:[%s9616_s1 + $0x5b0] ss:$36 sps:$4 sm:$0xff]  }
  0xc7   : > { %2381 = vmatprep.subr.bf16.mxu1 %v6102_v37  ;;  %v6123_v37 = vld [vmem:[%s9616_s1 + $0x32c] ss:$36 sps:$4 sm:$0xff]  }
  0xca   : > { %2382 = vmatpush1.bf16.msra.mxu1 %v6100_v49  ;;  %v6127_v49 = vld [vmem:[%s9616_s1 + $0x568] ss:$36 sps:$4 sm:$0xff]  }
  0xcb   : > { %2383 = vmatprep.subr.bf16.mxu1 %v6105_v52  ;;  %v6126_v52 = vld [vmem:[%s9616_s1 + $0x2e4] ss:$36 sps:$4 sm:$0xff]  }
  0xcc   : > { %1778 = vmatmul.mubr.bf16.gmra.mxu0 %v6972_v53 }
  0xcd   : > { %2054 = vmatmul.mubr.bf16.gmra.mxu1 %v6752_v32  ;;  %2206 = vmatprep.mubr.bf16.mxu0 %v9659_v2 }
  0xce   : > { %2063 = vmatprep.mubr.bf16.mxu1 %v6756_v34  ;;  %2384 = vmatpush2.bf16.msra.mxu1 %v6103_v54  ;;  %v6141_v54 = vld [vmem:[%s9616_s1 + $0x524] ss:$36 sps:$4 sm:$0xff]  }
  0xcf   : > { %2385 = vmatprep.subr.bf16.mxu1 %v6111_v5  ;;  %v6124_v5 = vld [vmem:[%s9616_s1 + $0x2e0] ss:$36 sps:$4 sm:$0xff]  }
  0xd2   : > { %2386 = vmatpush2.bf16.msra.mxu1 %v6109_v6  ;;  %v6139_v6 = vld [vmem:[%s9616_s1 + $0x520] ss:$36 sps:$4 sm:$0xff]  }
  0xd3   : > { %2387 = vmatprep.subr.bf16.mxu1 %v6114_v8  ;;  %v6132_v8 = vld [vmem:[%s9616_s1 + $0x29c] ss:$36 sps:$4 sm:$0xff]  }
  0xd4   : > { %5463 = vmatmul.mubr.msk.bf16.vlgmr.msra.gmra.mxu0 %vm1546_vm0, %v6457_v29 }
  0xd5   : > { %2064 = vmatmul.mubr.bf16.gmra.mxu1 %v6775_v44  ;;  %2216 = vmatprep.mubr.bf16.mxu0 %v9659_v2 }
  0xd6   : > { %2073 = vmatprep.mubr.bf16.mxu1 %v6782_v50  ;;  %2565 = vmatpush1.bf16.msra.mxu0 %v6106_v14  ;;  %v6150_v14 = vld [vmem:[%s9616_s1 + $0x4dc] ss:$36 sps:$4 sm:$0xff]  }
  0xd7   : > { %2388 = vmatpush2.bf16.msra.mxu1 %v6112_v15  ;;  %2566 = vmatprep.subr.bf16.mxu0 %v6120_v20  ;;  %v6130_v15 = vld [vmem:[%s9616_s1 + $0x298] ss:$36 sps:$4 sm:$0xff]  }
  0xd8   : > { %2389 = vmatprep.subr.bf16.mxu1 %v6117_v16  ;;  %v6148_v16 = vld [vmem:[%s9616_s1 + $0x4d8] ss:$36 sps:$4 sm:$0xff]  }
  0xd9   : > { %v6135_v20 = vld [vmem:[%s9616_s1 + $0x254] ss:$36 sps:$4 sm:$0xff]  }
  0xda   : > { %2567 = vmatpush1.bf16.msra.mxu0 %v6118_v36  ;;  %v6133_v36 = vld [vmem:[%s9616_s1 + $0x250] ss:$36 sps:$4 sm:$0xff]  }
  0xdb   : > { %2390 = vmatpush2.bf16.msra.mxu1 %v6115_v21  ;;  %2568 = vmatprep.subr.bf16.mxu0 %v6129_v42  ;;  %v6159_v21 = vld [vmem:[%s9616_s1 + $0x494] ss:$36 sps:$4 sm:$0xff]  }
  0xdc   : > { %2391 = vmatprep.subr.bf16.mxu1 %v6123_v37  ;;  %5464 = vmatmul.mubr.msk.bf16.gmra.mxu0 %vm1546_vm0, %v6488_v40  ;;  %v6157_v37 = vld [vmem:[%s9616_s1 + $0x490] ss:$36 sps:$4 sm:$0xff]  }
  0xdd   : > { %2074 = vmatmul.mubr.bf16.gmra.mxu1 %v6795_v59  ;;  %2226 = vmatprep.mubr.bf16.mxu0 %v9659_v2  ;;  %v6138_v42 = vld [vmem:[%s9616_s1 + $0x214] ss:$36 sps:$4 sm:$0xff]  }
  0xde   : > { %2083 = vmatprep.mubr.bf16.mxu1 %v6799_v61  ;;  %2569 = vmatpush1.bf16.msra.mxu0 %v6127_v49 }
  0xdf   : > { %2392 = vmatpush2.bf16.msra.mxu1 %v6121_v43  ;;  %2570 = vmatprep.subr.bf16.mxu0 %v6141_v54 }
  0xe0   : > { %2393 = vmatprep.subr.bf16.mxu1 %v6126_v52 }
  0xe2   : > { %2571 = vmatpush1.bf16.msra.mxu0 %v6139_v6 }
  0xe3   : > { %2394 = vmatpush2.bf16.msra.mxu1 %v6124_v5  ;;  %2572 = vmatprep.subr.bf16.mxu0 %v6150_v14 }
  0xe4   : > { %2395 = vmatprep.subr.bf16.mxu1 %v6132_v8  ;;  %5465 = vmatmul.mubr.msk.bf16.gmra.mxu0 %vm1546_vm0, %v6519_v51  ;;  %v6174_v8 = vld [vmem:[%s9616_s1 + $0x604] ss:$36 sps:$4 sm:$0xff]  }
  0xe5   : > { %2084 = vmatmul.mubr.bf16.gmra.mxu1 %v6812_v9  ;;  %2236 = vmatprep.mubr.bf16.mxu0 %v9659_v2 }
  0xe6   : > { %2093 = vmatprep.mubr.bf16.mxu1 %v6816_v11  ;;  %2573 = vmatpush1.bf16.msra.mxu0 %v6148_v16 }
  0xe7   : > { %2396 = vmatpush2.bf16.msra.mxu1 %v6130_v15  ;;  %2574 = vmatprep.subr.bf16.mxu0 %v6159_v21 }
  0xe8   : > { %2397 = vmatprep.subr.bf16.mxu1 %v6135_v20 }
  0xea   : > { %2575 = vmatpush1.bf16.msra.mxu0 %v6157_v37 }
  0xeb   : > { %2398 = vmatpush2.bf16.msra.mxu1 %v6133_v36  ;;  %2950 = vmatprep.subr.bf16.mxu0 %v6174_v8 }
  0xec   : > { %2753 = vmatprep.subr.bf16.mxu1 %v6138_v42  ;;  %5466 = vmatmul.mubr.msk.bf16.gmra.mxu0 %vm1546_vm0, %v6555_v1 }
  0xed   : > { %v1822_v43 = vpop.f32.mrf.mxu1  ;;  %2094 = vmatmul.mubr.bf16.gmra.mxu1 %v6829_v22  ;;  %2246 = vmatprep.mubr.bf16.mxu0 %v9659_v2 }
  0xee   : > { %2103 = vmatprep.mubr.bf16.mxu1 %v6833_v24 }
  0xef   : > { %v1824_v49 = vpop.f32.mrf.mxu1 }
  0xf1   : > { %v1826_v52 = vpop.f32.mrf.mxu1 }
  0xf3   : > { %v1828_v54 = vpop.f32.mrf.mxu1 }
  0xf4   : > { %5467 = vmatmul.mubr.msk.bf16.gmra.mxu0 %vm1546_vm0, %v6586_v13 }
  0xf5   : > { %v7079_v5 = vpop.f32.mrf.mxu1  ;;  %2104 = vmatmul.mubr.bf16.gmra.mxu1 %v6846_v38  ;;  %2256 = vmatprep.mubr.bf16.mxu0 %v9659_v2 }
  0xf6   : > { %2113 = vmatprep.mubr.bf16.mxu1 %v6850_v41 }
  0xf7   : > { %v7086_v6 = vpop.f32.mrf.mxu1 }
  0xf9   : > { %v7091_v14 = vpop.f32.mrf.mxu1 }
  0xfb   : > { %v7093_v15 = vpop.f32.mrf.mxu1 }
  0xfc   : > { %5468 = vmatmul.mubr.msk.bf16.gmra.mxu0 %vm1546_vm0, %v6623_v30 }
  0xfd   : > { %v7095_v16 = vpop.f32.mrf.mxu1  ;;  %2114 = vmatmul.mubr.bf16.gmra.mxu1 %v6863_v55  ;;  %2266 = vmatprep.mubr.bf16.mxu0 %v9659_v2 }
  0xfe   : > { %2123 = vmatprep.mubr.bf16.mxu1 %v6867_v58 }
  0xff   : > { %v7102_v20 = vpop.f32.mrf.mxu1 }
 0x101   : > { %v7104_v21 = vpop.f32.mrf.mxu1 }
 0x103   : > { %v7106_v36 = vpop.f32.mrf.mxu1 }
 0x104   : > { %5469 = vmatmul.mubr.msk.bf16.gmra.mxu0 %vm1546_vm0, %v6661_v47 }
 0x105   : > { %v7108_v37 = vpop.f32.mrf.mxu1  ;;  %2124 = vmatmul.mubr.bf16.gmra.mxu1 %v6878_v7  ;;  %2276 = vmatprep.mubr.bf16.mxu0 %v9659_v2  ;;  %v3461_v7 = vlaneseq }
 0x106   : > { %2133 = vmatprep.mubr.bf16.mxu1 %v6883_v12 }
 0x107   : > { %v7115_v42 = vpop.f32.mrf.mxu1  ;;  %v7132_v55 = vshrl.u32 %v3461_v7, 7 }
 0x109   : > { %v7117_v8 = vpop.f32.mrf.mxu1  ;;  %vm3949_vm1 = vcmp.lt.s32.totalorder %v7132_v55, 1 }
 0x10b   : > { %v7119_v58 = vpop.f32.mrf.mxu1 }
 0x10c   : > { %5470 = vmatmul.mubr.msk.bf16.gmra.mxu0 %vm1546_vm0, %v6696_v0 }
 0x10d   : > { %v7121_v30 = vpop.f32.mrf.mxu1  ;;  %2134 = vmatmul.mubr.bf16.gmra.mxu1 %v6902_v27  ;;  %2286 = vmatprep.mubr.bf16.mxu0 %v9659_v2 }
 0x10e   : > { %2143 = vmatprep.mubr.bf16.mxu1 %v6904_v35  ;;  %v3466_v35 = vadd.s32 32, %v7132_v55 }
 0x10f   : > { %v7128_v12 = vpop.f32.mrf.mxu1 }
 0x111   : > { %v7130_v47 = vpop.f32.mrf.mxu1 }
 0x113   : > { %v7134_v41 = vpop.f32.mrf.mxu1 }
 0x114   : > { %v1629_v13 = vpop.f32.mrf.mxu0  ;;  %5471 = vmatmul.mubr.msk.bf16.gmra.mxu0 %vm1546_vm0, %v6731_v18 }
 0x115   : > { %v7136_v38 = vpop.f32.mrf.mxu1  ;;  %2144 = vmatmul.mubr.bf16.gmra.mxu1 %v6926_v62  ;;  %v7142_v0 = vadd.f32 %v1822_v43, %v1629_v13  ;;  %2296 = vmatprep.mubr.bf16.mxu0 %v9659_v2  ;;  %v3498_v62 = vand.u32 15, %v3466_v35  ;;  %v7159_v2 = vld [vmem:[%s9617_s2] ss:$0 sm:$0xff]  ;;  %v9826_v35 = vmov 0  }
 0x116   : > { %2153 = vmatprep.mubr.bf16.mxu1 %v6928_v4  ;;  %v1631_v7 = vpop.f32.mrf.mxu0 }
 0x117   : > { %9824 = vst [vmem:[#allocation50_spill] sm:$0xff] %v7142_v0  ;;  %v7146_v27 = vpop.f32.mrf.mxu1  ;;  %v7148_v24 = vadd.f32 %v1824_v49, %v1631_v7  ;;  %v9668_v13 = vrot.slane %v7142_v0, 7  ;;  %vm3530_vm2 = vcmp.ne.s32.totalorder %v3498_v62, 0 }
 0x118   : > { %v1633_v1 = vpop.f32.mrf.mxu0 }
 0x119   : > { %9825 = vst [vmem:[#allocation51_spill] sm:$0xff] %v7148_v24  ;;  %v7150_v22 = vpop.f32.mrf.mxu1  ;;  %v1827_v11 = vadd.f32 %v1826_v52, %v1633_v1  ;;  %v3468_v1 = vadd.s32 48, %v7132_v55  ;;  %v9675_v24 = vmov 0.0  }
 0x11a   : > { %v1635_v18 = vpop.f32.mrf.mxu0  ;;  %v7179_v0 = vsel %vm3530_vm2, 1.0, %v9675_v24 }
 0x11b   : > { %v7153_v51 = vpop.f32.mrf.mxu1  ;;  %v3918_v43 = vrot.slane %v1827_v11, 7  ;;  %v1829_v4 = vadd.f32 %v1828_v54, %v1635_v18  ;;  %9827 = vst [vmem:[#allocation52_spill] sm:$0xff] %v7179_v0 }
 0x11c   : > { %v1639_v49 = vpop.f32.mrf.mxu0  ;;  %5472 = vmatmul.mubr.msk.bf16.gmra.mxu0 %vm1546_vm0, %v6754_v33 }
 0x11d   : > { %v7161_v7 = vpop.f32.mrf.mxu1  ;;  %2154 = vmatmul.mubr.bf16.gmra.mxu1 %v6950_v25  ;;  %v3980_v18 = vsel %vm3949_vm1, %v9668_v13, %v3918_v43  ;;  %v1833_v11 = vadd.f32 %v7079_v5, %v1639_v49  ;;  %2306 = vmatprep.mubr.bf16.mxu0 %v9826_v35  ;;  %v3500_v49 = vand.u32 15, %v3468_v1 }
 0x11e   : > { %2163 = vmatprep.mubr.bf16.mxu1 %v6952_v26  ;;  %v4049_v52 = vadd.f32 %v7159_v2, %v3980_v18  ;;  %v1641_v54 = vpop.f32.mrf.mxu0 }
 0x11f   : > { %v7175_v25 = vpop.f32.mrf.mxu1  ;;  %v3919_v33 = vrot.slane %v1833_v11, 7  ;;  %v1835_v62 = vadd.f32 %v7086_v6, %v1641_v54  ;;  %vm3532_vm3 = vcmp.ne.s32.totalorder %v3500_v49, 0 }
 0x120   : > { %v7181_v9 = vadd.f32 %v4049_v52, %v1829_v4  ;;  %v1643_v13 = vpop.f32.mrf.mxu0 }
 0x121   : > { %v7183_v5 = vpop.f32.mrf.mxu1  ;;  %v3979_v26 = vsel %vm3949_vm1, %v3918_v43, %v3919_v33  ;;  %v1837_v18 = vadd.f32 %v7091_v14, %v1643_v13  ;;  %v3470_v14 = vadd.s32 64, %v7132_v55 }
 0x122   : > { %9828 = vst [vmem:[#allocation53_spill] sm:$0xff] %v7181_v9  ;;  %v4018_v61 = vmul.f32 %v7179_v0, %v3979_v26  ;;  %v1645_v11 = vpop.f32.mrf.mxu0 }
 0x123   : > { %v7189_v40 = vpop.f32.mrf.mxu1  ;;  %v3920_v6 = vrot.slane %v1837_v18, 7  ;;  %v1839_v54 = vadd.f32 %v7093_v15, %v1645_v11  ;;  %v9829_v11 = vmov 0.0   ;;  %v3502_v9 = vand.u32 15, %v3470_v14 }
 0x124   : > { %v4050_v4 = vadd.f32 %v7159_v2, %v4018_v61  ;;  %v1649_v52 = vpop.f32.mrf.mxu0  ;;  %5473 = vmatmul.mubr.msk.bf16.gmra.mxu0 %vm1546_vm0, %v6777_v45  ;;  %v7211_v0 = vsel %vm3532_vm3, 1.0, %v9829_v11 }
 0x125   : > { %v7193_v24 = vpop.f32.mrf.mxu1  ;;  %2164 = vmatmul.mubr.bf16.gmra.mxu1 %v6972_v53  ;;  %v3978_v26 = vsel %vm3949_vm1, %v3919_v33, %v3920_v6  ;;  %v1843_v13 = vadd.f32 %v7095_v16, %v1649_v52  ;;  %2316 = vmatprep.mubr.bf16.mxu0 %v9826_v35  ;;  %9830 = vst [vmem:[#allocation54_spill] sm:$0xff] %v7211_v0  ;;  %vm7236_vm4 = vcmp.ne.s32.totalorder %v3502_v9, 0 }
 0x126   : > { %2399 = vmatprep.mubr.bf16.mxu1 %v6529_v56  ;;  %v7204_v61 = vadd.f32 %v4050_v4, %v1835_v62  ;;  %v4051_v15 = vadd.f32 %v7159_v2, %v3978_v26  ;;  %v1651_v43 = vpop.f32.mrf.mxu0  ;;  %v6136_v26 = vld [vmem:[%s9616_s1 + $0x210] ss:$36 sps:$4 sm:$0xff]  }
 0x127   : > { %v7207_v1 = vpop.f32.mrf.mxu1  ;;  %v3921_v18 = vrot.slane %v1843_v13, 7  ;;  %v1845_v49 = vadd.f32 %v7102_v20, %v1651_v43 }
 0x128   : > { %v7213_v33 = vadd.f32 %v4051_v15, %v1839_v54  ;;  %v1653_v16 = vpop.f32.mrf.mxu0  ;;  %v6144_v54 = vld [vmem:[%s9616_s1 + $0x1cc] ss:$36 sps:$4 sm:$0xff]  }
 0x129   : > { %v7215_v52 = vpop.f32.mrf.mxu1  ;;  %v3977_v62 = vsel %vm3949_vm1, %v3920_v6, %v3921_v18  ;;  %v1847_v4 = vadd.f32 %v7104_v21, %v1653_v16 }
 0x12a   : > { %9831 = vst [vmem:[#allocation55_spill] sm:$0xff] %v7213_v33  ;;  %v4020_v20 = vmul.f32 %v7211_v0, %v3977_v62  ;;  %v1655_v13 = vpop.f32.mrf.mxu0  ;;  %v3472_v62 = vadd.s32 80, %v7132_v55 }
 0x12b   : > { %v7224_v43 = vpop.f32.mrf.mxu1  ;;  %v3922_v15 = vrot.slane %v1847_v4, 7  ;;  %v1849_v14 = vadd.f32 %v7106_v36, %v1655_v13 }
 0x12c   : > { %v4052_v6 = vadd.f32 %v7159_v2, %v4020_v20  ;;  %v1659_v33 = vpop.f32.mrf.mxu0  ;;  %5474 = vmatmul.mubr.msk.bf16.gmra.mxu0 %vm1546_vm0, %v6797_v60  ;;  %v6142_v20 = vld [vmem:[%s9616_s1 + $0x1c8] ss:$36 sps:$4 sm:$0xff]  }
 0x12d   : > { %v7231_v21 = vpop.f32.mrf.mxu1  ;;  %2400 = vmatmul.mubr.bf16.vlgmr.msra.gmra.mxu1 %v6621_v28  ;;  %v3976_v4 = vsel %vm3949_vm1, %v3921_v18, %v3922_v15  ;;  %v1853_v36 = vadd.f32 %v7108_v37, %v1659_v33  ;;  %2326 = vmatprep.mubr.bf16.mxu0 %v9826_v35  ;;  %v6147_v37 = vld [vmem:[%s9616_s1 + $0x184] ss:$36 sps:$4 sm:$0xff]  }
 0x12e   : > { %2754 = vmatpush1.bf16.msra.mxu1 %v6136_v26  ;;  %v7248_v13 = vadd.f32 %v4052_v6, %v1845_v49  ;;  %v4053_v9 = vadd.f32 %v7159_v2, %v3976_v4  ;;  %v1661_v0 = vpop.f32.mrf.mxu0  ;;  %2409 = vmatprep.mubr.bf16.mxu1 %v6625_v31  ;;  %v7261_v49 = vsel %vm7236_vm4, 1.0, %v9829_v11  ;;  %vm4174_vm4 = vcmp.lt.s32.totalorder %v7132_v55, 7 }
 0x12f   : > { %v7251_v28 = vpop.f32.mrf.mxu1  ;;  %2755 = vmatprep.subr.bf16.mxu1 %v6144_v54  ;;  %v3923_v18 = vrot.slane %v1853_v36, 7  ;;  %v1855_v33 = vadd.f32 %v7115_v42, %v1661_v0  ;;  %9835 = vst [vmem:[#allocation57_spill] sm:$0xff] %v7261_v49 }
 0x130   : > { %9834 = vst [vmem:[#allocation56_spill] sm:$0xff] %v7248_v13  ;;  %v7263_v26 = vadd.f32 %v4053_v9, %v1849_v14  ;;  %v1663_v6 = vpop.f32.mrf.mxu0  ;;  %v3504_v13 = vand.u32 15, %v3472_v62  ;;  %v6145_v14 = vld [vmem:[%s9616_s1 + $0x180] ss:$36 sps:$4 sm:$0xff]  }
 0x131   : > { %v7265_v4 = vpop.f32.mrf.mxu1  ;;  %v3975_v54 = vsel %vm3949_vm1, %v3922_v15, %v3923_v18  ;;  %v1857_v31 = vadd.f32 %v7117_v8, %v1663_v6  ;;  %v6153_v15 = vld [vmem:[%s9616_s1 + $0x13c] ss:$36 sps:$4 sm:$0xff]  }
 0x132   : > { %2756 = vmatpush1.bf16.msra.mxu1 %v6142_v20  ;;  %v4022_v36 = vmul.f32 %v7261_v49, %v3975_v54  ;;  %v1665_v0 = vpop.f32.mrf.mxu0  ;;  %vm3536_vm5 = vcmp.ne.s32.totalorder %v3504_v13, 0  ;;  %v6151_v13 = vld [vmem:[%s9616_s1 + $0x138] ss:$36 sps:$4 sm:$0xff]  }
 0x133   : > { %v7271_v42 = vpop.f32.mrf.mxu1  ;;  %2757 = vmatprep.subr.bf16.mxu1 %v6147_v37  ;;  %v3924_v16 = vrot.slane %v1857_v31, 7  ;;  %v1859_v9 = vadd.f32 %v7119_v58, %v1665_v0  ;;  %v3474_v37 = vadd.s32 96, %v7132_v55 }
 0x134   : > { %v4054_v8 = vadd.f32 %v7159_v2, %v4022_v36  ;;  %v1669_v62 = vpop.f32.mrf.mxu0  ;;  %5475 = vmatmul.mubr.msk.bf16.gmra.mxu0 %vm1546_vm0, %v6814_v10 }
 0x135   : > { %v7281_v20 = vpop.f32.mrf.mxu1  ;;  %2410 = vmatmul.mubr.bf16.gmra.mxu1 %v6659_v46  ;;  %v3974_v31 = vsel %vm3949_vm1, %v3923_v18, %v3924_v16  ;;  %v1863_v58 = vadd.f32 %v7121_v30, %v1669_v62  ;;  %2336 = vmatprep.mubr.bf16.mxu0 %v9826_v35  ;;  %v7302_v30 = vsel %vm3536_vm5, 1.0, %v9829_v11 }
 0x136   : > { %2419 = vmatprep.mubr.bf16.mxu1 %v6663_v48  ;;  %v7292_v6 = vadd.f32 %v4054_v8, %v1855_v33  ;;  %v4055_v54 = vadd.f32 %v7159_v2, %v3974_v31  ;;  %v1671_v36 = vpop.f32.mrf.mxu0  ;;  %2758 = vmatpush1.bf16.msra.mxu1 %v6145_v14  ;;  %9837 = vst [vmem:[#allocation59_spill] sm:$0xff] %v7302_v30  ;;  %v6156_v33 = vld [vmem:[%s9616_s1 + $0xf4] ss:$36 sps:$4 sm:$0xff]   ;;  %v3506_v14 = vand.u32 15, %v3474_v37 }
 0x137   : > { %v7295_v0 = vpop.f32.mrf.mxu1  ;;  %v3925_v49 = vrot.slane %v1863_v58, 7  ;;  %v1865_v18 = vadd.f32 %v7128_v12, %v1671_v36  ;;  %2759 = vmatprep.subr.bf16.mxu1 %v6153_v15 }
 0x138   : > { %9836 = vst [vmem:[#allocation58_spill] sm:$0xff] %v7292_v6  ;;  %v7307_v8 = vadd.f32 %v4055_v54, %v1859_v9  ;;  %v1673_v62 = vpop.f32.mrf.mxu0  ;;  %v6154_v9 = vld [vmem:[%s9616_s1 + $0xf0] ss:$36 sps:$4 sm:$0xff]   ;;  %vm3538_vm6 = vcmp.ne.s32.totalorder %v3506_v14, 0  ;;  %v6160_v14 = vld [vmem:[%s9616_s1 + $0xa8] ss:$36 sps:$4 sm:$0xff]  }
 0x139   : > { %v7309_v31 = vpop.f32.mrf.mxu1  ;;  %v3973_v6 = vsel %vm3949_vm1, %v3924_v16, %v3925_v49  ;;  %v1867_v58 = vadd.f32 %v7130_v47, %v1673_v62  ;;  %v6162_v16 = vld [vmem:[%s9616_s1 + $0xac] ss:$36 sps:$4 sm:$0xff]  }
 0x13a   : > { %v4024_v12 = vmul.f32 %v7302_v30, %v3973_v6  ;;  %v1675_v36 = vpop.f32.mrf.mxu0  ;;  %2760 = vmatpush1.bf16.msra.mxu1 %v6151_v13  ;;  %v3476_v13 = vadd.s32 112, %v7132_v55 }
 0x13b   : > { %v7315_v48 = vpop.f32.mrf.mxu1  ;;  %v3926_v15 = vrot.slane %v1867_v58, 7  ;;  %v1869_v54 = vadd.f32 %v7134_v41, %v1675_v36  ;;  %2761 = vmatprep.subr.bf16.mxu1 %v6156_v33 }
 0x13c   : > { %v4056_v47 = vadd.f32 %v7159_v2, %v4024_v12  ;;  %v1679_v37 = vpop.f32.mrf.mxu0  ;;  %5476 = vmatmul.mubr.msk.bf16.gmra.mxu0 %vm1546_vm0, %v6831_v23 }
 0x13d   : > { %v7325_v6 = vpop.f32.mrf.mxu1  ;;  %2420 = vmatmul.mubr.bf16.gmra.mxu1 %v6694_v63  ;;  %v3972_v41 = vsel %vm3949_vm1, %v3925_v49, %v3926_v15  ;;  %v1873_v33 = vadd.f32 %v7136_v38, %v1679_v37  ;;  %2346 = vmatprep.mubr.bf16.mxu0 %v9826_v35  ;;  %v7346_v38 = vsel %vm3538_vm6, 1.0, %v9829_v11 }
 0x13e   : > { %2429 = vmatprep.mubr.bf16.mxu1 %v6698_v3  ;;  %v7336_v62 = vadd.f32 %v4056_v47, %v1865_v18  ;;  %v4057_v58 = vadd.f32 %v7159_v2, %v3972_v41  ;;  %v1681_v12 = vpop.f32.mrf.mxu0  ;;  %2762 = vmatpush1.bf16.msra.mxu1 %v6154_v9  ;;  %9839 = vst [vmem:[#allocation61_spill] sm:$0xff] %v7346_v38  ;;  %v6165_v18 = vld [vmem:[%s9616_s1 + $0x64] ss:$36 sps:$4 sm:$0xff]   ;;  %v3508_v9 = vand.u32 15, %v3476_v13 }
 0x13f   : > { %v7339_v36 = vpop.f32.mrf.mxu1  ;;  %v3927_v30 = vrot.slane %v1873_v33, 7  ;;  %v1875_v49 = vadd.f32 %v7146_v27, %v1681_v12  ;;  %2763 = vmatprep.subr.bf16.mxu1 %v6162_v16 }
 0x140   : > { %9838 = vst [vmem:[#allocation60_spill] sm:$0xff] %v7336_v62  ;;  %v7351_v47 = vadd.f32 %v4057_v58, %v1869_v54  ;;  %v1683_v37 = vpop.f32.mrf.mxu0  ;;  %v6163_v54 = vld [vmem:[%s9616_s1 + $0x60] ss:$36 sps:$4 sm:$0xff]   ;;  %vm3540_vm7 = vcmp.ne.s32.totalorder %v3508_v9, 0  ;;  %v6166_v9 = vld [vmem:[%s9616_s1 + $0x18] ss:$36 sps:$4 sm:$0xff]  }
 0x141   : > { %v7353_v41 = vpop.f32.mrf.mxu1  ;;  %v3971_v62 = vsel %vm3949_vm1, %v3926_v15, %v3927_v30  ;;  %v1877_v33 = vadd.f32 %v7150_v22, %v1683_v37  ;;  %v6168_v15 = vld [vmem:[%s9616_s1 + $0x1c] ss:$36 sps:$4 sm:$0xff]  }
 0x142   : > { %v4026_v27 = vmul.f32 %v7346_v38, %v3971_v62  ;;  %v1685_v12 = vpop.f32.mrf.mxu0  ;;  %2764 = vmatpush1.bf16.msra.mxu1 %v6160_v14  ;;  %v3478_v14 = vadd.s32 128, %v7132_v55 }
 0x143   : > { %v7359_v3 = vpop.f32.mrf.mxu1  ;;  %v3928_v16 = vrot.slane %v1877_v33, 7  ;;  %v1879_v58 = vadd.f32 %v7153_v51, %v1685_v12  ;;  %2765 = vmatprep.subr.bf16.mxu1 %v6165_v18 }
 0x144   : > { %v4058_v22 = vadd.f32 %v7159_v2, %v4026_v27  ;;  %v1689_v13 = vpop.f32.mrf.mxu0  ;;  %5477 = vmatmul.mubr.msk.bf16.gmra.mxu0 %vm1546_vm0, %v6848_v39 }
 0x145   : > { %v7369_v62 = vpop.f32.mrf.mxu1  ;;  %2430 = vmatmul.mubr.bf16.gmra.mxu1 %v6729_v17  ;;  %v3970_v51 = vsel %vm3949_vm1, %v3927_v30, %v3928_v16  ;;  %v1883_v18 = vadd.f32 %v7161_v7, %v1689_v13  ;;  %2356 = vmatprep.mubr.bf16.mxu0 %v9826_v35  ;;  %v7390_v7 = vsel %vm3540_vm7, 1.0, %v9829_v11 }
 0x146   : > { %2439 = vmatprep.mubr.bf16.mxu1 %v6733_v19  ;;  %v7380_v37 = vadd.f32 %v4058_v22, %v1875_v49  ;;  %v4059_v33 = vadd.f32 %v7159_v2, %v3970_v51  ;;  %v1691_v27 = vpop.f32.mrf.mxu0  ;;  %2766 = vmatpush1.bf16.msra.mxu1 %v6163_v54  ;;  %9841 = vst [vmem:[#allocation63_spill] sm:$0xff] %v7390_v7  ;;  %v6171_v49 = vld [vmem:[%s9616_s1 + $0x454] ss:$36 sps:$4 sm:$0xff]   ;;  %v3510_v54 = vand.u32 15, %v3478_v14 }
 0x147   : > { %v7383_v12 = vpop.f32.mrf.mxu1  ;;  %v3929_v38 = vrot.slane %v1883_v18, 7  ;;  %v1885_v30 = vadd.f32 %v7175_v25, %v1691_v27  ;;  %2767 = vmatprep.subr.bf16.mxu1 %v6168_v15 }
 0x148   : > { %9840 = vst [vmem:[#allocation62_spill] sm:$0xff] %v7380_v37  ;;  %v7395_v22 = vadd.f32 %v4059_v33, %v1879_v58  ;;  %v1693_v13 = vpop.f32.mrf.mxu0  ;;  %v6169_v58 = vld [vmem:[%s9616_s1 + $0x450] ss:$36 sps:$4 sm:$0xff]   ;;  %vm3542_vm8 = vcmp.ne.s32.totalorder %v3510_v54, 0  ;;  %v6175_v54 = vld [vmem:[%s9616_s1 + $0x408] ss:$36 sps:$4 sm:$0xff]  }
 0x149   : > { %v7397_v51 = vpop.f32.mrf.mxu1  ;;  %v3969_v37 = vsel %vm3949_vm1, %v3928_v16, %v3929_v38  ;;  %v1887_v18 = vadd.f32 %v7183_v5, %v1693_v13  ;;  %v6177_v16 = vld [vmem:[%s9616_s1 + $0x40c] ss:$36 sps:$4 sm:$0xff]  }
 0x14a   : > { %v4028_v25 = vmul.f32 %v7390_v7, %v3969_v37  ;;  %v1695_v27 = vpop.f32.mrf.mxu0  ;;  %2768 = vmatpush1.bf16.msra.mxu1 %v6166_v9  ;;  %v3480_v9 = vadd.s32 144, %v7132_v55 }
 0x14b   : > { %v7403_v19 = vpop.f32.mrf.mxu1  ;;  %v3930_v15 = vrot.slane %v1887_v18, 7  ;;  %v1889_v33 = vadd.f32 %v7189_v40, %v1695_v27  ;;  %2769 = vmatprep.subr.bf16.mxu1 %v6171_v49 }
 0x14c   : > { %v4060_v5 = vadd.f32 %v7159_v2, %v4028_v25  ;;  %v1699_v14 = vpop.f32.mrf.mxu0  ;;  %5478 = vmatmul.mubr.msk.bf16.gmra.mxu0 %vm1546_vm0, %v6865_v57 }
 0x14d   : > { %v7413_v37 = vpop.f32.mrf.mxu1  ;;  %2440 = vmatmul.mubr.bf16.gmra.mxu1 %v6752_v32  ;;  %v3968_v40 = vsel %vm3949_vm1, %v3929_v38, %v3930_v15  ;;  %v1893_v49 = vadd.f32 %v7193_v24, %v1699_v14  ;;  %2592 = vmatprep.mubr.bf16.mxu0 %v9826_v35  ;;  %v7434_v24 = vsel %vm3542_vm8, 1.0, %v9829_v11 }
 0x14e   : > { %2449 = vmatprep.mubr.bf16.mxu1 %v6756_v34  ;;  %v7424_v13 = vadd.f32 %v4060_v5, %v1885_v30  ;;  %v4061_v18 = vadd.f32 %v7159_v2, %v3968_v40  ;;  %v1701_v25 = vpop.f32.mrf.mxu0  ;;  %2770 = vmatpush2.bf16.msra.mxu1 %v6169_v58  ;;  %9843 = vst [vmem:[#allocation65_spill] sm:$0xff] %v7434_v24  ;;  %v6180_v30 = vld [vmem:[%s9616_s1 + $0x3c4] ss:$36 sps:$4 sm:$0xff]   ;;  %v3512_v58 = vand.u32 15, %v3480_v9 }
 0x14f   : > { %v7427_v27 = vpop.f32.mrf.mxu1  ;;  %v3931_v7 = vrot.slane %v1893_v49, 7  ;;  %v1895_v38 = vadd.f32 %v7207_v1, %v1701_v25  ;;  %2771 = vmatprep.subr.bf16.mxu1 %v6177_v16  ;;  %v6172_v16 = vld [vmem:[%s9616_s1 + $0x600] ss:$36 sps:$4 sm:$0xff]  }
 0x150   : > { %9842 = vst [vmem:[#allocation64_spill] sm:$0xff] %v7424_v13  ;;  %v7439_v5 = vadd.f32 %v4061_v18, %v1889_v33  ;;  %v1703_v14 = vpop.f32.mrf.mxu0  ;;  %v6178_v33 = vld [vmem:[%s9616_s1 + $0x3c0] ss:$36 sps:$4 sm:$0xff]   ;;  %vm7468_vm9 = vcmp.ne.s32.totalorder %v3512_v58, 0 }
 0x151   : > { %v7441_v40 = vpop.f32.mrf.mxu1  ;;  %v3967_v13 = vsel %vm3949_vm1, %v3930_v15, %v3931_v7  ;;  %v1897_v49 = vadd.f32 %v7215_v52, %v1703_v14  ;;  %v6183_v52 = vld [vmem:[%s9616_s1 + $0x37c] ss:$36 sps:$4 sm:$0xff]  }
 0x152   : > { %9844 = vst [vmem:[#allocation66_spill] sm:$0xff] %v7439_v5  ;;  %v4030_v1 = vmul.f32 %v7434_v24, %v3967_v13  ;;  %v1705_v25 = vpop.f32.mrf.mxu0  ;;  %2772 = vmatpush2.bf16.msra.mxu1 %v6175_v54  ;;  %v6186_v15 = vld [vmem:[%s9616_s1 + $0x5bc] ss:$36 sps:$4 sm:$0xff]  }
 0x153   : > { %v7447_v34 = vpop.f32.mrf.mxu1  ;;  %v3932_v9 = vrot.slane %v1897_v49, 7  ;;  %v1899_v18 = vadd.f32 %v7224_v43, %v1705_v25  ;;  %2773 = vmatprep.subr.bf16.mxu1 %v6180_v30  ;;  %v3482_v30 = vadd.s32 160, %v7132_v55 }
 0x154   : > { %v4062_v13 = vadd.f32 %v7159_v2, %v4030_v1  ;;  %v1709_v14 = vpop.f32.mrf.mxu0  ;;  %5479 = vmatmul.mubr.msk.bf16.vlgmr.msra.gmra.mxu0 %vm1546_vm0, %v6457_v29  ;;  %v6181_v29 = vld [vmem:[%s9616_s1 + $0x378] ss:$36 sps:$4 sm:$0xff]  }
 0x155   : > { %v7463_v54 = vpop.f32.mrf.mxu1  ;;  %2450 = vmatmul.mubr.bf16.gmra.mxu1 %v6775_v44  ;;  %v3966_v49 = vsel %vm3949_vm1, %v3931_v7, %v3932_v9  ;;  %v1903_v25 = vadd.f32 %v7231_v21, %v1709_v14  ;;  %2602 = vmatprep.mubr.bf16.mxu0 %v9826_v35  ;;  %v6184_v21 = vld [vmem:[%s9616_s1 + $0x5b8] ss:$36 sps:$4 sm:$0xff]  }
 0x156   : > { %2459 = vmatprep.mubr.bf16.mxu1 %v6782_v50  ;;  %v7478_v1 = vadd.f32 %v4062_v13, %v1895_v38  ;;  %v4063_v24 = vadd.f32 %v7159_v2, %v3966_v49  ;;  %v1711_v5 = vpop.f32.mrf.mxu0  ;;  %2951 = vmatpush1.bf16.msra.mxu0 %v6172_v16  ;;  %v7493_v38 = vsel %vm7468_vm9, 1.0, %v9829_v11  ;;  %v6189_v16 = vld [vmem:[%s9616_s1 + $0x334] ss:$36 sps:$4 sm:$0xff]  }
 0x157   : > { %v7481_v58 = vpop.f32.mrf.mxu1  ;;  %2774 = vmatpush2.bf16.msra.mxu1 %v6178_v33  ;;  %v3933_v7 = vrot.slane %v1903_v25, 7  ;;  %v1905_v14 = vadd.f32 %v7251_v28, %v1711_v5  ;;  %9848 = vst [vmem:[#allocation68_spill] sm:$0xff] %v7493_v38  ;;  %2952 = vmatprep.subr.bf16.mxu0 %v6186_v15  ;;  %v6195_v33 = vld [vmem:[%s9616_s1 + $0x574] ss:$36 sps:$4 sm:$0xff]   ;;  %v3514_v28 = vand.u32 15, %v3482_v30 }
 0x158   : > { %9847 = vst [vmem:[#allocation67_spill] sm:$0xff] %v7478_v1  ;;  %2775 = vmatprep.subr.bf16.mxu1 %v6183_v52  ;;  %v7501_v13 = vadd.f32 %v4063_v24, %v1899_v18  ;;  %v1713_v49 = vpop.f32.mrf.mxu0  ;;  %v6187_v24 = vld [vmem:[%s9616_s1 + $0x330] ss:$36 sps:$4 sm:$0xff]  }
 0x159   : > { %v7503_v25 = vpop.f32.mrf.mxu1  ;;  %v3965_v5 = vsel %vm3949_vm1, %v3932_v9, %v3933_v7  ;;  %v1907_v52 = vadd.f32 %v7265_v4, %v1713_v49  ;;  %v6193_v18 = vld [vmem:[%s9616_s1 + $0x570] ss:$36 sps:$4 sm:$0xff]   ;;  %vm7530_vm10 = vcmp.ne.s32.totalorder %v3514_v28, 0 }
 0x15a   : > { %9849 = vst [vmem:[#allocation69_spill] sm:$0xff] %v7501_v13  ;;  %v4032_v15 = vmul.f32 %v7493_v38, %v3965_v5  ;;  %v1715_v43 = vpop.f32.mrf.mxu0  ;;  %2953 = vmatpush1.bf16.msra.mxu0 %v6184_v21  ;;  %v6192_v4 = vld [vmem:[%s9616_s1 + $0x2ec] ss:$36 sps:$4 sm:$0xff]  }
 0x15b   : > { %v7509_v1 = vpop.f32.mrf.mxu1  ;;  %2776 = vmatpush2.bf16.msra.mxu1 %v6181_v29  ;;  %v3934_v30 = vrot.slane %v1907_v52, 7  ;;  %v1909_v9 = vadd.f32 %v7271_v42, %v1715_v43  ;;  %2954 = vmatprep.subr.bf16.mxu0 %v6195_v33  ;;  %v6206_v29 = vld [vmem:[%s9616_s1 + $0x52c] ss:$36 sps:$4 sm:$0xff]  }
 0x15c   : > { %2777 = vmatprep.subr.bf16.mxu1 %v6189_v16  ;;  %v4064_v21 = vadd.f32 %v7159_v2, %v4032_v15  ;;  %v1719_v49 = vpop.f32.mrf.mxu0  ;;  %v9850_v52 = vld [vmem:[#allocation6_spill] sm:$0xff]  ;;  %v3484_v16 = vadd.s32 176, %v7132_v55  ;;  %v9853_v15 = vld [vmem:[#allocation29_spill] sm:$0xff] }
 0x15d   : > { %v7525_v5 = vpop.f32.mrf.mxu1  ;;  %2460 = vmatmul.mubr.bf16.gmra.mxu1 %v6795_v59  ;;  %5480 = vmatmul.mubr.msk.bf16.gmra.mxu0 %vm1546_vm0, %v9850_v52  ;;  %v3964_v33 = vsel %vm3949_vm1, %v3933_v7, %v3934_v30  ;;  %v1913_v43 = vadd.f32 %v7281_v20, %v1719_v49  ;;  %v6190_v59 = vld [vmem:[%s9616_s1 + $0x2e8] ss:$36 sps:$4 sm:$0xff]  }
 0x15e   : > { %2469 = vmatprep.mubr.bf16.mxu1 %v9853_v15  ;;  %2612 = vmatprep.mubr.bf16.mxu0 %v9826_v35  ;;  %v7540_v38 = vadd.f32 %v4064_v21, %v1905_v14  ;;  %v4065_v13 = vadd.f32 %v7159_v2, %v3964_v33  ;;  %v1721_v52 = vpop.f32.mrf.mxu0  ;;  %v6204_v20 = vld [vmem:[%s9616_s1 + $0x528] ss:$36 sps:$4 sm:$0xff]   ;;  %v7555_v14 = vsel %vm7530_vm10, 1.0, %v9829_v11 }
 0x15f   : > { %v7543_v28 = vpop.f32.mrf.mxu1  ;;  %2778 = vmatpush2.bf16.msra.mxu1 %v6187_v24  ;;  %2955 = vmatpush1.bf16.msra.mxu0 %v6193_v18  ;;  %v3935_v7 = vrot.slane %v1913_v43, 7  ;;  %v1915_v49 = vadd.f32 %v7295_v0, %v1721_v52  ;;  %9855 = vst [vmem:[#allocation71_spill] sm:$0xff] %v7555_v14  ;;  %v6198_v24 = vld [vmem:[%s9616_s1 + $0x2a4] ss:$36 sps:$4 sm:$0xff]   ;;  %v3516_v0 = vand.u32 15, %v3484_v16 }
 0x160   : > { %9854 = vst [vmem:[#allocation70_spill] sm:$0xff] %v7540_v38  ;;  %2779 = vmatprep.subr.bf16.mxu1 %v6192_v4  ;;  %2956 = vmatprep.subr.bf16.mxu0 %v6206_v29  ;;  %v6211_v18 = vld [vmem:[%s9616_s1 + $0x4e4] ss:$36 sps:$4 sm:$0xff]   ;;  %v7563_v21 = vadd.f32 %v4065_v13, %v1909_v9  ;;  %v1723_v33 = vpop.f32.mrf.mxu0 }
 0x161   : > { %v7565_v43 = vpop.f32.mrf.mxu1  ;;  %v3963_v52 = vsel %vm3949_vm1, %v3934_v30, %v3935_v7  ;;  %v1917_v4 = vadd.f32 %v7309_v31, %v1723_v33  ;;  %v6196_v13 = vld [vmem:[%s9616_s1 + $0x2a0] ss:$36 sps:$4 sm:$0xff]   ;;  %vm7592_vm11 = vcmp.ne.s32.totalorder %v3516_v0, 0 }
 0x162   : > { %9856 = vst [vmem:[#allocation72_spill] sm:$0xff] %v7563_v21  ;;  %v4034_v42 = vmul.f32 %v7555_v14, %v3963_v52  ;;  %v1725_v38 = vpop.f32.mrf.mxu0  ;;  %v6209_v9 = vld [vmem:[%s9616_s1 + $0x4e0] ss:$36 sps:$4 sm:$0xff]   ;;  %v9857_v52 = vld [vmem:[#allocation30_spill] sm:$0xff] }
 0x163   : > { %v7571_v15 = vpop.f32.mrf.mxu1  ;;  %2780 = vmatpush2.bf16.msra.mxu1 %v6190_v59  ;;  %2957 = vmatpush1.bf16.msra.mxu0 %v6204_v20  ;;  %v3936_v29 = vrot.slane %v1917_v4, 7  ;;  %v1919_v30 = vadd.f32 %v7315_v48, %v1725_v38  ;;  %v6201_v31 = vld [vmem:[%s9616_s1 + $0x25c] ss:$36 sps:$4 sm:$0xff]   ;;  %v9858_v4 = vld [vmem:[#allocation7_spill] sm:$0xff]  ;;  %v3486_v38 = vadd.s32 192, %v7132_v55 }
 0x164   : > { %2781 = vmatprep.subr.bf16.mxu1 %v6198_v24  ;;  %2958 = vmatprep.subr.bf16.mxu0 %v6211_v18  ;;  %v6216_v59 = vld [vmem:[%s9616_s1 + $0x49c] ss:$36 sps:$4 sm:$0xff]   ;;  %v4066_v16 = vadd.f32 %v7159_v2, %v4034_v42  ;;  %v1729_v20 = vpop.f32.mrf.mxu0  ;;  %v9861_v42 = vld [vmem:[#allocation31_spill] sm:$0xff] }
 0x165   : > { %v7587_v33 = vpop.f32.mrf.mxu1  ;;  %2470 = vmatmul.mubr.bf16.gmra.mxu1 %v9857_v52  ;;  %5481 = vmatmul.mubr.msk.bf16.gmra.mxu0 %vm1546_vm0, %v9858_v4  ;;  %v3962_v24 = vsel %vm3949_vm1, %v3935_v7, %v3936_v29  ;;  %v1923_v18 = vadd.f32 %v7325_v6, %v1729_v20  ;;  %v6199_v52 = vld [vmem:[%s9616_s1 + $0x258] ss:$36 sps:$4 sm:$0xff]  }
 0x166   : > { %2479 = vmatprep.mubr.bf16.mxu1 %v9861_v42  ;;  %2622 = vmatprep.mubr.bf16.mxu0 %v9826_v35  ;;  %v7602_v14 = vadd.f32 %v4066_v16, %v1915_v49  ;;  %v4067_v21 = vadd.f32 %v7159_v2, %v3962_v24  ;;  %v1731_v4 = vpop.f32.mrf.mxu0  ;;  %v6214_v6 = vld [vmem:[%s9616_s1 + $0x498] ss:$36 sps:$4 sm:$0xff]   ;;  %v7617_v49 = vsel %vm7592_vm11, 1.0, %v9829_v11 }
 0x167   : > { %v7605_v0 = vpop.f32.mrf.mxu1  ;;  %2782 = vmatpush2.bf16.msra.mxu1 %v6196_v13  ;;  %2959 = vmatpush1.bf16.msra.mxu0 %v6209_v9  ;;  %v3937_v7 = vrot.slane %v1923_v18, 7  ;;  %v1925_v20 = vadd.f32 %v7339_v36, %v1731_v4  ;;  %9863 = vst [vmem:[#allocation74_spill] sm:$0xff] %v7617_v49  ;;  %v6202_v13 = vld [vmem:[%s9616_s1 + $0x458] ss:$36 sps:$4 sm:$0xff]  }
 0x168   : > { %9862 = vst [vmem:[#allocation73_spill] sm:$0xff] %v7602_v14  ;;  %2783 = vmatprep.subr.bf16.mxu1 %v6201_v31  ;;  %2960 = vmatprep.subr.bf16.mxu0 %v6216_v59  ;;  %v7622_v16 = vadd.f32 %v4067_v21, %v1919_v30  ;;  %v1733_v9 = vpop.f32.mrf.mxu0  ;;  %v3518_v14 = vand.u32 15, %v3486_v38 }
 0x169   : > { %v7624_v24 = vpop.f32.mrf.mxu1  ;;  %v3961_v36 = vsel %vm3949_vm1, %v3936_v29, %v3937_v7  ;;  %v1927_v4 = vadd.f32 %v7353_v41, %v1733_v9  ;;  %v9866_v29 = vld [vmem:[#allocation9_spill] sm:$0xff]  ;;  %v3488_v41 = vadd.s32 208, %v7132_v55 }
 0x16a   : > { %9864 = vst [vmem:[#allocation75_spill] sm:$0xff] %v7622_v16  ;;  %v4036_v48 = vmul.f32 %v7617_v49, %v3961_v36  ;;  %v1735_v18 = vpop.f32.mrf.mxu0  ;;  %v9865_v16 = vld [vmem:[#allocation32_spill] sm:$0xff]  ;;  %vm3550_vm12 = vcmp.ne.s32.totalorder %v3518_v14, 0 }
 0x16b   : > { %v7630_v31 = vpop.f32.mrf.mxu1  ;;  %2784 = vmatpush2.bf16.msra.mxu1 %v6199_v52  ;;  %2961 = vmatpush1.bf16.msra.mxu0 %v6214_v6  ;;  %v3938_v42 = vrot.slane %v1927_v4, 7  ;;  %v1929_v21 = vadd.f32 %v7359_v3, %v1735_v18  ;;  %v9867_v3 = vld [vmem:[#allocation34_spill] sm:$0xff]  ;;  %v7652_v18 = vsel %vm3550_vm12, 1.0, %v9829_v11  ;;  %v3520_v49 = vand.u32 15, %v3488_v41 }
 0x16c   : > { %5725 = vmatprep.subr.bf16.mxu1 %v6202_v13  ;;  %v4068_v30 = vadd.f32 %v7159_v2, %v4036_v48  ;;  %v1739_v59 = vpop.f32.mrf.mxu0  ;;  %9869 = vst [vmem:[#allocation77_spill] sm:$0xff] %v7652_v18 }
 0x16d   : > { %v7634_v38 = vpop.f32.mrf.mxu1  ;;  %2480 = vmatmul.mubr.bf16.gmra.mxu1 %v9865_v16  ;;  %5482 = vmatmul.mubr.msk.bf16.gmra.mxu0 %vm1546_vm0, %v9866_v29  ;;  %v3960_v52 = vsel %vm3949_vm1, %v3937_v7, %v3938_v42  ;;  %v1933_v6 = vadd.f32 %v7369_v62, %v1739_v59  ;;  %vm3552_vm13 = vcmp.ne.s32.totalorder %v3520_v49, 0  ;;  %v9878_v29 = vld [vmem:[#allocation38_spill] sm:$0xff] }
 0x16e   : > { %2489 = vmatprep.mubr.bf16.mxu1 %v9867_v3  ;;  %2632 = vmatprep.mubr.bf16.mxu0 %v9826_v35  ;;  %v7645_v13 = vadd.f32 %v4068_v30, %v1925_v20  ;;  %v4069_v9 = vadd.f32 %v7159_v2, %v3960_v52  ;;  %v1741_v36 = vpop.f32.mrf.mxu0 }
 0x16f   : > { %v7648_v4 = vpop.f32.mrf.mxu1  ;;  %v3939_v48 = vrot.slane %v1933_v6, 7  ;;  %v1935_v14 = vadd.f32 %v7383_v12, %v1741_v36 }
 0x170   : > { %9868 = vst [vmem:[#allocation76_spill] sm:$0xff] %v7645_v13  ;;  %v7654_v7 = vadd.f32 %v4069_v9, %v1929_v21  ;;  %v1743_v62 = vpop.f32.mrf.mxu0  ;;  %v7668_v21 = vld [vmem:[%s9616_s1 + $0x608] ss:$36 sps:$4 sm:$0xff]  }
 0x171   : > { %v7656_v59 = vpop.f32.mrf.mxu1  ;;  %v3959_v20 = vsel %vm3949_vm1, %v3938_v42, %v3939_v48  ;;  %v1937_v30 = vadd.f32 %v7397_v51, %v1743_v62  ;;  %9871 = vst [vmem:[#allocation79_spill] sm:$0xff] %v7668_v21  ;;  %v9872_v42 = vld [vmem:[#allocation35_spill] sm:$0xff]  ;;  %v9873_v51 = vld [vmem:[#allocation10_spill] sm:$0xff]  ;;  %v3490_v62 = vadd.s32 224, %v7132_v55  ;;  %5859 = vmatprep.subr.bf16.mxu0 %v7668_v21 }
 0x172   : > { %9870 = vst [vmem:[#allocation78_spill] sm:$0xff] %v7654_v7  ;;  %v4038_v52 = vmul.f32 %v7652_v18, %v3959_v20  ;;  %v1745_v13 = vpop.f32.mrf.mxu0  ;;  %v9874_v20 = vld [vmem:[#allocation37_spill] sm:$0xff] }
 0x173   : > { %v7662_v6 = vpop.f32.mrf.mxu1  ;;  %v3940_v12 = vrot.slane %v1937_v30, 7  ;;  %v1939_v36 = vadd.f32 %v7403_v19, %v1745_v13 }
 0x174   : > { %v4070_v41 = vadd.f32 %v7159_v2, %v4038_v52  ;;  %v1749_v9 = vpop.f32.mrf.mxu0 }
 0x175   : > { %v7671_v7 = vpop.f32.mrf.mxu1  ;;  %2490 = vmatmul.mubr.bf16.gmra.mxu1 %v9872_v42  ;;  %5483 = vmatmul.mubr.msk.bf16.gmra.mxu0 %vm1546_vm0, %v9873_v51  ;;  %v3958_v19 = vsel %vm3949_vm1, %v3939_v48, %v3940_v12  ;;  %v1943_v13 = vadd.f32 %v7413_v37, %v1749_v9  ;;  %v7690_v48 = vsel %vm3552_vm13, 1.0, %v9829_v11 }
 0x176   : > { %2499 = vmatprep.mubr.bf16.mxu1 %v9874_v20  ;;  %2642 = vmatprep.mubr.bf16.mxu0 %v9826_v35  ;;  %v7682_v30 = vadd.f32 %v4070_v41, %v1935_v14  ;;  %v4071_v52 = vadd.f32 %v7159_v2, %v3958_v19  ;;  %v1751_v18 = vpop.f32.mrf.mxu0  ;;  %9876 = vst [vmem:[#allocation81_spill] sm:$0xff] %v7690_v48  ;;  %v3522_v14 = vand.u32 15, %v3490_v62  ;;  %v9879_v62 = vld [vmem:[#allocation12_spill] sm:$0xff] }
 0x177   : > { %v7685_v42 = vpop.f32.mrf.mxu1  ;;  %v3941_v49 = vrot.slane %v1943_v13, 7  ;;  %v1945_v51 = vadd.f32 %v7427_v27, %v1751_v18 }
 0x178   : > { %9875 = vst [vmem:[#allocation80_spill] sm:$0xff] %v7682_v30  ;;  %v7692_v37 = vadd.f32 %v4071_v52, %v1939_v36  ;;  %v1753_v9 = vpop.f32.mrf.mxu0  ;;  %vm3554_vm14 = vcmp.ne.s32.totalorder %v3522_v14, 0 }
 0x179   : > { %v7694_v20 = vpop.f32.mrf.mxu1  ;;  %v3957_v41 = vsel %vm3949_vm1, %v3940_v12, %v3941_v49  ;;  %v1947_v19 = vadd.f32 %v7441_v40, %v1753_v9  ;;  %v3492_v40 = vadd.s32 240, %v7132_v55 }
 0x17a   : > { %9877 = vst [vmem:[#allocation82_spill] sm:$0xff] %v7692_v37  ;;  %v4040_v30 = vmul.f32 %v7690_v48, %v3957_v41  ;;  %v1755_v3 = vpop.f32.mrf.mxu0  ;;  %v9880_v41 = vld [vmem:[#allocation40_spill] sm:$0xff] }
 0x17b   : > { %v7700_v13 = vpop.f32.mrf.mxu1  ;;  %v3942_v27 = vrot.slane %v1947_v19, 7  ;;  %v1949_v18 = vadd.f32 %v7447_v34, %v1755_v3 }
 0x17c   : > { %v4072_v36 = vadd.f32 %v7159_v2, %v4040_v30  ;;  %v1759_v52 = vpop.f32.mrf.mxu0 }
 0x17d   : > { %v7704_v37 = vpop.f32.mrf.mxu1  ;;  %2500 = vmatmul.mubr.bf16.gmra.mxu1 %v9878_v29  ;;  %5484 = vmatmul.mubr.msk.bf16.gmra.mxu0 %vm1546_vm0, %v9879_v62  ;;  %v3956_v12 = vsel %vm3949_vm1, %v3941_v49, %v3942_v27  ;;  %v1953_v9 = vadd.f32 %v7463_v54, %v1759_v52  ;;  %v7722_v62 = vsel %vm3554_vm14, 1.0, %v9829_v11  ;;  %v9884_v29 = vld [vmem:[#allocation41_spill] sm:$0xff] }
 0x17e   : > { %2509 = vmatprep.mubr.bf16.mxu1 %v9880_v41  ;;  %2652 = vmatprep.mubr.bf16.mxu0 %v9826_v35  ;;  %v7715_v34 = vadd.f32 %v4072_v36, %v1945_v51  ;;  %v4073_v3 = vadd.f32 %v7159_v2, %v3956_v12  ;;  %v1761_v30 = vpop.f32.mrf.mxu0  ;;  %9882 = vst [vmem:[#allocation84_spill] sm:$0xff] %v7722_v62  ;;  %v3524_v41 = vand.u32 15, %v3492_v40  ;;  %v9885_v40 = vld [vmem:[#allocation14_spill] sm:$0xff] }
 0x17f   : > { %v7718_v19 = vpop.f32.mrf.mxu1  ;;  %v3943_v48 = vrot.slane %v1953_v9, 7  ;;  %v1955_v14 = vadd.f32 %v7481_v58, %v1761_v30 }
 0x180   : > { %9881 = vst [vmem:[#allocation83_spill] sm:$0xff] %v7715_v34  ;;  %v7724_v49 = vadd.f32 %v4073_v3, %v1949_v18  ;;  %v1763_v54 = vpop.f32.mrf.mxu0  ;;  %vm3556_vm15 = vcmp.ne.s32.totalorder %v3524_v41, 0 }
 0x181   : > { %v7726_v52 = vpop.f32.mrf.mxu1  ;;  %v3955_v51 = vsel %vm3949_vm1, %v3942_v27, %v3943_v48  ;;  %v1957_v36 = vadd.f32 %v7503_v25, %v1763_v54  ;;  %v3494_v25 = vand.u32 15, %v7132_v55 }
 0x182   : > { %9883 = vst [vmem:[#allocation85_spill] sm:$0xff] %v7724_v49  ;;  %v4042_v12 = vmul.f32 %v7722_v62, %v3955_v51  ;;  %v1765_v34 = vpop.f32.mrf.mxu0  ;;  %v9886_v51 = vld [vmem:[#allocation42_spill] sm:$0xff] }
 0x183   : > { %v7732_v9 = vpop.f32.mrf.mxu1  ;;  %v3944_v58 = vrot.slane %v1957_v36, 7  ;;  %v1959_v30 = vadd.f32 %v7509_v1, %v1765_v34  ;;  %vm3526_vm2 = vcmp.ne.s32.totalorder %v3494_v25, 0 }
 0x184   : > { %v4074_v18 = vadd.f32 %v7159_v2, %v4042_v12  ;;  %v1769_v3 = vpop.f32.mrf.mxu0 }
 0x185   : > { %v7736_v49 = vpop.f32.mrf.mxu1  ;;  %2510 = vmatmul.mubr.bf16.gmra.mxu1 %v9884_v29  ;;  %5485 = vmatmul.mubr.msk.bf16.gmra.mxu0 %vm1546_vm0, %v9885_v40  ;;  %v3954_v27 = vsel %vm3949_vm1, %v3943_v48, %v3944_v58  ;;  %v1963_v54 = vadd.f32 %v7525_v5, %v1769_v3  ;;  %v7754_v40 = vsel %vm3556_vm15, 1.0, %v9829_v11  ;;  %v9891_v29 = vld [vmem:[#allocation43_spill] sm:$0xff] }
 0x186   : > { %2519 = vmatprep.mubr.bf16.mxu1 %v9886_v51  ;;  %2662 = vmatprep.mubr.bf16.mxu0 %v9826_v35  ;;  %v7747_v1 = vadd.f32 %v4074_v18, %v1955_v14  ;;  %v4075_v34 = vadd.f32 %v7159_v2, %v3954_v27  ;;  %v1771_v36 = vpop.f32.mrf.mxu0  ;;  %9888 = vst [vmem:[#allocation87_spill] sm:$0xff] %v7754_v40  ;;  %v3464_v14 = vadd.s32 16, %v7132_v55 }
 0x187   : > { %v7750_v12 = vpop.f32.mrf.mxu1  ;;  %v3945_v62 = vrot.slane %v1963_v54, 7  ;;  %v1965_v41 = vadd.f32 %v7543_v28, %v1771_v36 }
 0x188   : > { %9887 = vst [vmem:[#allocation86_spill] sm:$0xff] %v7747_v1  ;;  %v7756_v48 = vadd.f32 %v4075_v34, %v1959_v30  ;;  %v1773_v5 = vpop.f32.mrf.mxu0  ;;  %v7769_v34 = vsel %vm3526_vm2, 1.0, %v9829_v11 }
 0x189   : > { %v7758_v3 = vpop.f32.mrf.mxu1  ;;  %v3953_v18 = vsel %vm3949_vm1, %v3944_v58, %v3945_v62  ;;  %v1967_v27 = vadd.f32 %v7565_v43, %v1773_v5  ;;  %9890 = vst [vmem:[#allocation89_spill] sm:$0xff] %v7769_v34  ;;  %v9892_v58 = vld [vmem:[#allocation16_spill] sm:$0xff]  ;;  %v3496_v43 = vand.u32 15, %v3464_v14 }
 0x18a   : > { %9889 = vst [vmem:[#allocation88_spill] sm:$0xff] %v7756_v48  ;;  %v4044_v54 = vmul.f32 %v7754_v40, %v3953_v18  ;;  %v1775_v1 = vpop.f32.mrf.mxu0 }
 0x18b   : > { %v7765_v28 = vpop.f32.mrf.mxu1  ;;  %v3946_v36 = vrot.slane %v1967_v27, 7  ;;  %v1969_v30 = vadd.f32 %v7571_v15, %v1775_v1  ;;  %v9893_v15 = vld [vmem:[#allocation44_spill] sm:$0xff]  ;;  %vm3528_vm3 = vcmp.ne.s32.totalorder %v3496_v43, 0 }
 0x18c   : > { %v4076_v25 = vadd.f32 %v7159_v2, %v4044_v54  ;;  %v1779_v48 = vpop.f32.mrf.mxu0  ;;  %v3982_v54 = vmul.f32 0.0, %v7769_v34  ;;  %v7799_v34 = vsel %vm3528_vm3, 1.0, %v9829_v11 }
 0x18d   : > { %v7772_v51 = vpop.f32.mrf.mxu1  ;;  %2520 = vmatmul.mubr.bf16.gmra.mxu1 %v9891_v29  ;;  %5486 = vmatmul.mubr.msk.bf16.gmra.mxu0 %vm1546_vm0, %v9892_v58  ;;  %v3952_v5 = vsel %vm3949_vm1, %v3945_v62, %v3946_v36  ;;  %v1973_v18 = vadd.f32 %v7587_v33, %v1779_v48  ;;  %9896 = vst [vmem:[#allocation92_spill] sm:$0xff] %v7799_v34 }
 0x18e   : > { %2529 = vmatprep.mubr.bf16.mxu1 %v9893_v15  ;;  %2672 = vmatprep.mubr.bf16.mxu0 %v9826_v35  ;;  %v7782_v1 = vadd.f32 %v4076_v25, %v1965_v41  ;;  %v4077_v27 = vadd.f32 %v7159_v2, %v3952_v5  ;;  %v1781_v40 = vpop.f32.mrf.mxu0 }
 0x18f   : > { %v7786_v29 = vpop.f32.mrf.mxu1  ;;  %v3947_v58 = vrot.slane %v1973_v18, 7  ;;  %v1975_v14 = vadd.f32 %v7605_v0, %v1781_v40  ;;  %v6233_v40 = vld [vmem:[%s9617_s2] ss:$0 sm:$0xff] }
 0x190   : > { %9894 = vst [vmem:[#allocation90_spill] sm:$0xff] %v7782_v1  ;;  %v7789_v16 = vadd.f32 %v4077_v27, %v1969_v30  ;;  %v1783_v62 = vpop.f32.mrf.mxu0 }
 0x191   : > { %v7791_v33 = vpop.f32.mrf.mxu1  ;;  %v3951_v41 = vsel %vm3949_vm1, %v3946_v36, %v3947_v58  ;;  %v1977_v48 = vadd.f32 %v7624_v24, %v1783_v62  ;;  %v4078_v43 = vmul.f32 0.0, %v1975_v14  ;;  %v9897_v24 = vld [vmem:[#allocation45_spill] sm:$0xff]  ;;  %v3465_v62 = vadd.s32 24, %v7132_v55 }
 0x192   : > { %9895 = vst [vmem:[#allocation91_spill] sm:$0xff] %v7789_v16  ;;  %v4014_v2 = vmul.f32 %v3982_v54, %v3951_v41  ;;  %v1785_v25 = vpop.f32.mrf.mxu0  ;;  %v9898_v54 = vld [vmem:[#allocation19_spill] sm:$0xff] }
 0x193   : > { %v7796_v5 = vpop.f32.mrf.mxu1  ;;  %v3948_v18 = vrot.slane %v1977_v48, 7  ;;  %v1979_v0 = vadd.f32 %v7630_v31, %v1785_v25  ;;  %v9899_v31 = vld [vmem:[#allocation50_spill] sm:$0xff] }
 0x194   : > { %v4046_v30 = vadd.f32 %v6233_v40, %v4014_v2  ;;  %v2208_v36 = vpop.f32.mrf.mxu0  ;;  %v9900_v48 = vrot.slane %v9899_v31, 7  ;;  %v9901_v2 = vld [vmem:[#allocation46_spill] sm:$0xff] }
 0x195   : > { %v7805_v27 = vpop.f32.mrf.mxu1  ;;  %2530 = vmatmul.mubr.bf16.gmra.mxu1 %v9897_v24  ;;  %5487 = vmatmul.mubr.msk.bf16.gmra.mxu0 %vm1546_vm0, %v9898_v54  ;;  %v3950_v41 = vsel %vm3949_vm1, %v3947_v58, %v3948_v18  ;;  %v7818_v14 = vadd.f32 %v2208_v36, %v7634_v38 }
 0x196   : > { %v3981_v25 = vsel %vm3949_vm1, %v3948_v18, %v9900_v48  ;;  %2539 = vmatprep.mubr.bf16.mxu1 %v9901_v2  ;;  %2682 = vmatprep.mubr.bf16.mxu0 %v9826_v35  ;;  %v7822_v16 = vadd.f32 %v4078_v43, %v4046_v30  ;;  %v4015_v54 = vmul.f32 0.0, %v3950_v41  ;;  %v2210_v58 = vpop.f32.mrf.mxu0  ;;  %v4079_v48 = vmul.f32 0.0, %v1979_v0 }
 0x197   : > { %v4016_v24 = vmul.f32 %v7799_v34, %v3981_v25  ;;  %v7825_v1 = vpop.f32.mrf.mxu1  ;;  %v7828_v31 = vadd.f32 %v2210_v58, %v7648_v4  ;;  %v3497_v2 = vand.u32 15, %v3465_v62  ;;  %v9905_v25 = vld [vmem:[#allocation51_spill] sm:$0xff]  ;;  %v9724_v4 = vrot.slane %v7818_v14, 1 }
 0x198   : > { %9902 = vst [vmem:[#allocation50_spill] sm:$0xff] %v7822_v16  ;;  %v4047_v18 = vadd.f32 %v6233_v40, %v4015_v54  ;;  %v2212_v36 = vpop.f32.mrf.mxu0  ;;  %v9906_v62 = vld [vmem:[#allocation47_spill] sm:$0xff]  ;;  %v3467_v58 = vadd.s32 40, %v7132_v55 }
 0x199   : > { %9903 = vst [vmem:[#allocation93_spill] sm:$0xff] %v7828_v31  ;;  %v4048_v15 = vadd.f32 %v6233_v40, %v4016_v24  ;;  %v7830_v38 = vpop.f32.mrf.mxu1  ;;  %v2213_v21 = vadd.f32 %v2212_v36, %v7656_v59  ;;  %vm3625_vm5 = vcmp.ne.s32.totalorder %v3497_v2, 15  ;;  %v9907_v59 = vld [vmem:[#allocation22_spill] sm:$0xff] }
 0x19a   : > { %v7833_v30 = vadd.f32 %v4079_v48, %v4047_v18  ;;  %v2214_v41 = vpop.f32.mrf.mxu0  ;;  %v9908_v48 = vld [vmem:[#allocation48_spill] sm:$0xff] }
 0x19b   : > { %v7836_v43 = vpop.f32.mrf.mxu1  ;;  %v4112_v16 = vadd.f32 %v4048_v15, %v9905_v25  ;;  %v4143_v24 = vrot.slane %v2213_v21, 1  ;;  %v2215_v0 = vadd.f32 %v2214_v41, %v7662_v6  ;;  %v7858_v25 = vsel %vm3625_vm5, 1.0, %v9829_v11 }
 0x19c   : > { %9904 = vst [vmem:[#allocation94_spill] sm:$0xff] %v7833_v30  ;;  %v2218_v54 = vpop.f32.mrf.mxu0  ;;  %9909 = vst [vmem:[#allocation51_spill] sm:$0xff] %v7858_v25 }
 0x19d   : > { %v7841_v40 = vpop.f32.mrf.mxu1  ;;  %2540 = vmatmul.mubr.bf16.gmra.mxu1 %v9906_v62  ;;  %5488 = vmatmul.mubr.msk.bf16.gmra.mxu0 %vm1546_vm0, %v9907_v59  ;;  %v4205_v21 = vsel %vm4174_vm4, %v9724_v4, %v4143_v24  ;;  %v4304_v15 = vrot.slane %v2215_v0, 7  ;;  %v2219_v6 = vadd.f32 %v2218_v54, %v7671_v7  ;;  %v9910_v62 = vrot.slane %v7828_v31, 7 }
 0x19e   : > { %2549 = vmatprep.mubr.bf16.mxu1 %v9908_v48  ;;  %2692 = vmatprep.mubr.bf16.mxu0 %v9826_v35  ;;  %v2220_v36 = vpop.f32.mrf.mxu0  ;;  %v4273_v41 = vadd.f32 %v4205_v21, %v4112_v16  ;;  %v3499_v4 = vand.u32 15, %v3467_v58 }
 0x19f   : > { %v7855_v2 = vpop.f32.mrf.mxu1  ;;  %v4144_v18 = vrot.slane %v2219_v6, 1  ;;  %v2221_v59 = vadd.f32 %v2220_v36, %v7685_v42  ;;  %v7865_v0 = vsel %vm3949_vm1, %v9910_v62, %v4304_v15 }
 0x1a0   : > { %9911 = vst [vmem:[#allocation95_spill] sm:$0xff] %v7865_v0  ;;  %v2222_v54 = vpop.f32.mrf.mxu0  ;;  %vm3627_vm6 = vcmp.ne.s32.totalorder %v3499_v4, 15 }
 0x1a1   : > { %v7867_v7 = vpop.f32.mrf.mxu1  ;;  %v4204_v48 = vsel %vm4174_vm4, %v4143_v24, %v4144_v18  ;;  %v4305_v16 = vrot.slane %v2221_v59, 7  ;;  %v2223_v21 = vadd.f32 %v2222_v54, %v7694_v20  ;;  %v3469_v20 = vadd.s32 56, %v7132_v55  ;;  %v9912_v59 = vld [vmem:[#allocation53_spill] sm:$0xff] }
 0x1a2   : > { %v4242_v6 = vmul.f32 %v7858_v25, %v4204_v48  ;;  %v2224_v42 = vpop.f32.mrf.mxu0 }
 0x1a3   : > { %v7873_v30 = vpop.f32.mrf.mxu1  ;;  %v4364_v36 = vsel %vm3949_vm1, %v4304_v15, %v4305_v16  ;;  %v4145_v62 = vrot.slane %v2223_v21, 1  ;;  %v2225_v0 = vadd.f32 %v2224_v42, %v7700_v13 }
 0x1a4   : > { %v2228_v58 = vpop.f32.mrf.mxu0  ;;  %v4369_v24 = vmul.f32 %v7799_v34, %v4364_v36  ;;  %v4274_v48 = vadd.f32 %v4242_v6, %v9912_v59  ;;  %v7897_v36 = vsel %vm3627_vm6, 1.0, %v9829_v11  ;;  %v3501_v59 = vand.u32 15, %v3469_v20  ;;  %v6207_v20 = vld [vmem:[%s9616_s1 + $0x410] ss:$36 sps:$4 sm:$0xff]  }
 0x1a5   : > { %v7878_v31 = vpop.f32.mrf.mxu1  ;;  %2550 = vmatmul.mubr.bf16.gmra.mxu1 %v6972_v53  ;;  %5489 = vmatmul.mubr.msk.bf16.gmra.mxu0 %vm1546_vm0, %v6777_v45  ;;  %v4203_v15 = vsel %vm4174_vm4, %v4144_v18, %v4145_v62  ;;  %v4306_v54 = vrot.slane %v2225_v0, 7  ;;  %v2229_v13 = vadd.f32 %v2228_v58, %v7704_v37  ;;  %9913 = vst [vmem:[#allocation53_spill] sm:$0xff] %v7897_v36  ;;  %v9920_v53 = vld [vmem:[#allocation13_spill] sm:$0xff] }
 0x1a6   : > { %2702 = vmatprep.mubr.bf16.mxu0 %v9826_v35  ;;  %2785 = vmatprep.mubr.bf16.mxu1 %v6529_v56  ;;  %v2230_v21 = vpop.f32.mrf.mxu0  ;;  %v7893_v42 = vadd.f32 %v4369_v24, %v4273_v41  ;;  %v4275_v25 = vadd.f32 %v4203_v15, %v7204_v61  ;;  %v6203_v15 = vld [vmem:[%s9616_s1 + $0x218] ss:$36 sps:$4 sm:$0xff]   ;;  %vm7923_vm7 = vcmp.ne.s32.totalorder %v3501_v59, 15 }
 0x1a7   : > { %v7891_v4 = vpop.f32.mrf.mxu1  ;;  %v4146_v6 = vrot.slane %v2229_v13, 1  ;;  %v2231_v18 = vadd.f32 %v2230_v21, %v7718_v19  ;;  %v4363_v37 = vsel %vm3949_vm1, %v4305_v16, %v4306_v54 }
 0x1a8   : > { %v2232_v58 = vpop.f32.mrf.mxu0  ;;  %v7904_v34 = vadd.f32 %v4363_v37, %v4274_v48 }
 0x1a9   : > { %v7902_v0 = vpop.f32.mrf.mxu1  ;;  %v4202_v41 = vsel %vm4174_vm4, %v4145_v62, %v4146_v6  ;;  %v4307_v24 = vrot.slane %v2231_v18, 7  ;;  %v2233_v61 = vadd.f32 %v2232_v58, %v7726_v52  ;;  %v9917_v58 = vld [vmem:[#allocation11_spill] sm:$0xff] }
 0x1aa   : > { %9914 = vst [vmem:[#allocation96_spill] sm:$0xff] %v7904_v34  ;;  %v4244_v19 = vmul.f32 %v7897_v36, %v4202_v41  ;;  %v2234_v16 = vpop.f32.mrf.mxu0  ;;  %v3471_v41 = vadd.s32 72, %v7132_v55  ;;  %v9918_v36 = vld [vmem:[#allocation52_spill] sm:$0xff] }
 0x1ab   : > { %v7913_v13 = vpop.f32.mrf.mxu1  ;;  %v4362_v48 = vsel %vm3949_vm1, %v4306_v54, %v4307_v24  ;;  %v4147_v62 = vrot.slane %v2233_v61, 1  ;;  %v2235_v21 = vadd.f32 %v2234_v16, %v7732_v9  ;;  %v9919_v54 = vld [vmem:[#allocation55_spill] sm:$0xff] }
 0x1ac   : > { %v2238_v18 = vpop.f32.mrf.mxu0  ;;  %v4371_v56 = vmul.f32 %v9918_v36, %v4362_v48  ;;  %v4276_v61 = vadd.f32 %v4244_v19, %v9919_v54  ;;  %v7952_v48 = vsel %vm7923_vm7, 1.0, %v9829_v11 }
 0x1ad   : > { %v7921_v52 = vpop.f32.mrf.mxu1  ;;  %5490 = vmatmul.mubr.msk.bf16.gmra.mxu0 %vm1546_vm0, %v6797_v60  ;;  %2786 = vmatmul.mubr.bf16.vlgmr.msra.gmra.mxu1 %v9917_v58  ;;  %v4201_v9 = vsel %vm4174_vm4, %v4146_v6, %v4147_v62  ;;  %v4308_v16 = vrot.slane %v2235_v21, 7  ;;  %v2239_v59 = vadd.f32 %v2238_v18, %v7736_v49  ;;  %v6208_v60 = vld [vmem:[%s9616_s1 + $0x1d0] ss:$36 sps:$4 sm:$0xff]   ;;  %v6212_v6 = vld [vmem:[%s9616_s1 + $0x3c8] ss:$36 sps:$4 sm:$0xff]   ;;  %v9921_v49 = vld [vmem:[#allocation56_spill] sm:$0xff] }
 0x1ae   : > { %5726 = vmatpush3.bf16.msra.mxu1 %v6203_v15  ;;  %2712 = vmatprep.mubr.bf16.mxu0 %v9826_v35  ;;  %v2240_v45 = vpop.f32.mrf.mxu0  ;;  %v7946_v19 = vadd.f32 %v4371_v56, %v4275_v25  ;;  %v4277_v15 = vadd.f32 %v4201_v9, %v9921_v49  ;;  %9922 = vst [vmem:[#allocation55_spill] sm:$0xff] %v7952_v48 }
 0x1af   : > { %v7940_v58 = vpop.f32.mrf.mxu1  ;;  %2795 = vmatprep.mubr.bf16.mxu1 %v9920_v53  ;;  %5727 = vmatprep.subr.bf16.mxu1 %v6207_v20  ;;  %v4148_v21 = vrot.slane %v2239_v59, 1  ;;  %v2241_v18 = vadd.f32 %v2240_v45, %v7750_v12  ;;  %v4361_v54 = vsel %vm3949_vm1, %v4307_v24, %v4308_v16  ;;  %v3503_v53 = vand.u32 15, %v3471_v41  ;;  %v6213_v12 = vld [vmem:[%s9616_s1 + $0x188] ss:$36 sps:$4 sm:$0xff]  }
 0x1b0   : > { %v2242_v36 = vpop.f32.mrf.mxu0  ;;  %v7959_v34 = vadd.f32 %v4361_v54, %v4276_v61 }
 0x1b1   : > { %v7957_v20 = vpop.f32.mrf.mxu1  ;;  %v4200_v56 = vsel %vm4174_vm4, %v4147_v62, %v4148_v21  ;;  %v4309_v25 = vrot.slane %v2241_v18, 7  ;;  %v2243_v37 = vadd.f32 %v2242_v36, %v7758_v3  ;;  %vm7978_vm8 = vcmp.ne.s32.totalorder %v3503_v53, 15 }
 0x1b2   : > { %5728 = vmatpush3.bf16.msra.mxu1 %v6208_v60  ;;  %v4246_v9 = vmul.f32 %v7952_v48, %v4200_v56  ;;  %v2244_v45 = vpop.f32.mrf.mxu0  ;;  %v6217_v60 = vld [vmem:[%s9616_s1 + $0x380] ss:$36 sps:$4 sm:$0xff]   ;;  %v9926_v56 = vld [vmem:[#allocation15_spill] sm:$0xff] }
 0x1b3   : > { %v7965_v59 = vpop.f32.mrf.mxu1  ;;  %5729 = vmatprep.subr.bf16.mxu1 %v6212_v6  ;;  %v4360_v24 = vsel %vm3949_vm1, %v4308_v16, %v4309_v25  ;;  %v4149_v41 = vrot.slane %v2243_v37, 1  ;;  %v2245_v62 = vadd.f32 %v2244_v45, %v7765_v28  ;;  %v3473_v16 = vadd.s32 88, %v7132_v55  ;;  %v9925_v6 = vld [vmem:[#allocation54_spill] sm:$0xff] }
 0x1b4   : > { %v2248_v36 = vpop.f32.mrf.mxu0  ;;  %v4373_v28 = vmul.f32 %v9925_v6, %v4360_v24  ;;  %v4278_v49 = vadd.f32 %v4246_v9, %v7263_v26  ;;  %v6218_v24 = vld [vmem:[%s9616_s1 + $0x140] ss:$36 sps:$4 sm:$0xff]   ;;  %v9927_v26 = vld [vmem:[#allocation58_spill] sm:$0xff] }
 0x1b5   : > { %v7976_v3 = vpop.f32.mrf.mxu1  ;;  %5491 = vmatmul.mubr.msk.bf16.gmra.mxu0 %vm1546_vm0, %v6814_v10  ;;  %2796 = vmatmul.mubr.bf16.gmra.mxu1 %v6659_v46  ;;  %v4199_v18 = vsel %vm4174_vm4, %v4148_v21, %v4149_v41  ;;  %v4310_v54 = vrot.slane %v2245_v62, 7  ;;  %v2249_v53 = vadd.f32 %v2248_v36, %v7772_v51  ;;  %v8004_v51 = vsel %vm7978_vm8, 1.0, %v9829_v11 }
 0x1b6   : > { %2722 = vmatprep.mubr.bf16.mxu0 %v9826_v35  ;;  %2805 = vmatprep.mubr.bf16.mxu1 %v9926_v56  ;;  %v2250_v45 = vpop.f32.mrf.mxu0  ;;  %v7998_v6 = vadd.f32 %v4373_v28, %v4277_v15  ;;  %v4279_v9 = vadd.f32 %v4199_v18, %v9927_v26  ;;  %9928 = vst [vmem:[#allocation56_spill] sm:$0xff] %v8004_v51  ;;  %v3505_v18 = vand.u32 15, %v3473_v16 }
 0x1b7   : > { %v7993_v37 = vpop.f32.mrf.mxu1  ;;  %5730 = vmatpush3.bf16.msra.mxu1 %v6213_v12  ;;  %v4150_v21 = vrot.slane %v2249_v53, 1  ;;  %v2251_v62 = vadd.f32 %v2250_v45, %v7786_v29  ;;  %v6219_v12 = vld [vmem:[%s9616_s1 + $0x338] ss:$36 sps:$4 sm:$0xff]   ;;  %v4359_v36 = vsel %vm3949_vm1, %v4309_v25, %v4310_v54 }
 0x1b8   : > { %5731 = vmatprep.subr.bf16.mxu1 %v6217_v60  ;;  %v2252_v28 = vpop.f32.mrf.mxu0  ;;  %v8014_v26 = vadd.f32 %v4359_v36, %v4278_v49  ;;  %v6220_v25 = vld [vmem:[%s9616_s1 + $0xf8] ss:$36 sps:$4 sm:$0xff]   ;;  %vm8033_vm9 = vcmp.ne.s32.totalorder %v3505_v18, 15 }
 0x1b9   : > { %v8012_v15 = vpop.f32.mrf.mxu1  ;;  %v4198_v61 = vsel %vm4174_vm4, %v4149_v41, %v4150_v21  ;;  %v4311_v53 = vrot.slane %v2251_v62, 7  ;;  %v2253_v29 = vadd.f32 %v2252_v28, %v7791_v33  ;;  %v6222_v33 = vld [vmem:[%s9616_s1 + $0x2f0] ss:$36 sps:$4 sm:$0xff]  }
 0x1ba   : > { %v4248_v60 = vmul.f32 %v8004_v51, %v4198_v61  ;;  %v2254_v48 = vpop.f32.mrf.mxu0 }
 0x1bb   : > { %v8020_v45 = vpop.f32.mrf.mxu1  ;;  %5732 = vmatpush3.bf16.msra.mxu1 %v6218_v24  ;;  %v4358_v16 = vsel %vm3949_vm1, %v4310_v54, %v4311_v53  ;;  %v4151_v49 = vrot.slane %v2253_v29, 1  ;;  %v2255_v36 = vadd.f32 %v2254_v48, %v7796_v5  ;;  %v3475_v54 = vadd.s32 104, %v7132_v55  ;;  %v9931_v5 = vld [vmem:[#allocation57_spill] sm:$0xff] }
 0x1bc   : > { %5733 = vmatprep.subr.bf16.mxu1 %v6219_v12  ;;  %v2258_v62 = vpop.f32.mrf.mxu0  ;;  %v4375_v48 = vmul.f32 %v9931_v5, %v4358_v16  ;;  %v4280_v12 = vadd.f32 %v4248_v60, %v7307_v8  ;;  %v9932_v29 = vld [vmem:[#allocation17_spill] sm:$0xff]  ;;  %v6223_v16 = vld [vmem:[%s9616_s1 + $0xb0] ss:$36 sps:$4 sm:$0xff]   ;;  %v9933_v8 = vld [vmem:[#allocation60_spill] sm:$0xff] }
 0x1bd   : > { %v8031_v41 = vpop.f32.mrf.mxu1  ;;  %5492 = vmatmul.mubr.msk.bf16.gmra.mxu0 %vm1546_vm0, %v6831_v23  ;;  %2806 = vmatmul.mubr.bf16.gmra.mxu1 %v6694_v63  ;;  %v4197_v28 = vsel %vm4174_vm4, %v4150_v21, %v4151_v49  ;;  %v4312_v61 = vrot.slane %v2255_v36, 7  ;;  %v2259_v18 = vadd.f32 %v2258_v62, %v7805_v27  ;;  %v8059_v27 = vsel %vm8033_vm9, 1.0, %v9829_v11 }
 0x1be   : > { %2732 = vmatprep.mubr.bf16.mxu0 %v9826_v35  ;;  %2815 = vmatprep.mubr.bf16.mxu1 %v9932_v29  ;;  %v2260_v23 = vpop.f32.mrf.mxu0  ;;  %v8053_v5 = vadd.f32 %v4375_v48, %v4279_v9  ;;  %v4281_v60 = vadd.f32 %v4197_v28, %v9933_v8  ;;  %9934 = vst [vmem:[#allocation15_spill] sm:$0xff] %v8059_v27  ;;  %v3507_v28 = vand.u32 15, %v3475_v54 }
 0x1bf   : > { %v8048_v51 = vpop.f32.mrf.mxu1  ;;  %5734 = vmatpush3.bf16.msra.mxu1 %v6220_v25  ;;  %v4152_v21 = vrot.slane %v2259_v18, 1  ;;  %v2261_v36 = vadd.f32 %v2260_v23, %v7825_v1  ;;  %v6225_v25 = vld [vmem:[%s9616_s1 + $0x2a8] ss:$36 sps:$4 sm:$0xff]   ;;  %v4357_v62 = vsel %vm3949_vm1, %v4311_v53, %v4312_v61 }
 0x1c0   : > { %5735 = vmatprep.subr.bf16.mxu1 %v6222_v33  ;;  %v2262_v48 = vpop.f32.mrf.mxu0  ;;  %v8069_v8 = vadd.f32 %v4357_v62, %v4280_v12  ;;  %v6226_v53 = vld [vmem:[%s9616_s1 + $0x68] ss:$36 sps:$4 sm:$0xff]   ;;  %vm8088_vm10 = vcmp.ne.s32.totalorder %v3507_v28, 15 }
 0x1c1   : > { %v8067_v9 = vpop.f32.mrf.mxu1  ;;  %v4196_v24 = vsel %vm4174_vm4, %v4151_v49, %v4152_v21  ;;  %v4313_v18 = vrot.slane %v2261_v36, 7  ;;  %v2263_v23 = vadd.f32 %v2262_v48, %v7830_v38  ;;  %v6228_v38 = vld [vmem:[%s9616_s1 + $0x260] ss:$36 sps:$4 sm:$0xff]  }
 0x1c2   : > { %v4250_v1 = vmul.f32 %v8059_v27, %v4196_v24  ;;  %v2264_v29 = vpop.f32.mrf.mxu0 }
 0x1c3   : > { %v8075_v33 = vpop.f32.mrf.mxu1  ;;  %5736 = vmatpush3.bf16.msra.mxu1 %v6223_v16  ;;  %v4356_v54 = vsel %vm3949_vm1, %v4312_v61, %v4313_v18  ;;  %v4153_v12 = vrot.slane %v2263_v23, 1  ;;  %v2265_v62 = vadd.f32 %v2264_v29, %v7836_v43  ;;  %v3477_v61 = vadd.s32 120, %v7132_v55  ;;  %v9937_v43 = vld [vmem:[#allocation59_spill] sm:$0xff]  ;;  %v9938_v23 = vld [vmem:[#allocation20_spill] sm:$0xff] }
 0x1c4   : > { %5737 = vmatprep.subr.bf16.mxu1 %v6225_v25  ;;  %v2268_v36 = vpop.f32.mrf.mxu0  ;;  %v4377_v29 = vmul.f32 %v9937_v43, %v4356_v54  ;;  %v4282_v25 = vadd.f32 %v4250_v1, %v7351_v47  ;;  %v6229_v54 = vld [vmem:[%s9616_s1 + $0x20] ss:$36 sps:$4 sm:$0xff]   ;;  %v9939_v47 = vld [vmem:[#allocation62_spill] sm:$0xff] }
 0x1c5   : > { %v8086_v49 = vpop.f32.mrf.mxu1  ;;  %5493 = vmatmul.mubr.msk.bf16.gmra.mxu0 %vm1546_vm0, %v6848_v39  ;;  %2816 = vmatmul.mubr.bf16.gmra.mxu1 %v6729_v17  ;;  %v4195_v48 = vsel %vm4174_vm4, %v4152_v21, %v4153_v12  ;;  %v4314_v24 = vrot.slane %v2265_v62, 7  ;;  %v2269_v28 = vadd.f32 %v2268_v36, %v7841_v40  ;;  %v8114_v40 = vsel %vm8088_vm10, 1.0, %v9829_v11 }
 0x1c6   : > { %2742 = vmatprep.mubr.bf16.mxu0 %v9826_v35  ;;  %2825 = vmatprep.mubr.bf16.mxu1 %v9938_v23  ;;  %v2270_v39 = vpop.f32.mrf.mxu0  ;;  %v8108_v43 = vadd.f32 %v4377_v29, %v4281_v60  ;;  %v4283_v1 = vadd.f32 %v4195_v48, %v9939_v47  ;;  %9940 = vst [vmem:[#allocation58_spill] sm:$0xff] %v8114_v40  ;;  %v3509_v17 = vand.u32 15, %v3477_v61 }
 0x1c7   : > { %v8103_v27 = vpop.f32.mrf.mxu1  ;;  %5738 = vmatpush3.bf16.msra.mxu1 %v6226_v53  ;;  %v4154_v21 = vrot.slane %v2269_v28, 1  ;;  %v2271_v62 = vadd.f32 %v2270_v39, %v7855_v2  ;;  %v4355_v53 = vsel %vm3949_vm1, %v4313_v18, %v4314_v24 }
 0x1c8   : > { %5739 = vmatprep.subr.bf16.mxu1 %v6228_v38  ;;  %v2272_v23 = vpop.f32.mrf.mxu0  ;;  %v8121_v60 = vadd.f32 %v4355_v53, %v4282_v25  ;;  %vm3637_vm11 = vcmp.ne.s32.totalorder %v3509_v17, 15  ;;  %v9942_v53 = vld [vmem:[#allocation23_spill] sm:$0xff] }
 0x1c9   : > { %v8119_v36 = vpop.f32.mrf.mxu1  ;;  %v4194_v29 = vsel %vm4174_vm4, %v4153_v12, %v4154_v21  ;;  %v4315_v48 = vrot.slane %v2271_v62, 7  ;;  %v2273_v16 = vadd.f32 %v2272_v23, %v7867_v7  ;;  %v3479_v7 = vadd.s32 136, %v7132_v55  ;;  %v9941_v12 = vld [vmem:[#allocation61_spill] sm:$0xff] }
 0x1ca   : > { %v4252_v28 = vmul.f32 %v8114_v40, %v4194_v29  ;;  %v2274_v39 = vpop.f32.mrf.mxu0 }
 0x1cb   : > { %v8127_v47 = vpop.f32.mrf.mxu1  ;;  %5740 = vmatpush3.bf16.msra.mxu1 %v6229_v54  ;;  %v4354_v2 = vsel %vm3949_vm1, %v4314_v24, %v4315_v48  ;;  %v4155_v18 = vrot.slane %v2273_v16, 1  ;;  %v2275_v38 = vadd.f32 %v2274_v39, %v7873_v30  ;;  %v9943_v39 = vld [vmem:[#allocation64_spill] sm:$0xff] }
 0x1cc   : > { %v2278_v25 = vpop.f32.mrf.mxu0  ;;  %v4379_v23 = vmul.f32 %v9941_v12, %v4354_v2  ;;  %v4284_v54 = vadd.f32 %v4252_v28, %v7395_v22  ;;  %v8151_v2 = vsel %vm3637_vm11, 1.0, %v9829_v11 }
 0x1cd   : > { %v8132_v61 = vpop.f32.mrf.mxu1  ;;  %5494 = vmatmul.mubr.msk.bf16.gmra.mxu0 %vm1546_vm0, %v6865_v57  ;;  %2826 = vmatmul.mubr.bf16.gmra.mxu1 %v6752_v32  ;;  %v4193_v24 = vsel %vm4174_vm4, %v4154_v21, %v4155_v18  ;;  %v4316_v62 = vrot.slane %v2275_v38, 7  ;;  %v2279_v30 = vadd.f32 %v2278_v25, %v7878_v31  ;;  %9944 = vst [vmem:[#allocation60_spill] sm:$0xff] %v8151_v2  ;;  %v3511_v25 = vand.u32 15, %v3479_v7  ;;  %v6224_v7 = vld [vmem:[%s9616_s1 + $0x5c0] ss:$36 sps:$4 sm:$0xff]   ;;  %v9963_v57 = vld [vmem:[#allocation70_spill] sm:$0xff] }
 0x1ce   : > { %2835 = vmatprep.mubr.bf16.mxu1 %v9942_v53  ;;  %2978 = vmatprep.mubr.bf16.mxu0 %v9826_v35  ;;  %v2280_v29 = vpop.f32.mrf.mxu0  ;;  %v8147_v16 = vadd.f32 %v4379_v23, %v4283_v1  ;;  %v4285_v40 = vadd.f32 %v4193_v24, %v9943_v39 }
 0x1cf   : > { %v8145_v17 = vpop.f32.mrf.mxu1  ;;  %v4156_v22 = vrot.slane %v2279_v30, 1  ;;  %v2281_v21 = vadd.f32 %v2280_v29, %v7891_v4  ;;  %v4353_v31 = vsel %vm3949_vm1, %v4315_v48, %v4316_v62  ;;  %vm8174_vm12 = vcmp.ne.s32.totalorder %v3511_v25, 15 }
 0x1d0   : > { %v2282_v38 = vpop.f32.mrf.mxu0  ;;  %v8158_v12 = vadd.f32 %v4353_v31, %v4284_v54  ;;  %v9948_v31 = vld [vmem:[#allocation63_spill] sm:$0xff] }
 0x1d1   : > { %v8156_v28 = vpop.f32.mrf.mxu1  ;;  %v4192_v1 = vsel %vm4174_vm4, %v4155_v18, %v4156_v22  ;;  %v4317_v23 = vrot.slane %v2281_v21, 7  ;;  %v2283_v24 = vadd.f32 %v2282_v38, %v7902_v0  ;;  %v9947_v21 = vld [vmem:[#allocation5_spill] sm:$0xff]  ;;  %v9949_v38 = vld [vmem:[#allocation66_spill] sm:$0xff] }
 0x1d2   : > { %v4254_v39 = vmul.f32 %v8151_v2, %v4192_v1  ;;  %v2284_v4 = vpop.f32.mrf.mxu0 }
 0x1d3   : > { %v8164_v30 = vpop.f32.mrf.mxu1  ;;  %v4352_v48 = vsel %vm3949_vm1, %v4316_v62, %v4317_v23  ;;  %v4157_v29 = vrot.slane %v2283_v24, 1  ;;  %v2285_v53 = vadd.f32 %v2284_v4, %v7913_v13  ;;  %v3481_v62 = vadd.s32 152, %v7132_v55 }
 0x1d4   : > { %v2288_v18 = vpop.f32.mrf.mxu0  ;;  %v4381_v13 = vmul.f32 %v9948_v31, %v4352_v48  ;;  %v4286_v1 = vadd.f32 %v4254_v39, %v9949_v38  ;;  %v9952_v48 = vld [vmem:[#allocation67_spill] sm:$0xff]  ;;  %v6227_v39 = vld [vmem:[%s9616_s1 + $0x578] ss:$36 sps:$4 sm:$0xff]  }
 0x1d5   : > { %v8172_v54 = vpop.f32.mrf.mxu1  ;;  %2836 = vmatmul.mubr.bf16.gmra.mxu1 %v6775_v44  ;;  %5495 = vmatmul.mubr.msk.bf16.vlgmr.msra.gmra.mxu0 %vm1546_vm0, %v9947_v21  ;;  %v4191_v24 = vsel %vm4174_vm4, %v4156_v22, %v4157_v29  ;;  %v4318_v4 = vrot.slane %v2285_v53, 7  ;;  %v2289_v25 = vadd.f32 %v2288_v18, %v7921_v52  ;;  %v9950_v21 = vld [vmem:[#allocation79_spill] sm:$0xff]  ;;  %v8198_v22 = vsel %vm8174_vm12, 1.0, %v9829_v11 }
 0x1d6   : > { %2845 = vmatprep.mubr.bf16.mxu1 %v6782_v50  ;;  %2988 = vmatprep.mubr.bf16.mxu0 %v9826_v35  ;;  %v2290_v44 = vpop.f32.mrf.mxu0  ;;  %v8192_v32 = vadd.f32 %v4381_v13, %v4285_v40  ;;  %v4287_v31 = vadd.f32 %v4191_v24, %v9952_v48  ;;  %9953 = vst [vmem:[#allocation64_spill] sm:$0xff] %v8198_v22  ;;  %v3513_v13 = vand.u32 15, %v3481_v62 }
 0x1d7   : > { %v8189_v2 = vpop.f32.mrf.mxu1  ;;  %5860 = vmatpush3.bf16.msra.mxu0 %v9950_v21  ;;  %v4158_v53 = vrot.slane %v2289_v25, 1  ;;  %v2291_v52 = vadd.f32 %v2290_v44, %v7940_v58  ;;  %v4351_v18 = vsel %vm3949_vm1, %v4317_v23, %v4318_v4 }
 0x1d8   : > { %9951 = vst [vmem:[#allocation62_spill] sm:$0xff] %v8192_v32  ;;  %5861 = vmatprep.subr.bf16.mxu0 %v6224_v7  ;;  %v2292_v21 = vpop.f32.mrf.mxu0  ;;  %v8208_v38 = vadd.f32 %v4351_v18, %v4286_v1  ;;  %vm8224_vm13 = vcmp.ne.s32.totalorder %v3513_v13, 15  ;;  %v9957_v18 = vld [vmem:[#allocation27_spill] sm:$0xff] }
 0x1d9   : > { %v8206_v40 = vpop.f32.mrf.mxu1  ;;  %v4190_v0 = vsel %vm4174_vm4, %v4157_v29, %v4158_v53  ;;  %v4319_v24 = vrot.slane %v2291_v52, 7  ;;  %v2293_v44 = vadd.f32 %v2292_v21, %v7957_v20  ;;  %v6230_v29 = vld [vmem:[%s9616_s1 + $0x530] ss:$36 sps:$4 sm:$0xff]  }
 0x1da   : > { %9954 = vst [vmem:[#allocation66_spill] sm:$0xff] %v8208_v38  ;;  %v4256_v58 = vmul.f32 %v8198_v22, %v4190_v0  ;;  %v2294_v48 = vpop.f32.mrf.mxu0  ;;  %v9960_v0 = vld [vmem:[#allocation69_spill] sm:$0xff] }
 0x1db   : > { %v8214_v25 = vpop.f32.mrf.mxu1  ;;  %5862 = vmatpush3.bf16.msra.mxu0 %v6224_v7  ;;  %v4350_v23 = vsel %vm3949_vm1, %v4318_v4, %v4319_v24  ;;  %v4159_v50 = vrot.slane %v2293_v44, 1  ;;  %v2295_v62 = vadd.f32 %v2294_v48, %v7965_v59  ;;  %v9958_v7 = vld [vmem:[#allocation6_spill] sm:$0xff]  ;;  %v3483_v4 = vadd.s32 168, %v7132_v55  ;;  %v9959_v59 = vld [vmem:[#allocation65_spill] sm:$0xff] }
 0x1dc   : > { %5863 = vmatprep.subr.bf16.mxu0 %v6227_v39  ;;  %v2298_v20 = vpop.f32.mrf.mxu0  ;;  %v4383_v21 = vmul.f32 %v9959_v59, %v4350_v23  ;;  %v4288_v44 = vadd.f32 %v4256_v58, %v9960_v0  ;;  %v9961_v38 = vld [vmem:[#allocation29_spill] sm:$0xff]  ;;  %v8247_v58 = vsel %vm8224_vm13, 1.0, %v9829_v11 }
 0x1dd   : > { %v8222_v1 = vpop.f32.mrf.mxu1  ;;  %2846 = vmatmul.mubr.bf16.gmra.mxu1 %v9957_v18  ;;  %5496 = vmatmul.mubr.msk.bf16.gmra.mxu0 %vm1546_vm0, %v9958_v7  ;;  %v4189_v48 = vsel %vm4174_vm4, %v4158_v53, %v4159_v50  ;;  %v4320_v22 = vrot.slane %v2295_v62, 7  ;;  %v2299_v13 = vadd.f32 %v2298_v20, %v7976_v3  ;;  %9964 = vst [vmem:[#allocation67_spill] sm:$0xff] %v8247_v58  ;;  %v6231_v62 = vld [vmem:[%s9616_s1 + $0x4e8] ss:$36 sps:$4 sm:$0xff]  }
 0x1de   : > { %2855 = vmatprep.mubr.bf16.mxu1 %v9961_v38  ;;  %2998 = vmatprep.mubr.bf16.mxu0 %v9826_v35  ;;  %v2300_v32 = vpop.f32.mrf.mxu0  ;;  %v8241_v7 = vadd.f32 %v4383_v21, %v4287_v31  ;;  %v4289_v23 = vadd.f32 %v4189_v48, %v9963_v57  ;;  %v3515_v57 = vand.u32 15, %v3483_v4  ;;  %v9972_v38 = vld [vmem:[#allocation31_spill] sm:$0xff] }
 0x1df   : > { %v8239_v18 = vpop.f32.mrf.mxu1  ;;  %5864 = vmatpush3.bf16.msra.mxu0 %v6227_v39  ;;  %v4160_v53 = vrot.slane %v2299_v13, 1  ;;  %v2301_v3 = vadd.f32 %v2300_v32, %v7993_v37  ;;  %v4349_v39 = vsel %vm3949_vm1, %v4319_v24, %v4320_v22 }
 0x1e0   : > { %9962 = vst [vmem:[#allocation79_spill] sm:$0xff] %v8241_v7  ;;  %5865 = vmatprep.subr.bf16.mxu0 %v6230_v29  ;;  %v2302_v20 = vpop.f32.mrf.mxu0  ;;  %v8257_v21 = vadd.f32 %v4349_v39, %v4288_v44  ;;  %vm8273_vm14 = vcmp.ne.s32.totalorder %v3515_v57, 15  ;;  %v9968_v39 = vld [vmem:[#allocation30_spill] sm:$0xff] }
 0x1e1   : > { %v8255_v31 = vpop.f32.mrf.mxu1  ;;  %v4188_v52 = vsel %vm4174_vm4, %v4159_v50, %v4160_v53  ;;  %v4321_v0 = vrot.slane %v2301_v3, 7  ;;  %v2303_v32 = vadd.f32 %v2302_v20, %v8012_v15  ;;  %v6232_v50 = vld [vmem:[%s9616_s1 + $0x4a0] ss:$36 sps:$4 sm:$0xff]  }
 0x1e2   : > { %9965 = vst [vmem:[#allocation69_spill] sm:$0xff] %v8257_v21  ;;  %v4258_v37 = vmul.f32 %v8247_v58, %v4188_v52  ;;  %v2304_v13 = vpop.f32.mrf.mxu0  ;;  %v9971_v52 = vld [vmem:[#allocation72_spill] sm:$0xff] }
 0x1e3   : > { %v8263_v48 = vpop.f32.mrf.mxu1  ;;  %5866 = vmatpush3.bf16.msra.mxu0 %v6230_v29  ;;  %v4348_v24 = vsel %vm3949_vm1, %v4320_v22, %v4321_v0  ;;  %v4161_v59 = vrot.slane %v2303_v32, 1  ;;  %v2305_v4 = vadd.f32 %v2304_v13, %v8020_v45  ;;  %v9969_v29 = vld [vmem:[#allocation7_spill] sm:$0xff]  ;;  %v3485_v22 = vadd.s32 184, %v7132_v55  ;;  %v9970_v45 = vld [vmem:[#allocation68_spill] sm:$0xff] }
 0x1e4   : > { %5867 = vmatprep.subr.bf16.mxu0 %v6231_v62  ;;  %v2308_v15 = vpop.f32.mrf.mxu0  ;;  %v4385_v20 = vmul.f32 %v9970_v45, %v4348_v24  ;;  %v4290_v32 = vadd.f32 %v4258_v37, %v9971_v52  ;;  %v8296_v37 = vsel %vm8273_vm14, 1.0, %v9829_v11  ;;  %v9983_v45 = vld [vmem:[#allocation34_spill] sm:$0xff] }
 0x1e5   : > { %v8271_v44 = vpop.f32.mrf.mxu1  ;;  %2856 = vmatmul.mubr.bf16.gmra.mxu1 %v9968_v39  ;;  %5497 = vmatmul.mubr.msk.bf16.gmra.mxu0 %vm1546_vm0, %v9969_v29  ;;  %v4187_v13 = vsel %vm4174_vm4, %v4160_v53, %v4161_v59  ;;  %v4322_v58 = vrot.slane %v2305_v4, 7  ;;  %v2309_v57 = vadd.f32 %v2308_v15, %v8031_v41  ;;  %v9974_v29 = vld [vmem:[#allocation73_spill] sm:$0xff]  ;;  %9975 = vst [vmem:[#allocation72_spill] sm:$0xff] %v8296_v37 }
 0x1e6   : > { %2865 = vmatprep.mubr.bf16.mxu1 %v9972_v38  ;;  %3008 = vmatprep.mubr.bf16.mxu0 %v9826_v35  ;;  %v2310_v21 = vpop.f32.mrf.mxu0  ;;  %v8290_v7 = vadd.f32 %v4385_v20, %v4289_v23  ;;  %v4291_v24 = vadd.f32 %v4187_v13, %v9974_v29 }
 0x1e7   : > { %v8288_v39 = vpop.f32.mrf.mxu1  ;;  %5868 = vmatpush3.bf16.msra.mxu0 %v6231_v62  ;;  %v4162_v53 = vrot.slane %v2309_v57, 1  ;;  %v2311_v41 = vadd.f32 %v2310_v21, %v8048_v51  ;;  %v4347_v4 = vsel %vm3949_vm1, %v4321_v0, %v4322_v58  ;;  %v3517_v62 = vand.u32 15, %v3485_v22 }
 0x1e8   : > { %9973 = vst [vmem:[#allocation70_spill] sm:$0xff] %v8290_v7  ;;  %5869 = vmatprep.subr.bf16.mxu0 %v6232_v50  ;;  %v2312_v52 = vpop.f32.mrf.mxu0  ;;  %v8303_v23 = vadd.f32 %v4347_v4, %v4290_v32 }
 0x1e9   : > { %v8301_v15 = vpop.f32.mrf.mxu1  ;;  %v4186_v29 = vsel %vm4174_vm4, %v4161_v59, %v4162_v53  ;;  %v4323_v20 = vrot.slane %v2311_v41, 7  ;;  %v2313_v3 = vadd.f32 %v2312_v52, %v8067_v9  ;;  %vm8314_vm15 = vcmp.ne.s32.totalorder %v3517_v62, 15  ;;  %v9979_v9 = vld [vmem:[#allocation32_spill] sm:$0xff]  ;;  %v9980_v41 = vld [vmem:[#allocation9_spill] sm:$0xff]  ;;  %v9981_v52 = vld [vmem:[#allocation71_spill] sm:$0xff] }
 0x1ea   : > { %9976 = vst [vmem:[#allocation73_spill] sm:$0xff] %v8303_v23  ;;  %v4260_v13 = vmul.f32 %v8296_v37, %v4186_v29  ;;  %v2314_v51 = vpop.f32.mrf.mxu0  ;;  %v9985_v23 = vld [vmem:[#allocation76_spill] sm:$0xff] }
 0x1eb   : > { %v8309_v57 = vpop.f32.mrf.mxu1  ;;  %5870 = vmatpush3.bf16.msra.mxu0 %v6232_v50  ;;  %v4346_v21 = vsel %vm3949_vm1, %v4322_v58, %v4323_v20  ;;  %v4163_v0 = vrot.slane %v2313_v3, 1  ;;  %v2315_v22 = vadd.f32 %v2314_v51, %v8075_v33  ;;  %v3487_v50 = vadd.s32 200, %v7132_v55  ;;  %v9982_v58 = vld [vmem:[#allocation75_spill] sm:$0xff] }
 0x1ec   : > { %v2318_v32 = vpop.f32.mrf.mxu0  ;;  %v4387_v29 = vmul.f32 %v9981_v52, %v4346_v21  ;;  %v4292_v3 = vadd.f32 %v4260_v13, %v9982_v58  ;;  %v8339_v13 = vsel %vm8314_vm15, 1.0, %v9829_v11 }
 0x1ed   : > { %v8318_v59 = vpop.f32.mrf.mxu1  ;;  %2866 = vmatmul.mubr.bf16.gmra.mxu1 %v9979_v9  ;;  %5498 = vmatmul.mubr.msk.bf16.gmra.mxu0 %vm1546_vm0, %v9980_v41  ;;  %v4185_v33 = vsel %vm4174_vm4, %v4162_v53, %v4163_v0  ;;  %v4324_v62 = vrot.slane %v2315_v22, 7  ;;  %v2319_v51 = vadd.f32 %v2318_v32, %v8086_v49  ;;  %9986 = vst [vmem:[#allocation76_spill] sm:$0xff] %v8339_v13  ;;  %v3519_v58 = vand.u32 15, %v3487_v50 }
 0x1ee   : > { %2875 = vmatprep.mubr.bf16.mxu1 %v9983_v45  ;;  %3018 = vmatprep.mubr.bf16.mxu0 %v9826_v35  ;;  %v2320_v37 = vpop.f32.mrf.mxu0  ;;  %v8333_v38 = vadd.f32 %v4387_v29, %v4291_v24  ;;  %v4293_v7 = vadd.f32 %v4185_v33, %v9985_v23 }
 0x1ef   : > { %v8331_v9 = vpop.f32.mrf.mxu1  ;;  %v4164_v53 = vrot.slane %v2319_v51, 1  ;;  %v2321_v21 = vadd.f32 %v2320_v37, %v8103_v27  ;;  %v4345_v49 = vsel %vm3949_vm1, %v4323_v20, %v4324_v62  ;;  %vm8357_vm2 = vcmp.ne.s32.totalorder %v3519_v58, 15 }
 0x1f0   : > { %9984 = vst [vmem:[#allocation75_spill] sm:$0xff] %v8333_v38  ;;  %v2322_v22 = vpop.f32.mrf.mxu0  ;;  %v8346_v52 = vadd.f32 %v4345_v49, %v4292_v3  ;;  %v3489_v49 = vadd.s32 216, %v7132_v55  ;;  %v9996_v38 = vld [vmem:[#allocation80_spill] sm:$0xff] }
 0x1f1   : > { %v8344_v32 = vpop.f32.mrf.mxu1  ;;  %v4184_v24 = vsel %vm4174_vm4, %v4163_v0, %v4164_v53  ;;  %v4325_v23 = vrot.slane %v2321_v21, 7  ;;  %v2323_v4 = vadd.f32 %v2322_v22, %v8119_v36  ;;  %v9990_v21 = vld [vmem:[#allocation35_spill] sm:$0xff]  ;;  %v9991_v36 = vld [vmem:[#allocation10_spill] sm:$0xff] }
 0x1f2   : > { %9987 = vst [vmem:[#allocation97_spill] sm:$0xff] %v8346_v52  ;;  %v4262_v29 = vmul.f32 %v8339_v13, %v4184_v24  ;;  %v2324_v33 = vpop.f32.mrf.mxu0  ;;  %v9992_v22 = vld [vmem:[#allocation74_spill] sm:$0xff]  ;;  %v9994_v13 = vld [vmem:[#allocation37_spill] sm:$0xff] }
 0x1f3   : > { %v8352_v51 = vpop.f32.mrf.mxu1  ;;  %v4344_v27 = vsel %vm3949_vm1, %v4324_v62, %v4325_v23  ;;  %v4165_v37 = vrot.slane %v2323_v4, 1  ;;  %v2325_v20 = vadd.f32 %v2324_v33, %v8127_v47  ;;  %v9993_v62 = vld [vmem:[#allocation78_spill] sm:$0xff] }
 0x1f4   : > { %v2328_v50 = vpop.f32.mrf.mxu0  ;;  %v4389_v24 = vmul.f32 %v9992_v22, %v4344_v27  ;;  %v4294_v4 = vadd.f32 %v4262_v29, %v9993_v62  ;;  %v8382_v29 = vsel %vm8357_vm2, 1.0, %v9829_v11  ;;  %v3521_v62 = vand.u32 15, %v3489_v49 }
 0x1f5   : > { %v8361_v0 = vpop.f32.mrf.mxu1  ;;  %2876 = vmatmul.mubr.bf16.gmra.mxu1 %v9990_v21  ;;  %5499 = vmatmul.mubr.msk.bf16.gmra.mxu0 %vm1546_vm0, %v9991_v36  ;;  %v4183_v47 = vsel %vm4174_vm4, %v4164_v53, %v4165_v37  ;;  %v4326_v58 = vrot.slane %v2325_v20, 7  ;;  %v2329_v33 = vadd.f32 %v2328_v50, %v8132_v61  ;;  %9997 = vst [vmem:[#allocation80_spill] sm:$0xff] %v8382_v29 }
 0x1f6   : > { %2885 = vmatprep.mubr.bf16.mxu1 %v9994_v13  ;;  %3028 = vmatprep.mubr.bf16.mxu0 %v9826_v35  ;;  %v2330_v21 = vpop.f32.mrf.mxu0  ;;  %v8376_v52 = vadd.f32 %v4389_v24, %v4293_v7  ;;  %v4295_v36 = vadd.f32 %v4183_v47, %v9996_v38  ;;  %vm8401_vm3 = vcmp.ne.s32.totalorder %v3521_v62, 15 }
 0x1f7   : > { %v8374_v45 = vpop.f32.mrf.mxu1  ;;  %v4166_v53 = vrot.slane %v2329_v33, 1  ;;  %v2331_v27 = vadd.f32 %v2330_v21, %v8145_v17  ;;  %v4343_v61 = vsel %vm3949_vm1, %v4325_v23, %v4326_v58  ;;  %v3491_v17 = vadd.s32 232, %v7132_v55 }
 0x1f8   : > { %9995 = vst [vmem:[#allocation78_spill] sm:$0xff] %v8376_v52  ;;  %v2332_v20 = vpop.f32.mrf.mxu0  ;;  %v8389_v22 = vadd.f32 %v4343_v61, %v4294_v4 }
 0x1f9   : > { %v8387_v50 = vpop.f32.mrf.mxu1  ;;  %v4182_v38 = vsel %vm4174_vm4, %v4165_v37, %v4166_v53  ;;  %v4327_v7 = vrot.slane %v2331_v27, 7  ;;  %v2333_v3 = vadd.f32 %v2332_v20, %v8156_v28  ;;  %v10001_v28 = vld [vmem:[#allocation38_spill] sm:$0xff]  ;;  %v10002_v27 = vld [vmem:[#allocation12_spill] sm:$0xff]  ;;  %v10003_v20 = vld [vmem:[#allocation77_spill] sm:$0xff] }
 0x1fa   : > { %9998 = vst [vmem:[#allocation98_spill] sm:$0xff] %v8389_v22  ;;  %v4264_v24 = vmul.f32 %v8382_v29, %v4182_v38  ;;  %v2334_v47 = vpop.f32.mrf.mxu0  ;;  %v10004_v29 = vld [vmem:[#allocation82_spill] sm:$0xff] }
 0x1fb   : > { %v8395_v33 = vpop.f32.mrf.mxu1  ;;  %v4342_v23 = vsel %vm3949_vm1, %v4326_v58, %v4327_v7  ;;  %v4167_v21 = vrot.slane %v2333_v3, 1  ;;  %v2335_v49 = vadd.f32 %v2334_v47, %v8164_v30  ;;  %v10005_v3 = vld [vmem:[#allocation40_spill] sm:$0xff] }
 0x1fc   : > { %v2338_v4 = vpop.f32.mrf.mxu0  ;;  %v4391_v38 = vmul.f32 %v10003_v20, %v4342_v23  ;;  %v4296_v13 = vadd.f32 %v4264_v24, %v10004_v29  ;;  %v8425_v29 = vsel %vm8401_vm3, 1.0, %v9829_v11 }
 0x1fd   : > { %v8405_v37 = vpop.f32.mrf.mxu1  ;;  %2886 = vmatmul.mubr.bf16.gmra.mxu1 %v10001_v28  ;;  %5500 = vmatmul.mubr.msk.bf16.gmra.mxu0 %vm1546_vm0, %v10002_v27  ;;  %v4181_v58 = vsel %vm4174_vm4, %v4166_v53, %v4167_v21  ;;  %v4328_v30 = vrot.slane %v2335_v49, 7  ;;  %v2339_v62 = vadd.f32 %v2338_v4, %v8172_v54  ;;  %v3523_v28 = vand.u32 15, %v3491_v17  ;;  %v10007_v27 = vld [vmem:[#allocation83_spill] sm:$0xff] }
 0x1fe   : > { %2895 = vmatprep.mubr.bf16.mxu1 %v10005_v3  ;;  %3038 = vmatprep.mubr.bf16.mxu0 %v9826_v35  ;;  %v2340_v47 = vpop.f32.mrf.mxu0  ;;  %v8419_v52 = vadd.f32 %v4391_v38, %v4295_v36  ;;  %v4297_v23 = vadd.f32 %v4181_v58, %v10007_v27  ;;  %10008 = vst [vmem:[#allocation83_spill] sm:$0xff] %v8425_v29 }
 0x1ff   : > { %v8417_v22 = vpop.f32.mrf.mxu1  ;;  %v4168_v53 = vrot.slane %v2339_v62, 1  ;;  %v2341_v54 = vadd.f32 %v2340_v47, %v8189_v2  ;;  %v4341_v24 = vsel %vm3949_vm1, %v4327_v7, %v4328_v30  ;;  %vm8440_vm5 = vcmp.ne.s32.totalorder %v3523_v28, 15 }
 0x200   : > { %10006 = vst [vmem:[#allocation82_spill] sm:$0xff] %v8419_v52  ;;  %v2342_v49 = vpop.f32.mrf.mxu0  ;;  %v8432_v20 = vadd.f32 %v4341_v24, %v4296_v13  ;;  %v10013_v24 = vld [vmem:[#allocation14_spill] sm:$0xff]  ;;  %v3463_v28 = vadd.s32 8, %v7132_v55 }
 0x201   : > { %v8430_v4 = vpop.f32.mrf.mxu1  ;;  %v4180_v36 = vsel %vm4174_vm4, %v4167_v21, %v4168_v53  ;;  %v4329_v17 = vrot.slane %v2341_v54, 7  ;;  %v2343_v27 = vadd.f32 %v2342_v49, %v8206_v40  ;;  %v3493_v21 = vadd.s32 248, %v7132_v55  ;;  %v10012_v40 = vld [vmem:[#allocation41_spill] sm:$0xff] }
 0x202   : > { %10009 = vst [vmem:[#allocation99_spill] sm:$0xff] %v8432_v20  ;;  %v4266_v61 = vmul.f32 %v8425_v29, %v4180_v36  ;;  %v2344_v38 = vpop.f32.mrf.mxu0  ;;  %v10014_v49 = vld [vmem:[#allocation81_spill] sm:$0xff]  ;;  %v3495_v2 = vand.u32 15, %v3463_v28 }
 0x203   : > { %v8438_v58 = vpop.f32.mrf.mxu1  ;;  %v4340_v7 = vsel %vm3949_vm1, %v4328_v30, %v4329_v17  ;;  %v4169_v13 = vrot.slane %v2343_v27, 1  ;;  %v2345_v62 = vadd.f32 %v2344_v38, %v8214_v25  ;;  %v10015_v29 = vld [vmem:[#allocation85_spill] sm:$0xff]  ;;  %v10016_v38 = vld [vmem:[#allocation42_spill] sm:$0xff] }
 0x204   : > { %v2348_v47 = vpop.f32.mrf.mxu0  ;;  %v4393_v36 = vmul.f32 %v10014_v49, %v4340_v7  ;;  %v4298_v3 = vadd.f32 %v4266_v61, %v10015_v29  ;;  %v10019_v29 = vld [vmem:[#allocation86_spill] sm:$0xff]  ;;  %vm3623_vm7 = vcmp.ne.s32.totalorder %v3495_v2, 15 }
 0x205   : > { %v8448_v54 = vpop.f32.mrf.mxu1  ;;  %2896 = vmatmul.mubr.bf16.gmra.mxu1 %v10012_v40  ;;  %5501 = vmatmul.mubr.msk.bf16.gmra.mxu0 %vm1546_vm0, %v10013_v24  ;;  %v4179_v30 = vsel %vm4174_vm4, %v4168_v53, %v4169_v13  ;;  %v4330_v25 = vrot.slane %v2345_v62, 7  ;;  %v2349_v27 = vadd.f32 %v2348_v47, %v8222_v1  ;;  %v8464_v40 = vsel %vm8440_vm5, 1.0, %v9829_v11 }
 0x206   : > { %2905 = vmatprep.mubr.bf16.mxu1 %v10016_v38  ;;  %3048 = vmatprep.mubr.bf16.mxu0 %v9826_v35  ;;  %10017 = vst [vmem:[#allocation85_spill] sm:$0xff] %v8464_v40  ;;  %v2350_v20 = vpop.f32.mrf.mxu0  ;;  %v8468_v7 = vadd.f32 %v4393_v36, %v4297_v23  ;;  %v4299_v61 = vadd.f32 %v4179_v30, %v10019_v29  ;;  %v3525_v1 = vand.u32 15, %v3493_v21  ;;  %v10021_v29 = vld [vmem:[#allocation43_spill] sm:$0xff] }
 0x207   : > { %v8466_v52 = vpop.f32.mrf.mxu1  ;;  %v4170_v53 = vrot.slane %v2349_v27, 1  ;;  %v2351_v62 = vadd.f32 %v2350_v20, %v8239_v18  ;;  %v4339_v47 = vsel %vm3949_vm1, %v4329_v17, %v4330_v25 }
 0x208   : > { %10018 = vst [vmem:[#allocation100_spill] sm:$0xff] %v8468_v7  ;;  %v2352_v49 = vpop.f32.mrf.mxu0  ;;  %v8476_v24 = vadd.f32 %v4339_v47, %v4298_v3  ;;  %vm3653_vm6 = vcmp.ne.s32.totalorder %v3525_v1, 15  ;;  %v10025_v1 = vld [vmem:[#allocation44_spill] sm:$0xff] }
 0x209   : > { %v8474_v38 = vpop.f32.mrf.mxu1  ;;  %v4178_v41 = vsel %vm4174_vm4, %v4169_v13, %v4170_v53  ;;  %v4331_v23 = vrot.slane %v2351_v62, 7  ;;  %v2353_v36 = vadd.f32 %v2352_v49, %v8255_v31  ;;  %v10022_v13 = vld [vmem:[#allocation16_spill] sm:$0xff] }
 0x20a   : > { %10020 = vst [vmem:[#allocation86_spill] sm:$0xff] %v8476_v24  ;;  %v4268_v30 = vmul.f32 %v8464_v40, %v4178_v41  ;;  %v2354_v27 = vpop.f32.mrf.mxu0  ;;  %v10023_v31 = vld [vmem:[#allocation84_spill] sm:$0xff] }
 0x20b   : > { %v8482_v18 = vpop.f32.mrf.mxu1  ;;  %v4338_v20 = vsel %vm3949_vm1, %v4330_v25, %v4331_v23  ;;  %v4171_v17 = vrot.slane %v2353_v36, 1  ;;  %v2355_v21 = vadd.f32 %v2354_v27, %v8263_v48  ;;  %v10024_v49 = vld [vmem:[#allocation88_spill] sm:$0xff]  ;;  %v8500_v36 = vsel %vm3653_vm6, 1.0, %v9829_v11 }
 0x20c   : > { %v2358_v3 = vpop.f32.mrf.mxu0  ;;  %v4395_v41 = vmul.f32 %v10023_v31, %v4338_v20  ;;  %v4300_v62 = vadd.f32 %v4268_v30, %v10024_v49  ;;  %10026 = vst [vmem:[#allocation16_spill] sm:$0xff] %v8500_v36  ;;  %v10028_v20 = vld [vmem:[#allocation90_spill] sm:$0xff] }
 0x20d   : > { %v8487_v28 = vpop.f32.mrf.mxu1  ;;  %2906 = vmatmul.mubr.bf16.gmra.mxu1 %v10021_v29  ;;  %5502 = vmatmul.mubr.msk.bf16.gmra.mxu0 %vm1546_vm0, %v10022_v13  ;;  %v4177_v25 = vsel %vm4174_vm4, %v4170_v53, %v4171_v17  ;;  %v4332_v47 = vrot.slane %v2355_v21, 7  ;;  %v2359_v48 = vadd.f32 %v2358_v3, %v8271_v44  ;;  %v8509_v21 = vsel %vm3623_vm7, 1.0, %v9829_v11 }
 0x20e   : > { %2915 = vmatprep.mubr.bf16.mxu1 %v10025_v1  ;;  %3058 = vmatprep.mubr.bf16.mxu0 %v9826_v35  ;;  %v2360_v27 = vpop.f32.mrf.mxu0  ;;  %v8504_v2 = vadd.f32 %v4395_v41, %v4299_v61  ;;  %v4301_v30 = vadd.f32 %v4177_v25, %v10028_v20  ;;  %10029 = vst [vmem:[#allocation90_spill] sm:$0xff] %v8509_v21 }
 0x20f   : > { %v8502_v40 = vpop.f32.mrf.mxu1  ;;  %v4172_v49 = vrot.slane %v2359_v48, 1  ;;  %v2361_v53 = vadd.f32 %v2360_v27, %v8288_v39  ;;  %v4337_v44 = vsel %vm3949_vm1, %v4331_v23, %v4332_v47  ;;  %v4208_v39 = vmul.f32 0.0, %v8509_v21 }
 0x210   : > { %10027 = vst [vmem:[#allocation88_spill] sm:$0xff] %v8504_v2  ;;  %v2362_v3 = vpop.f32.mrf.mxu0  ;;  %v8515_v1 = vadd.f32 %v4337_v44, %v4300_v62  ;;  %v10036_v2 = vld [vmem:[#allocation46_spill] sm:$0xff] }
 0x211   : > { %v8513_v31 = vpop.f32.mrf.mxu1  ;;  %v4176_v61 = vsel %vm4174_vm4, %v4171_v17, %v4172_v49  ;;  %v4333_v41 = vrot.slane %v2361_v53, 7  ;;  %v2363_v25 = vadd.f32 %v2362_v3, %v8301_v15  ;;  %v10031_v17 = vld [vmem:[#allocation45_spill] sm:$0xff]  ;;  %v10032_v53 = vld [vmem:[#allocation19_spill] sm:$0xff] }
 0x212   : > { %10030 = vst [vmem:[#allocation101_spill] sm:$0xff] %v8515_v1  ;;  %v4270_v48 = vmul.f32 %v8500_v36, %v4176_v61  ;;  %v2364_v11 = vpop.f32.mrf.mxu0  ;;  %v10033_v15 = vld [vmem:[#allocation87_spill] sm:$0xff] }
 0x213   : > { %v8522_v27 = vpop.f32.mrf.mxu1  ;;  %v4336_v23 = vsel %vm3949_vm1, %v4332_v47, %v4333_v41  ;;  %v4173_v20 = vrot.slane %v2363_v25, 1  ;;  %v2365_v62 = vadd.f32 %v2364_v11, %v8309_v57  ;;  %v10034_v61 = vld [vmem:[#allocation91_spill] sm:$0xff]  ;;  %v10035_v47 = vrot.slane %v7818_v14, 1 }
 0x214   : > { %v2594_v29 = vpop.f32.mrf.mxu0  ;;  %v4397_v3 = vmul.f32 %v10033_v15, %v4336_v23  ;;  %v4302_v36 = vadd.f32 %v4270_v48, %v10034_v61 }
 0x215   : > { %v8527_v44 = vpop.f32.mrf.mxu1  ;;  %2916 = vmatmul.mubr.bf16.gmra.mxu1 %v10031_v17  ;;  %5503 = vmatmul.mubr.msk.bf16.gmra.mxu0 %vm1546_vm0, %v10032_v53  ;;  %v4175_v1 = vsel %vm4174_vm4, %v4172_v49, %v4173_v20  ;;  %v4206_v57 = vsel %vm4174_vm4, %v4173_v20, %v10035_v47  ;;  %v4334_v25 = vrot.slane %v2365_v62, 7  ;;  %v2595_v11 = vadd.f32 %v2594_v29, %v8318_v59  ;;  %v10038_v49 = vld [vmem:[#allocation93_spill] sm:$0xff]  ;;  %v10040_v29 = vld [vmem:[#allocation50_spill] sm:$0xff] }
 0x216   : > { %2925 = vmatprep.mubr.bf16.mxu1 %v10036_v2  ;;  %3068 = vmatprep.mubr.bf16.mxu0 %v9826_v35  ;;  %v4239_v17 = vmul.f32 0.0, %v4175_v1  ;;  %v4240_v24 = vmul.f32 %v4208_v39, %v4206_v57  ;;  %v2596_v48 = vpop.f32.mrf.mxu0  ;;  %v8545_v61 = vadd.f32 %v4397_v3, %v4301_v30  ;;  %v10039_v15 = vrot.slane %v10038_v49, 7  ;;  %v10041_v1 = vld [vmem:[#allocation89_spill] sm:$0xff]  ;;  %v10042_v30 = vld [vmem:[#allocation94_spill] sm:$0xff] }
 0x217   : > { %v8543_v23 = vpop.f32.mrf.mxu1  ;;  %v8552_v20 = vadd.f32 %v2596_v48, %v8331_v9  ;;  %v4335_v59 = vsel %vm3949_vm1, %v4333_v41, %v4334_v25 }
 0x218   : > { %10037 = vst [vmem:[#allocation19_spill] sm:$0xff] %v8545_v61  ;;  %v4366_v14 = vsel %vm3949_vm1, %v4334_v25, %v10039_v15  ;;  %v4271_v62 = vadd.f32 %v4239_v17, %v10040_v29  ;;  %v2598_v57 = vpop.f32.mrf.mxu0  ;;  %v4272_v3 = vadd.f32 %v4240_v24, %v10042_v30  ;;  %v8561_v2 = vadd.f32 %v4335_v59, %v4302_v36  ;;  %v10043_v61 = vld [vmem:[#allocation95_spill] sm:$0xff]  ;;  %v10045_v24 = vld [vmem:[#allocation22_spill] sm:$0xff]  ;;  %v10046_v59 = vld [vmem:[#allocation48_spill] sm:$0xff] }
 0x219   : > { %v4367_v39 = vmul.f32 %v10041_v1, %v4366_v14  ;;  %v8558_v47 = vpop.f32.mrf.mxu1  ;;  %v2599_v49 = vadd.f32 %v2598_v57, %v8344_v32  ;;  %v10044_v1 = vld [vmem:[#allocation47_spill] sm:$0xff]  ;;  %v9774_v32 = vrot.slane %v8552_v20, 1 }
 0x21a   : > { %v4400_v9 = vadd.f32 %v10043_v61, %v4272_v3  ;;  %v2600_v7 = vpop.f32.mrf.mxu0 }
 0x21b   : > { %v4399_v15 = vadd.f32 %v4367_v39, %v4271_v62  ;;  %v8565_v48 = vpop.f32.mrf.mxu1  ;;  %v2601_v41 = vadd.f32 %v2600_v7, %v8352_v51 }
 0x21c   : > { %v4432_v25 = vadd.f32 %v4400_v9, %v2599_v49 }
 0x21d   : > { %v4431_v17 = vadd.f32 %v4399_v15, %v2595_v11  ;;  %v8568_v14 = vpop.f32.mrf.mxu1  ;;  %v2604_v29 = vpop.f32.mrf.mxu0  ;;  %2926 = vmatmul.mubr.bf16.gmra.mxu1 %v10044_v1  ;;  %5504 = vmatmul.mubr.msk.bf16.gmra.mxu0 %vm1546_vm0, %v10045_v24  ;;  %v4464_v36 = vrot.slane %v2601_v41, 1 }
 0x21e   : > { %v2605_v61 = vadd.f32 %v2604_v29, %v8361_v0  ;;  %2935 = vmatprep.mubr.bf16.mxu1 %v10046_v59  ;;  %3078 = vmatprep.mubr.bf16.mxu0 %v9826_v35  ;;  %v10048_v29 = vld [vmem:[#allocation96_spill] sm:$0xff] }
 0x21f   : > { %v8577_v51 = vpop.f32.mrf.mxu1  ;;  %v2606_v7 = vpop.f32.mrf.mxu0  ;;  %v4525_v11 = vsel %vm4174_vm4, %v9774_v32, %v4464_v36 }
 0x220   : > { %v4433_v62 = vadd.f32 %v7893_v42, %v2605_v61  ;;  %v2607_v39 = vadd.f32 %v2606_v7, %v8374_v45  ;;  %v8587_v0 = vadd.f32 %v4525_v11, %v4431_v17  ;;  %v10049_v17 = vld [vmem:[#allocation49_spill] sm:$0xff] }
 0x221   : > { %v8585_v57 = vpop.f32.mrf.mxu1  ;;  %v2608_v30 = vpop.f32.mrf.mxu0  ;;  %v10050_v11 = vld [vmem:[#allocation25_spill] sm:$0xff] }
 0x222   : > { %10047 = vst [vmem:[#allocation91_spill] sm:$0xff] %v8587_v0  ;;  %v4465_v3 = vrot.slane %v2607_v39, 1  ;;  %v2609_v49 = vadd.f32 %v2608_v30, %v8387_v50 }
 0x223   : > { %v8590_v15 = vpop.f32.mrf.mxu1  ;;  %v2610_v9 = vpop.f32.mrf.mxu0 }
 0x224   : > { %v4524_v41 = vsel %vm4174_vm4, %v4464_v36, %v4465_v3  ;;  %v4434_v32 = vadd.f32 %v10048_v29, %v2609_v49  ;;  %v2611_v42 = vadd.f32 %v2610_v9, %v8395_v33  ;;  %v10051_v36 = vld [vmem:[#allocation8_spill] sm:$0xff] }
 0x225   : > { %v4528_v45 = vmul.f32 %v8509_v21, %v4524_v41  ;;  %v8597_v61 = vpop.f32.mrf.mxu1  ;;  %v2614_v7 = vpop.f32.mrf.mxu0  ;;  %2936 = vmatmul.mubr.bf16.gmra.mxu1 %v10049_v17  ;;  %5505 = vmatmul.mubr.msk.bf16.gmra.mxu0 %vm1546_vm0, %v10050_v11 }
 0x226   : > { %v4466_v50 = vrot.slane %v2611_v42, 1  ;;  %v2615_v39 = vadd.f32 %v2614_v7, %v8405_v37  ;;  %3088 = vmatprep.mubr.bf16.mxu0 %v9826_v35  ;;  %3171 = vmatprep.mubr.bf16.mxu1 %v10051_v36 }
 0x227   : > { %v8605_v30 = vpop.f32.mrf.mxu1  ;;  %v2616_v33 = vpop.f32.mrf.mxu0  ;;  %v8607_v49 = vadd.f32 %v4528_v45, %v4432_v25  ;;  %v10053_v45 = vld [vmem:[#allocation51_spill] sm:$0xff] }
 0x228   : > { %v4523_v9 = vsel %vm4174_vm4, %v4465_v3, %v4466_v50  ;;  %v4435_v41 = vadd.f32 %v7946_v19, %v2615_v39  ;;  %v2617_v29 = vadd.f32 %v2616_v33, %v8417_v22 }
 0x229   : > { %v8613_v21 = vpop.f32.mrf.mxu1  ;;  %v2618_v42 = vpop.f32.mrf.mxu0  ;;  %v8615_v37 = vadd.f32 %v4523_v9, %v4433_v62  ;;  %v10054_v62 = vld [vmem:[#allocation28_spill] sm:$0xff]  ;;  %v10055_v9 = vld [vmem:[#allocation11_spill] sm:$0xff] }
 0x22a   : > { %v4467_v7 = vrot.slane %v2617_v29, 1  ;;  %v2619_v36 = vadd.f32 %v2618_v42, %v8430_v4 }
 0x22b   : > { %10052 = vst [vmem:[#allocation93_spill] sm:$0xff] %v8615_v37  ;;  %v8618_v17 = vpop.f32.mrf.mxu1  ;;  %v2620_v0 = vpop.f32.mrf.mxu0 }
 0x22c   : > { %v4522_v25 = vsel %vm4174_vm4, %v4466_v50, %v4467_v7  ;;  %v4436_v3 = vadd.f32 %v7959_v34, %v2619_v36  ;;  %v2621_v19 = vadd.f32 %v2620_v0, %v8438_v58  ;;  %v10056_v50 = vld [vmem:[#allocation13_spill] sm:$0xff] }
 0x22d   : > { %v4530_v22 = vmul.f32 %v10053_v45, %v4522_v25  ;;  %v8625_v39 = vpop.f32.mrf.mxu1  ;;  %v2624_v33 = vpop.f32.mrf.mxu0  ;;  %5506 = vmatmul.mubr.msk.bf16.gmra.mxu0 %vm1546_vm0, %v10054_v62  ;;  %3172 = vmatmul.mubr.bf16.vlgmr.msra.gmra.mxu1 %v10055_v9 }
 0x22e   : > { %v4468_v4 = vrot.slane %v2621_v19, 1  ;;  %v2625_v29 = vadd.f32 %v2624_v33, %v8448_v54  ;;  %3098 = vmatprep.mubr.bf16.mxu0 %v9826_v35  ;;  %3179 = vmatprep.mubr.bf16.mxu1 %v10056_v50 }
 0x22f   : > { %v8633_v34 = vpop.f32.mrf.mxu1  ;;  %v2626_v58 = vpop.f32.mrf.mxu0  ;;  %v8635_v0 = vadd.f32 %v4530_v22, %v4434_v32  ;;  %v10057_v22 = vld [vmem:[#allocation53_spill] sm:$0xff] }
 0x230   : > { %v4521_v42 = vsel %vm4174_vm4, %v4467_v7, %v4468_v4  ;;  %v4437_v36 = vadd.f32 %v7998_v6, %v2625_v29  ;;  %v2627_v25 = vadd.f32 %v2626_v58, %v8466_v52 }
 0x231   : > { %v8641_v9 = vpop.f32.mrf.mxu1  ;;  %v2628_v19 = vpop.f32.mrf.mxu0  ;;  %v8643_v54 = vadd.f32 %v4521_v42, %v4435_v41 }
 0x232   : > { %v4469_v33 = vrot.slane %v2627_v25, 1  ;;  %v2629_v50 = vadd.f32 %v2628_v19, %v8474_v38 }
 0x233   : > { %v8646_v45 = vpop.f32.mrf.mxu1  ;;  %v2630_v37 = vpop.f32.mrf.mxu0 }
 0x234   : > { %v4520_v32 = vsel %vm4174_vm4, %v4468_v4, %v4469_v33  ;;  %v4438_v7 = vadd.f32 %v8014_v26, %v2629_v50  ;;  %v2631_v6 = vadd.f32 %v2630_v37, %v8482_v18 }
 0x235   : > { %v4532_v52 = vmul.f32 %v10057_v22, %v4520_v32  ;;  %v8653_v29 = vpop.f32.mrf.mxu1  ;;  %v2634_v58 = vpop.f32.mrf.mxu0  ;;  %5507 = vmatmul.mubr.msk.bf16.gmra.mxu0 %vm1546_vm0, %v6814_v10  ;;  %3180 = vmatmul.mubr.bf16.gmra.mxu1 %v6659_v46 }
 0x236   : > { %v4470_v38 = vrot.slane %v2631_v6, 1  ;;  %v2635_v41 = vadd.f32 %v2634_v58, %v8487_v28  ;;  %3108 = vmatprep.mubr.bf16.mxu0 %v9826_v35  ;;  %3187 = vmatprep.mubr.bf16.mxu1 %v9926_v56 }
 0x237   : > { %v8661_v26 = vpop.f32.mrf.mxu1  ;;  %v2636_v18 = vpop.f32.mrf.mxu0  ;;  %v8663_v37 = vadd.f32 %v4532_v52, %v4436_v3  ;;  %v10058_v52 = vld [vmem:[#allocation55_spill] sm:$0xff] }
 0x238   : > { %v4519_v4 = vsel %vm4174_vm4, %v4469_v33, %v4470_v38  ;;  %v4439_v42 = vadd.f32 %v8053_v5, %v2635_v41  ;;  %v2637_v25 = vadd.f32 %v2636_v18, %v8502_v40 }
 0x239   : > { %v8669_v46 = vpop.f32.mrf.mxu1  ;;  %v2638_v19 = vpop.f32.mrf.mxu0  ;;  %v8671_v28 = vadd.f32 %v4519_v4, %v4437_v36  ;;  %v10059_v36 = vld [vmem:[#allocation33_spill] sm:$0xff] }
 0x23a   : > { %v4471_v50 = vrot.slane %v2637_v25, 1  ;;  %v2639_v56 = vadd.f32 %v2638_v19, %v8513_v31 }
 0x23b   : > { %v8674_v32 = vpop.f32.mrf.mxu1  ;;  %v2640_v6 = vpop.f32.mrf.mxu0 }
 0x23c   : > { %v4518_v3 = vsel %vm4174_vm4, %v4470_v38, %v4471_v50  ;;  %v4440_v33 = vadd.f32 %v8069_v8, %v2639_v56  ;;  %v2641_v5 = vadd.f32 %v2640_v6, %v8522_v27  ;;  %v10060_v38 = vld [vmem:[#allocation17_spill] sm:$0xff] }
 0x23d   : > { %v4534_v40 = vmul.f32 %v10058_v52, %v4518_v3  ;;  %v8681_v58 = vpop.f32.mrf.mxu1  ;;  %v2644_v41 = vpop.f32.mrf.mxu0  ;;  %5508 = vmatmul.mubr.msk.bf16.gmra.mxu0 %vm1546_vm0, %v10059_v36  ;;  %3188 = vmatmul.mubr.bf16.gmra.mxu1 %v6694_v63 }
 0x23e   : > { %v4472_v31 = vrot.slane %v2641_v5, 1  ;;  %v2645_v18 = vadd.f32 %v2644_v41, %v8527_v44  ;;  %3118 = vmatprep.mubr.bf16.mxu0 %v9826_v35  ;;  %3195 = vmatprep.mubr.bf16.mxu1 %v10060_v38 }
 0x23f   : > { %v8689_v8 = vpop.f32.mrf.mxu1  ;;  %v2646_v27 = vpop.f32.mrf.mxu0  ;;  %v8691_v4 = vadd.f32 %v4534_v40, %v4438_v7  ;;  %v10061_v40 = vld [vmem:[#allocation56_spill] sm:$0xff] }
 0x240   : > { %v4517_v25 = vsel %vm4174_vm4, %v4471_v50, %v4472_v31  ;;  %v4441_v19 = vadd.f32 %v8108_v43, %v2645_v18  ;;  %v2647_v56 = vadd.f32 %v2646_v27, %v8543_v23 }
 0x241   : > { %v8697_v63 = vpop.f32.mrf.mxu1  ;;  %v2648_v6 = vpop.f32.mrf.mxu0  ;;  %v8699_v44 = vadd.f32 %v4517_v25, %v4439_v42  ;;  %v10062_v42 = vld [vmem:[#allocation36_spill] sm:$0xff]  ;;  %v10063_v25 = vld [vmem:[#allocation18_spill] sm:$0xff] }
 0x242   : > { %v4473_v3 = vrot.slane %v2647_v56, 1  ;;  %v2649_v5 = vadd.f32 %v2648_v6, %v8558_v47 }
 0x243   : > { %v8702_v41 = vpop.f32.mrf.mxu1  ;;  %v2650_v38 = vpop.f32.mrf.mxu0 }
 0x244   : > { %v4516_v7 = vsel %vm4174_vm4, %v4472_v31, %v4473_v3  ;;  %v4442_v50 = vadd.f32 %v8121_v60, %v2649_v5  ;;  %v2651_v43 = vadd.f32 %v2650_v38, %v8565_v48  ;;  %v10064_v31 = vld [vmem:[#allocation20_spill] sm:$0xff] }
 0x245   : > { %v4536_v23 = vmul.f32 %v10061_v40, %v4516_v7  ;;  %v8709_v18 = vpop.f32.mrf.mxu1  ;;  %v2654_v27 = vpop.f32.mrf.mxu0  ;;  %5509 = vmatmul.mubr.msk.bf16.gmra.mxu0 %vm1546_vm0, %v10062_v42  ;;  %3196 = vmatmul.mubr.bf16.gmra.mxu1 %v10063_v25 }
 0x246   : > { %v4474_v47 = vrot.slane %v2651_v43, 1  ;;  %v2655_v56 = vadd.f32 %v2654_v27, %v8568_v14  ;;  %3128 = vmatprep.mubr.bf16.mxu0 %v9826_v35  ;;  %3203 = vmatprep.mubr.bf16.mxu1 %v10064_v31 }
 0x247   : > { %v8717_v60 = vpop.f32.mrf.mxu1  ;;  %v2656_v48 = vpop.f32.mrf.mxu0  ;;  %v8719_v6 = vadd.f32 %v4536_v23, %v4440_v33  ;;  %v10065_v23 = vld [vmem:[#allocation15_spill] sm:$0xff] }
 0x248   : > { %v4515_v5 = vsel %vm4174_vm4, %v4473_v3, %v4474_v47  ;;  %v4443_v38 = vadd.f32 %v8147_v16, %v2655_v56  ;;  %v2657_v7 = vadd.f32 %v2656_v48, %v8577_v51 }
 0x249   : > { %v8725_v25 = vpop.f32.mrf.mxu1  ;;  %v2658_v43 = vpop.f32.mrf.mxu0  ;;  %v8727_v14 = vadd.f32 %v4515_v5, %v4441_v19  ;;  %v10066_v19 = vld [vmem:[#allocation39_spill] sm:$0xff]  ;;  %v10067_v5 = vld [vmem:[#allocation21_spill] sm:$0xff] }
 0x24a   : > { %v4475_v35 = vrot.slane %v2657_v7, 1  ;;  %v2659_v27 = vadd.f32 %v2658_v43, %v8585_v57  ;;  %v10068_v43 = vld [vmem:[#allocation23_spill] sm:$0xff] }
 0x24b   : > { %v8730_v31 = vpop.f32.mrf.mxu1  ;;  %v2660_v40 = vpop.f32.mrf.mxu0 }
 0x24c   : > { %v4514_v33 = vsel %vm4174_vm4, %v4474_v47, %v4475_v35  ;;  %v4444_v3 = vadd.f32 %v8158_v12, %v2659_v27  ;;  %v2661_v16 = vadd.f32 %v2660_v40, %v8590_v15  ;;  %v10069_v47 = vld [vmem:[#allocation5_spill] sm:$0xff] }
 0x24d   : > { %v4538_v51 = vmul.f32 %v10065_v23, %v4514_v33  ;;  %v8737_v56 = vpop.f32.mrf.mxu1  ;;  %v2664_v48 = vpop.f32.mrf.mxu0  ;;  %5510 = vmatmul.mubr.msk.bf16.gmra.mxu0 %vm1546_vm0, %v10066_v19  ;;  %3204 = vmatmul.mubr.bf16.gmra.mxu1 %v10067_v5  ;;  %v10071_v33 = vld [vmem:[#allocation62_spill] sm:$0xff] }
 0x24e   : > { %v4476_v57 = vrot.slane %v2661_v16, 1  ;;  %v2665_v7 = vadd.f32 %v2664_v48, %v8597_v61  ;;  %3211 = vmatprep.mubr.bf16.mxu1 %v10068_v43  ;;  %5871 = vmatprep.mubr.msk.bf16.mxu0 %vm1546_vm0, %v10069_v47 }
 0x24f   : > { %v8746_v12 = vpop.f32.mrf.mxu1  ;;  %v2666_v15 = vpop.f32.mrf.mxu0  ;;  %v8748_v40 = vadd.f32 %v4538_v51, %v4442_v50  ;;  %v10073_v51 = vld [vmem:[#allocation66_spill] sm:$0xff] }
 0x250   : > { %v4513_v27 = vsel %vm4174_vm4, %v4475_v35, %v4476_v57  ;;  %v4445_v23 = vadd.f32 %v10071_v33, %v2665_v7  ;;  %v2667_v5 = vadd.f32 %v2666_v15, %v8605_v30  ;;  %v10074_v33 = vld [vmem:[#allocation58_spill] sm:$0xff] }
 0x251   : > { %10070 = vst [vmem:[#allocation50_spill] sm:$0xff] %v8748_v40  ;;  %v8754_v16 = vpop.f32.mrf.mxu1  ;;  %v2668_v61 = vpop.f32.mrf.mxu0  ;;  %v8756_v48 = vadd.f32 %v4513_v27, %v4443_v38  ;;  %v10075_v38 = vld [vmem:[#allocation24_spill] sm:$0xff]  ;;  %v10076_v27 = vld [vmem:[#allocation6_spill] sm:$0xff] }
 0x252   : > { %v4477_v43 = vrot.slane %v2667_v5, 1  ;;  %v2669_v47 = vadd.f32 %v2668_v61, %v8613_v21  ;;  %v10077_v61 = vld [vmem:[#allocation26_spill] sm:$0xff] }
 0x253   : > { %10072 = vst [vmem:[#allocation94_spill] sm:$0xff] %v8756_v48  ;;  %v8759_v52 = vpop.f32.mrf.mxu1  ;;  %v2670_v22 = vpop.f32.mrf.mxu0 }
 0x254   : > { %v4512_v50 = vsel %vm4174_vm4, %v4476_v57, %v4477_v43  ;;  %v4446_v35 = vadd.f32 %v10073_v51, %v2669_v47  ;;  %v2671_v7 = vadd.f32 %v2670_v22, %v8618_v17  ;;  %v10078_v57 = vld [vmem:[#allocation7_spill] sm:$0xff] }
 0x255   : > { %v4540_v30 = vmul.f32 %v10074_v33, %v4512_v50  ;;  %v8766_v15 = vpop.f32.mrf.mxu1  ;;  %v2674_v40 = vpop.f32.mrf.mxu0  ;;  %3212 = vmatmul.mubr.bf16.gmra.mxu1 %v10075_v38  ;;  %5872 = vmatmul.mubr.msk.bf16.vlgmr.msra.gmra.mxu0 %vm1546_vm0, %v10076_v27  ;;  %v10080_v51 = vld [vmem:[#allocation79_spill] sm:$0xff] }
 0x256   : > { %v4478_v21 = vrot.slane %v2671_v7, 1  ;;  %v2675_v5 = vadd.f32 %v2674_v40, %v8625_v39  ;;  %3219 = vmatprep.mubr.bf16.mxu1 %v10077_v61  ;;  %5875 = vmatprep.mubr.msk.bf16.mxu0 %vm1546_vm0, %v10078_v57 }
 0x257   : > { %v8775_v47 = vpop.f32.mrf.mxu1  ;;  %v2676_v17 = vpop.f32.mrf.mxu0  ;;  %v8777_v22 = vadd.f32 %v4540_v30, %v4444_v3  ;;  %v10082_v30 = vld [vmem:[#allocation69_spill] sm:$0xff] }
 0x258   : > { %v4511_v50 = vsel %vm4174_vm4, %v4477_v43, %v4478_v21  ;;  %v4447_v38 = vadd.f32 %v10080_v51, %v2675_v5  ;;  %v2677_v27 = vadd.f32 %v2676_v17, %v8633_v34  ;;  %v10083_v51 = vld [vmem:[#allocation60_spill] sm:$0xff] }
 0x259   : > { %10079 = vst [vmem:[#allocation95_spill] sm:$0xff] %v8777_v22  ;;  %v8783_v7 = vpop.f32.mrf.mxu1  ;;  %v2678_v39 = vpop.f32.mrf.mxu0  ;;  %v8785_v40 = vadd.f32 %v4511_v50, %v4445_v23  ;;  %v10084_v23 = vld [vmem:[#allocation27_spill] sm:$0xff]  ;;  %v10085_v50 = vld [vmem:[#allocation9_spill] sm:$0xff] }
 0x25a   : > { %v4479_v61 = vrot.slane %v2677_v27, 1  ;;  %v2679_v57 = vadd.f32 %v2678_v39, %v8641_v9  ;;  %v10086_v39 = vld [vmem:[#allocation29_spill] sm:$0xff] }
 0x25b   : > { %10081 = vst [vmem:[#allocation47_spill] sm:$0xff] %v8785_v40  ;;  %v8788_v33 = vpop.f32.mrf.mxu1  ;;  %v2680_v48 = vpop.f32.mrf.mxu0 }
 0x25c   : > { %v4510_v3 = vsel %vm4174_vm4, %v4478_v21, %v4479_v61  ;;  %v4448_v43 = vadd.f32 %v10082_v30, %v2679_v57  ;;  %v2681_v5 = vadd.f32 %v2680_v48, %v8646_v45  ;;  %v10087_v21 = vld [vmem:[#allocation10_spill] sm:$0xff] }
 0x25d   : > { %v4542_v34 = vmul.f32 %v10083_v51, %v4510_v3  ;;  %v8795_v17 = vpop.f32.mrf.mxu1  ;;  %v2684_v22 = vpop.f32.mrf.mxu0  ;;  %3220 = vmatmul.mubr.bf16.gmra.mxu1 %v10084_v23  ;;  %5876 = vmatmul.mubr.msk.bf16.gmra.mxu0 %vm1546_vm0, %v10085_v50  ;;  %v10089_v30 = vld [vmem:[#allocation70_spill] sm:$0xff] }
 0x25e   : > { %v4480_v9 = vrot.slane %v2681_v5, 1  ;;  %v2685_v27 = vadd.f32 %v2684_v22, %v8653_v29  ;;  %3227 = vmatprep.mubr.bf16.mxu1 %v10086_v39  ;;  %5879 = vmatprep.mubr.msk.bf16.mxu0 %vm1546_vm0, %v10087_v21 }
 0x25f   : > { %v8804_v57 = vpop.f32.mrf.mxu1  ;;  %v2686_v45 = vpop.f32.mrf.mxu0  ;;  %v8806_v48 = vadd.f32 %v4542_v34, %v4446_v35  ;;  %v10091_v34 = vld [vmem:[#allocation73_spill] sm:$0xff] }
 0x260   : > { %v4509_v3 = vsel %vm4174_vm4, %v4479_v61, %v4480_v9  ;;  %v4449_v23 = vadd.f32 %v10089_v30, %v2685_v27  ;;  %v2687_v50 = vadd.f32 %v2686_v45, %v8661_v26  ;;  %v10092_v30 = vld [vmem:[#allocation64_spill] sm:$0xff] }
 0x261   : > { %10088 = vst [vmem:[#allocation22_spill] sm:$0xff] %v8806_v48  ;;  %v8812_v5 = vpop.f32.mrf.mxu1  ;;  %v2688_v29 = vpop.f32.mrf.mxu0  ;;  %v8814_v22 = vadd.f32 %v4509_v3, %v4447_v38  ;;  %v10093_v38 = vld [vmem:[#allocation30_spill] sm:$0xff]  ;;  %v10094_v3 = vld [vmem:[#allocation12_spill] sm:$0xff] }
 0x262   : > { %v4481_v39 = vrot.slane %v2687_v50, 1  ;;  %v2689_v21 = vadd.f32 %v2688_v29, %v8669_v46  ;;  %v10095_v29 = vld [vmem:[#allocation31_spill] sm:$0xff] }
 0x263   : > { %10090 = vst [vmem:[#allocation48_spill] sm:$0xff] %v8814_v22  ;;  %v8817_v51 = vpop.f32.mrf.mxu1  ;;  %v2690_v40 = vpop.f32.mrf.mxu0 }
 0x264   : > { %v4508_v35 = vsel %vm4174_vm4, %v4480_v9, %v4481_v39  ;;  %v4450_v61 = vadd.f32 %v10091_v34, %v2689_v21  ;;  %v2691_v27 = vadd.f32 %v2690_v40, %v8674_v32  ;;  %v10096_v9 = vld [vmem:[#allocation14_spill] sm:$0xff]  ;;  %v10098_v34 = vld [vmem:[#allocation75_spill] sm:$0xff] }
 0x265   : > { %v4544_v26 = vmul.f32 %v10092_v30, %v4508_v35  ;;  %v8824_v45 = vpop.f32.mrf.mxu1  ;;  %v2694_v48 = vpop.f32.mrf.mxu0  ;;  %3228 = vmatmul.mubr.bf16.gmra.mxu1 %v10093_v38  ;;  %5880 = vmatmul.mubr.msk.bf16.gmra.mxu0 %vm1546_vm0, %v10094_v3 }
 0x266   : > { %v4482_v46 = vrot.slane %v2691_v27, 1  ;;  %v2695_v50 = vadd.f32 %v2694_v48, %v8681_v58  ;;  %3235 = vmatprep.mubr.bf16.mxu1 %v10095_v29  ;;  %5883 = vmatprep.mubr.msk.bf16.mxu0 %vm1546_vm0, %v10096_v9 }
 0x267   : > { %v8833_v21 = vpop.f32.mrf.mxu1  ;;  %v2696_v32 = vpop.f32.mrf.mxu0  ;;  %v8835_v40 = vadd.f32 %v4544_v26, %v4448_v43  ;;  %v10099_v26 = vld [vmem:[#allocation97_spill] sm:$0xff] }
 0x268   : > { %v4507_v35 = vsel %vm4174_vm4, %v4481_v39, %v4482_v46  ;;  %v4451_v38 = vadd.f32 %v10098_v34, %v2695_v50  ;;  %v2697_v3 = vadd.f32 %v2696_v32, %v8689_v8  ;;  %v10100_v34 = vld [vmem:[#allocation67_spill] sm:$0xff] }
 0x269   : > { %10097 = vst [vmem:[#allocation96_spill] sm:$0xff] %v8835_v40  ;;  %v8841_v27 = vpop.f32.mrf.mxu1  ;;  %v2698_v58 = vpop.f32.mrf.mxu0  ;;  %v8843_v48 = vadd.f32 %v4507_v35, %v4449_v23  ;;  %v10101_v23 = vld [vmem:[#allocation32_spill] sm:$0xff] }
 0x26a   : > { %v4483_v29 = vrot.slane %v2697_v3, 1  ;;  %v2699_v9 = vadd.f32 %v2698_v58, %v8697_v63  ;;  %v10102_v3 = vld [vmem:[#allocation34_spill] sm:$0xff] }
 0x26b   : > { %v8846_v30 = vpop.f32.mrf.mxu1  ;;  %v2700_v22 = vpop.f32.mrf.mxu0 }
 0x26c   : > { %v4506_v43 = vsel %vm4174_vm4, %v4482_v46, %v4483_v29  ;;  %v4452_v39 = vadd.f32 %v10099_v26, %v2699_v9  ;;  %v2701_v50 = vadd.f32 %v2700_v22, %v8702_v41  ;;  %v10103_v9 = vld [vmem:[#allocation78_spill] sm:$0xff] }
 0x26d   : > { %v4546_v8 = vmul.f32 %v10100_v34, %v4506_v43  ;;  %v2704_v32 = vpop.f32.mrf.mxu0  ;;  %v8853_v40 = vpop.f32.mrf.mxu1  ;;  %3236 = vmatmul.mubr.bf16.gmra.mxu1 %v10101_v23  ;;  %5884 = vmatmul.mubr.msk.bf16.gmra.mxu0 %vm1546_vm0, %v10022_v13 }
 0x26e   : > { %v4484_v63 = vrot.slane %v2701_v50, 1  ;;  %v2705_v35 = vadd.f32 %v2704_v32, %v8709_v18  ;;  %3243 = vmatprep.mubr.bf16.mxu1 %v10102_v3  ;;  %5887 = vmatprep.mubr.msk.bf16.mxu0 %vm1546_vm0, %v10032_v53 }
 0x26f   : > { %v2706_v46 = vpop.f32.mrf.mxu0  ;;  %v8862_v41 = vpop.f32.mrf.mxu1  ;;  %v8864_v22 = vadd.f32 %v4546_v8, %v4450_v61  ;;  %v10104_v8 = vld [vmem:[#allocation98_spill] sm:$0xff] }
 0x270   : > { %v4505_v58 = vsel %vm4174_vm4, %v4483_v29, %v4484_v63  ;;  %v4453_v43 = vadd.f32 %v10103_v9, %v2705_v35  ;;  %v2707_v13 = vadd.f32 %v2706_v46, %v8717_v60  ;;  %v10105_v9 = vld [vmem:[#allocation72_spill] sm:$0xff] }
 0x271   : > { %v2708_v26 = vpop.f32.mrf.mxu0  ;;  %v8870_v50 = vpop.f32.mrf.mxu1  ;;  %v8872_v18 = vadd.f32 %v4505_v58, %v4451_v38  ;;  %v10106_v38 = vld [vmem:[#allocation35_spill] sm:$0xff] }
 0x272   : > { %v4485_v32 = vrot.slane %v2707_v13, 1  ;;  %v2709_v53 = vadd.f32 %v2708_v26, %v8725_v25  ;;  %v10107_v13 = vld [vmem:[#allocation37_spill] sm:$0xff] }
 0x273   : > { %v2710_v23 = vpop.f32.mrf.mxu0  ;;  %v8875_v3 = vpop.f32.mrf.mxu1 }
 0x274   : > { %v4504_v61 = vsel %vm4174_vm4, %v4484_v63, %v4485_v32  ;;  %v4454_v29 = vadd.f32 %v10104_v8, %v2709_v53  ;;  %v2711_v35 = vadd.f32 %v2710_v23, %v8730_v31  ;;  %v10108_v23 = vld [vmem:[#allocation82_spill] sm:$0xff] }
 0x275   : > { %v4548_v60 = vmul.f32 %v10105_v9, %v4504_v61  ;;  %v2714_v46 = vpop.f32.mrf.mxu0  ;;  %v8882_v34 = vpop.f32.mrf.mxu1  ;;  %3244 = vmatmul.mubr.bf16.gmra.mxu1 %v10106_v38  ;;  %5888 = vmatmul.mubr.msk.bf16.gmra.mxu0 %vm1546_vm0, %v10045_v24 }
 0x276   : > { %v4486_v25 = vrot.slane %v2711_v35, 1  ;;  %v2715_v58 = vadd.f32 %v2714_v46, %v8737_v56  ;;  %3251 = vmatprep.mubr.bf16.mxu1 %v10107_v13  ;;  %5891 = vmatprep.mubr.msk.bf16.mxu0 %vm1546_vm0, %v10050_v11 }
 0x277   : > { %v2716_v63 = vpop.f32.mrf.mxu0  ;;  %v8891_v31 = vpop.f32.mrf.mxu1  ;;  %v8893_v26 = vadd.f32 %v4548_v60, %v4452_v39  ;;  %v10109_v60 = vld [vmem:[#allocation99_spill] sm:$0xff] }
 0x278   : > { %v4503_v53 = vsel %vm4174_vm4, %v4485_v32, %v4486_v25  ;;  %v4455_v61 = vadd.f32 %v10108_v23, %v2715_v58  ;;  %v2717_v24 = vadd.f32 %v2716_v63, %v8746_v12  ;;  %v10110_v23 = vld [vmem:[#allocation76_spill] sm:$0xff] }
 0x279   : > { %v2718_v8 = vpop.f32.mrf.mxu0  ;;  %v8899_v35 = vpop.f32.mrf.mxu1  ;;  %v8901_v56 = vadd.f32 %v4503_v53, %v4453_v43  ;;  %v10111_v43 = vld [vmem:[#allocation38_spill] sm:$0xff] }
 0x27a   : > { %v4487_v46 = vrot.slane %v2717_v24, 1  ;;  %v2719_v11 = vadd.f32 %v2718_v8, %v8754_v16  ;;  %v10112_v24 = vld [vmem:[#allocation40_spill] sm:$0xff] }
 0x27b   : > { %v2720_v38 = vpop.f32.mrf.mxu0  ;;  %v8904_v13 = vpop.f32.mrf.mxu1 }
 0x27c   : > { %v4502_v39 = vsel %vm4174_vm4, %v4486_v25, %v4487_v46  ;;  %v4456_v32 = vadd.f32 %v10109_v60, %v2719_v11  ;;  %v2721_v58 = vadd.f32 %v2720_v38, %v8759_v52  ;;  %v10113_v38 = vld [vmem:[#allocation100_spill] sm:$0xff] }
 0x27d   : > { %v4550_v12 = vmul.f32 %v10110_v23, %v4502_v39  ;;  %v2724_v63 = vpop.f32.mrf.mxu0  ;;  %v8911_v9 = vpop.f32.mrf.mxu1  ;;  %3252 = vmatmul.mubr.bf16.gmra.mxu1 %v10111_v43  ;;  %5892 = vmatmul.mubr.msk.bf16.gmra.mxu0 %vm1546_vm0, %v10054_v62 }
 0x27e   : > { %v4488_v16 = vrot.slane %v2721_v58, 1  ;;  %v2725_v53 = vadd.f32 %v2724_v63, %v8766_v15  ;;  %3259 = vmatprep.mubr.bf16.mxu1 %v10112_v24  ;;  %5895 = vmatprep.mubr.msk.bf16.mxu0 %vm1546_vm0, %v6814_v10 }
 0x27f   : > { %v2726_v25 = vpop.f32.mrf.mxu0  ;;  %v8920_v52 = vpop.f32.mrf.mxu1  ;;  %v8922_v8 = vadd.f32 %v4550_v12, %v4454_v29  ;;  %v10114_v12 = vld [vmem:[#allocation86_spill] sm:$0xff] }
 0x280   : > { %v4501_v11 = vsel %vm4174_vm4, %v4487_v46, %v4488_v16  ;;  %v4457_v39 = vadd.f32 %v10113_v38, %v2725_v53  ;;  %v2727_v62 = vadd.f32 %v2726_v25, %v8775_v47  ;;  %v10115_v38 = vld [vmem:[#allocation80_spill] sm:$0xff] }
 0x281   : > { %v2728_v60 = vpop.f32.mrf.mxu0  ;;  %v8928_v58 = vpop.f32.mrf.mxu1  ;;  %v8930_v15 = vadd.f32 %v4501_v11, %v4455_v61  ;;  %v10116_v61 = vld [vmem:[#allocation41_spill] sm:$0xff] }
 0x282   : > { %v4489_v63 = vrot.slane %v2727_v62, 1  ;;  %v2729_v10 = vadd.f32 %v2728_v60, %v8783_v7  ;;  %v10117_v62 = vld [vmem:[#allocation42_spill] sm:$0xff] }
 0x283   : > { %v2730_v43 = vpop.f32.mrf.mxu0  ;;  %v8933_v24 = vpop.f32.mrf.mxu1 }
 0x284   : > { %v4500_v29 = vsel %vm4174_vm4, %v4488_v16, %v4489_v63  ;;  %v4458_v46 = vadd.f32 %v10114_v12, %v2729_v10  ;;  %v2731_v53 = vadd.f32 %v2730_v43, %v8788_v33  ;;  %v10118_v43 = vld [vmem:[#allocation88_spill] sm:$0xff] }
 0x285   : > { %v4552_v47 = vmul.f32 %v10115_v38, %v4500_v29  ;;  %v2734_v25 = vpop.f32.mrf.mxu0  ;;  %v8940_v23 = vpop.f32.mrf.mxu1  ;;  %3260 = vmatmul.mubr.bf16.gmra.mxu1 %v10116_v61  ;;  %5896 = vmatmul.mubr.msk.bf16.gmra.mxu0 %vm1546_vm0, %v10059_v36 }
 0x286   : > { %v4490_v7 = vrot.slane %v2731_v53, 1  ;;  %v2735_v11 = vadd.f32 %v2734_v25, %v8795_v17  ;;  %3267 = vmatprep.mubr.bf16.mxu1 %v10117_v62  ;;  %5899 = vmatprep.mubr.msk.bf16.mxu0 %vm1546_vm0, %v10062_v42 }
 0x287   : > { %v2736_v16 = vpop.f32.mrf.mxu0  ;;  %v8949_v33 = vpop.f32.mrf.mxu1  ;;  %v8951_v60 = vadd.f32 %v4552_v47, %v4456_v32  ;;  %v10119_v47 = vld [vmem:[#allocation101_spill] sm:$0xff] }
 0x288   : > { %v4499_v10 = vsel %vm4174_vm4, %v4489_v63, %v4490_v7  ;;  %v4459_v29 = vadd.f32 %v10118_v43, %v2735_v11  ;;  %v2737_v36 = vadd.f32 %v2736_v16, %v8804_v57  ;;  %v10120_v43 = vld [vmem:[#allocation83_spill] sm:$0xff] }
 0x289   : > { %v2738_v12 = vpop.f32.mrf.mxu0  ;;  %v8957_v53 = vpop.f32.mrf.mxu1  ;;  %v8959_v17 = vadd.f32 %v4499_v10, %v4457_v39  ;;  %v10121_v39 = vld [vmem:[#allocation43_spill] sm:$0xff] }
 0x28a   : > { %v4491_v25 = vrot.slane %v2737_v36, 1  ;;  %v2739_v42 = vadd.f32 %v2738_v12, %v8812_v5  ;;  %v10122_v36 = vld [vmem:[#allocation44_spill] sm:$0xff] }
 0x28b   : > { %v2740_v61 = vpop.f32.mrf.mxu0  ;;  %v8962_v62 = vpop.f32.mrf.mxu1 }
 0x28c   : > { %v4498_v32 = vsel %vm4174_vm4, %v4490_v7, %v4491_v25  ;;  %v4460_v63 = vadd.f32 %v10119_v47, %v2739_v42  ;;  %v2741_v11 = vadd.f32 %v2740_v61, %v8817_v51  ;;  %v10123_v61 = vld [vmem:[#allocation19_spill] sm:$0xff] }
 0x28d   : > { %v4554_v57 = vmul.f32 %v10120_v43, %v4498_v32  ;;  %v2744_v16 = vpop.f32.mrf.mxu0  ;;  %v8969_v38 = vpop.f32.mrf.mxu1  ;;  %3268 = vmatmul.mubr.bf16.gmra.mxu1 %v10121_v39  ;;  %5900 = vmatmul.mubr.msk.bf16.gmra.mxu0 %vm1546_vm0, %v10066_v19 }
 0x28e   : > { %v4492_v5 = vrot.slane %v2741_v11, 1  ;;  %v2745_v10 = vadd.f32 %v2744_v16, %v8824_v45  ;;  %3275 = vmatprep.mubr.bf16.mxu1 %v10122_v36 }
 0x28f   : > { %v2746_v7 = vpop.f32.mrf.mxu0  ;;  %v8976_v12 = vpop.f32.mrf.mxu1  ;;  %v8978_v42 = vadd.f32 %v4554_v57, %v4458_v46 }
 0x290   : > { %v4497_v51 = vsel %vm4174_vm4, %v4491_v25, %v4492_v5  ;;  %v4461_v32 = vadd.f32 %v10123_v61, %v2745_v10  ;;  %v2747_v47 = vadd.f32 %v2746_v7, %v8833_v21  ;;  %v10125_v10 = vld [vmem:[#allocation85_spill] sm:$0xff] }
 0x291   : > { %v2748_v39 = vpop.f32.mrf.mxu0  ;;  %v8984_v43 = vpop.f32.mrf.mxu1  ;;  %v8986_v19 = vadd.f32 %v4497_v51, %v4459_v29  ;;  %v10126_v29 = vld [vmem:[#allocation45_spill] sm:$0xff] }
 0x292   : > { %v4493_v45 = vrot.slane %v2747_v47, 1  ;;  %v2749_v11 = vadd.f32 %v2748_v39, %v8841_v27  ;;  %v10127_v47 = vld [vmem:[#allocation46_spill] sm:$0xff] }
 0x293   : > { %10124 = vst [vmem:[#allocation25_spill] sm:$0xff] %v8986_v19  ;;  %v2750_v16 = vpop.f32.mrf.mxu0  ;;  %v8989_v36 = vpop.f32.mrf.mxu1 }
 0x294   : > { %v4496_v46 = vsel %vm4174_vm4, %v4492_v5, %v4493_v45  ;;  %v4462_v25 = vadd.f32 %v8561_v2, %v2749_v11  ;;  %v2751_v57 = vadd.f32 %v2750_v16, %v8846_v30  ;;  %v10128_v30 = vrot.slane %v8552_v20, 1 }
 0x295   : > { %v4556_v21 = vmul.f32 %v10125_v10, %v4496_v46  ;;  %v8996_v7 = vpop.f32.mrf.mxu1  ;;  %v2980_v61 = vpop.f32.mrf.mxu0  ;;  %3276 = vmatmul.mubr.bf16.gmra.mxu1 %v10126_v29 }
 0x296   : > { %v4494_v51 = vrot.slane %v2751_v57, 1  ;;  %v9000_v27 = vadd.f32 %v2980_v61, %v8853_v40  ;;  %3283 = vmatprep.mubr.bf16.mxu1 %v10127_v47  ;;  %v10129_v40 = vld [vmem:[#allocation16_spill] sm:$0xff] }
 0x297   : > { %v9003_v39 = vpop.f32.mrf.mxu1  ;;  %v2982_v5 = vpop.f32.mrf.mxu0  ;;  %v9005_v19 = vadd.f32 %v4556_v21, %v4460_v63 }
 0x298   : > { %v4495_v2 = vsel %vm4174_vm4, %v4493_v45, %v4494_v51  ;;  %v4526_v11 = vsel %vm4174_vm4, %v4494_v51, %v10128_v30  ;;  %v9014_v16 = vadd.f32 %v2982_v5, %v8862_v41  ;;  %v9776_v20 = vrot.slane %v9000_v27, 7 }
 0x299   : > { %v4558_v46 = vmul.f32 %v10129_v40, %v4526_v11  ;;  %v9017_v57 = vadd.f32 %v4495_v2, %v4461_v32  ;;  %v9019_v61 = vpop.f32.mrf.mxu1  ;;  %v2984_v29 = vpop.f32.mrf.mxu0 }
 0x29a   : > { %v2985_v63 = vadd.f32 %v2984_v29, %v8870_v50 }
 0x29b   : > { %10130 = vst [vmem:[#allocation8_spill] sm:$0xff] %v9017_v57  ;;  %v9022_v21 = vpop.f32.mrf.mxu1  ;;  %v2986_v45 = vpop.f32.mrf.mxu0  ;;  %v4590_v47 = vadd.f32 %v4558_v46, %v4462_v25  ;;  %v10133_v57 = vld [vmem:[#allocation49_spill] sm:$0xff] }
 0x29c   : > { %v4592_v10 = vrot.slane %v2985_v63, 7  ;;  %v2987_v51 = vadd.f32 %v2986_v45, %v8875_v3 }
 0x29d   : > { %v9026_v41 = vpop.f32.mrf.mxu1  ;;  %v2990_v5 = vpop.f32.mrf.mxu0  ;;  %3284 = vmatmul.mubr.bf16.gmra.mxu1 %v10044_v1 }
 0x29e   : > { %v4653_v32 = vsel %vm3949_vm1, %v9776_v20, %v4592_v10  ;;  %v2991_v50 = vadd.f32 %v2990_v5, %v8882_v34  ;;  %3291 = vmatprep.mubr.bf16.mxu1 %v10046_v59  ;;  %v4782_v29 = vmul.f32 0.0, %v2987_v51  ;;  %v10131_v59 = vld [vmem:[#allocation89_spill] sm:$0xff] }
 0x29f   : > { %v4718_v25 = vmul.f32 0.0, %v4653_v32  ;;  %v9035_v2 = vpop.f32.mrf.mxu1  ;;  %v2992_v30 = vpop.f32.mrf.mxu0 }
 0x2a0   : > { %v4593_v11 = vrot.slane %v2991_v50, 7  ;;  %v2993_v3 = vadd.f32 %v2992_v30, %v8891_v31 }
 0x2a1   : > { %v4750_v46 = vadd.f32 %v4718_v25, %v4590_v47  ;;  %v9038_v63 = vpop.f32.mrf.mxu1  ;;  %v2994_v1 = vpop.f32.mrf.mxu0  ;;  %v10132_v47 = vld [vmem:[#allocation91_spill] sm:$0xff] }
 0x2a2   : > { %v4652_v45 = vsel %vm3949_vm1, %v4592_v10, %v4593_v11  ;;  %v2995_v20 = vadd.f32 %v2994_v1, %v8899_v35 }
 0x2a3   : > { %v9043_v34 = vadd.f32 %v4782_v29, %v4750_v46  ;;  %v4687_v5 = vmul.f32 %v10131_v59, %v4652_v45  ;;  %v9046_v32 = vpop.f32.mrf.mxu1  ;;  %v2996_v40 = vpop.f32.mrf.mxu0 }
 0x2a4   : > { %v4594_v50 = vrot.slane %v2995_v20, 7  ;;  %v2997_v31 = vadd.f32 %v2996_v40, %v8904_v13 }
 0x2a5   : > { %v4719_v51 = vadd.f32 %v4687_v5, %v10132_v47  ;;  %v9050_v25 = vpop.f32.mrf.mxu1  ;;  %v3000_v30 = vpop.f32.mrf.mxu0  ;;  %3292 = vmatmul.mubr.bf16.gmra.mxu1 %v10133_v57 }
 0x2a6   : > { %v4651_v35 = vsel %vm3949_vm1, %v4593_v11, %v4594_v50  ;;  %v3001_v10 = vadd.f32 %v3000_v30, %v8911_v9 }
 0x2a7   : > { %v9056_v46 = vadd.f32 %v4719_v51, %v2993_v3  ;;  %v4720_v29 = vadd.f32 %v4651_v35, %v8607_v49  ;;  %v9059_v1 = vpop.f32.mrf.mxu1  ;;  %v3002_v20 = vpop.f32.mrf.mxu0  ;;  %v10134_v3 = vld [vmem:[#allocation92_spill] sm:$0xff]  ;;  %v10135_v35 = vld [vmem:[#allocation93_spill] sm:$0xff] }
 0x2a8   : > { %v4595_v13 = vrot.slane %v3001_v10, 7  ;;  %v3003_v40 = vadd.f32 %v3002_v20, %v8920_v52 }
 0x2a9   : > { %v9062_v45 = vadd.f32 %v4720_v29, %v2997_v31  ;;  %v9064_v59 = vpop.f32.mrf.mxu1  ;;  %v3004_v57 = vpop.f32.mrf.mxu0 }
 0x2aa   : > { %v4650_v11 = vsel %vm3949_vm1, %v4594_v50, %v4595_v13  ;;  %v3005_v9 = vadd.f32 %v3004_v57, %v8928_v58 }
 0x2ab   : > { %v4689_v5 = vmul.f32 %v10134_v3, %v4650_v11  ;;  %v9070_v47 = vpop.f32.mrf.mxu1  ;;  %v3006_v49 = vpop.f32.mrf.mxu0 }
 0x2ac   : > { %v4596_v51 = vrot.slane %v3005_v9, 7  ;;  %v3007_v30 = vadd.f32 %v3006_v49, %v8933_v24 }
 0x2ad   : > { %v4721_v52 = vadd.f32 %v4689_v5, %v10135_v35  ;;  %v9074_v31 = vpop.f32.mrf.mxu1  ;;  %v3010_v10 = vpop.f32.mrf.mxu0 }
 0x2ae   : > { %v4649_v29 = vsel %vm3949_vm1, %v4595_v13, %v4596_v51  ;;  %v3011_v50 = vadd.f32 %v3010_v10, %v8940_v23 }
 0x2af   : > { %v9079_v20 = vadd.f32 %v4721_v52, %v3003_v40  ;;  %v4722_v58 = vadd.f32 %v4649_v29, %v8635_v0  ;;  %v9082_v57 = vpop.f32.mrf.mxu1  ;;  %v3012_v11 = vpop.f32.mrf.mxu0  ;;  %v10136_v40 = vld [vmem:[#allocation52_spill] sm:$0xff] }
 0x2b0   : > { %v4597_v9 = vrot.slane %v3011_v50, 7  ;;  %v3013_v24 = vadd.f32 %v3012_v11, %v8949_v33 }
 0x2b1   : > { %v9085_v3 = vadd.f32 %v4722_v58, %v3007_v30  ;;  %v9087_v5 = vpop.f32.mrf.mxu1  ;;  %v3014_v49 = vpop.f32.mrf.mxu0 }
 0x2b2   : > { %v4648_v13 = vsel %vm3949_vm1, %v4596_v51, %v4597_v9  ;;  %v3015_v23 = vadd.f32 %v3014_v49, %v8957_v53 }
 0x2b3   : > { %v4691_v35 = vmul.f32 %v10136_v40, %v4648_v13  ;;  %v9093_v52 = vpop.f32.mrf.mxu1  ;;  %v3016_v0 = vpop.f32.mrf.mxu0 }
 0x2b4   : > { %v4598_v10 = vrot.slane %v3015_v23, 7  ;;  %v3017_v29 = vadd.f32 %v3016_v0, %v8962_v62 }
 0x2b5   : > { %v4723_v33 = vadd.f32 %v4691_v35, %v8643_v54  ;;  %v9097_v30 = vpop.f32.mrf.mxu1  ;;  %v3020_v50 = vpop.f32.mrf.mxu0 }
 0x2b6   : > { %v4647_v58 = vsel %vm3949_vm1, %v4597_v9, %v4598_v10  ;;  %v3021_v51 = vadd.f32 %v3020_v50, %v8969_v38 }
 0x2b7   : > { %v9102_v11 = vadd.f32 %v4723_v33, %v3013_v24  ;;  %v4724_v53 = vadd.f32 %v4647_v58, %v8663_v37  ;;  %v9105_v49 = vpop.f32.mrf.mxu1  ;;  %v3022_v13 = vpop.f32.mrf.mxu0  ;;  %v10137_v24 = vld [vmem:[#allocation54_spill] sm:$0xff] }
 0x2b8   : > { %v4599_v23 = vrot.slane %v3021_v51, 7  ;;  %v3023_v62 = vadd.f32 %v3022_v13, %v8976_v12 }
 0x2b9   : > { %v9108_v40 = vadd.f32 %v4724_v53, %v3017_v29  ;;  %v9110_v54 = vpop.f32.mrf.mxu1  ;;  %v3024_v35 = vpop.f32.mrf.mxu0 }
 0x2ba   : > { %v4646_v9 = vsel %vm3949_vm1, %v4598_v10, %v4599_v23  ;;  %v3025_v38 = vadd.f32 %v3024_v35, %v8984_v43 }
 0x2bb   : > { %v4693_v0 = vmul.f32 %v10137_v24, %v4646_v9  ;;  %v9116_v33 = vpop.f32.mrf.mxu1  ;;  %v3026_v37 = vpop.f32.mrf.mxu0 }
 0x2bc   : > { %v4600_v50 = vrot.slane %v3025_v38, 7  ;;  %v3027_v58 = vadd.f32 %v3026_v37, %v8989_v36 }
 0x2bd   : > { %v4725_v12 = vadd.f32 %v4693_v0, %v8671_v28  ;;  %v9120_v29 = vpop.f32.mrf.mxu1  ;;  %v3030_v51 = vpop.f32.mrf.mxu0 }
 0x2be   : > { %v4645_v53 = vsel %vm3949_vm1, %v4599_v23, %v4600_v50  ;;  %v3031_v10 = vadd.f32 %v3030_v51, %v8996_v7 }
 0x2bf   : > { %v9125_v13 = vadd.f32 %v4725_v12, %v3023_v62  ;;  %v4726_v43 = vadd.f32 %v4645_v53, %v8691_v4  ;;  %v9128_v35 = vpop.f32.mrf.mxu1  ;;  %v3032_v9 = vpop.f32.mrf.mxu0  ;;  %v10138_v62 = vld [vmem:[#allocation57_spill] sm:$0xff] }
 0x2c0   : > { %v4601_v38 = vrot.slane %v3031_v10, 7  ;;  %v3033_v36 = vadd.f32 %v3032_v9, %v9003_v39 }
 0x2c1   : > { %v9131_v24 = vadd.f32 %v4726_v43, %v3027_v58  ;;  %v9133_v28 = vpop.f32.mrf.mxu1  ;;  %v3034_v0 = vpop.f32.mrf.mxu0 }
 0x2c2   : > { %v4644_v23 = vsel %vm3949_vm1, %v4600_v50, %v4601_v38  ;;  %v3035_v7 = vadd.f32 %v3034_v0, %v9019_v61 }
 0x2c3   : > { %v4695_v37 = vmul.f32 %v10138_v62, %v4644_v23  ;;  %v9139_v12 = vpop.f32.mrf.mxu1  ;;  %v3036_v4 = vpop.f32.mrf.mxu0 }
 0x2c4   : > { %v4602_v51 = vrot.slane %v3035_v7, 7  ;;  %v3037_v53 = vadd.f32 %v3036_v4, %v9022_v21 }
 0x2c5   : > { %v4727_v39 = vadd.f32 %v4695_v37, %v8699_v44  ;;  %v9143_v58 = vpop.f32.mrf.mxu1  ;;  %v3040_v10 = vpop.f32.mrf.mxu0 }
 0x2c6   : > { %v4643_v43 = vsel %vm3949_vm1, %v4601_v38, %v4602_v51  ;;  %v3041_v50 = vadd.f32 %v3040_v10, %v9026_v41 }
 0x2c7   : > { %v9148_v9 = vadd.f32 %v4727_v39, %v3033_v36  ;;  %v4728_v61 = vadd.f32 %v4643_v43, %v8719_v6  ;;  %v9151_v0 = vpop.f32.mrf.mxu1  ;;  %v3042_v23 = vpop.f32.mrf.mxu0  ;;  %v10139_v36 = vld [vmem:[#allocation59_spill] sm:$0xff] }
 0x2c8   : > { %v4603_v7 = vrot.slane %v3041_v50, 7  ;;  %v3043_v21 = vadd.f32 %v3042_v23, %v9035_v2 }
 0x2c9   : > { %v9154_v62 = vadd.f32 %v4728_v61, %v3037_v53  ;;  %v9156_v44 = vpop.f32.mrf.mxu1  ;;  %v3044_v37 = vpop.f32.mrf.mxu0 }
 0x2ca   : > { %v4642_v38 = vsel %vm3949_vm1, %v4602_v51, %v4603_v7  ;;  %v3045_v41 = vadd.f32 %v3044_v37, %v9038_v63  ;;  %v10141_v63 = vld [vmem:[#allocation50_spill] sm:$0xff] }
 0x2cb   : > { %v4697_v4 = vmul.f32 %v10139_v36, %v4642_v38  ;;  %v9162_v39 = vpop.f32.mrf.mxu1  ;;  %v3046_v6 = vpop.f32.mrf.mxu0 }
 0x2cc   : > { %v4604_v10 = vrot.slane %v3045_v41, 7  ;;  %v3047_v43 = vadd.f32 %v3046_v6, %v9046_v32 }
 0x2cd   : > { %v4729_v2 = vadd.f32 %v4697_v4, %v8727_v14  ;;  %v9166_v53 = vpop.f32.mrf.mxu1  ;;  %v3050_v50 = vpop.f32.mrf.mxu0 }
 0x2ce   : > { %v4641_v61 = vsel %vm3949_vm1, %v4603_v7, %v4604_v10  ;;  %v3051_v51 = vadd.f32 %v3050_v50, %v9050_v25 }
 0x2cf   : > { %v9171_v23 = vadd.f32 %v4729_v2, %v3043_v21  ;;  %v4730_v37 = vadd.f32 %v4641_v61, %v10141_v63  ;;  %v9174_v38 = vpop.f32.mrf.mxu1  ;;  %v3052_v36 = vpop.f32.mrf.mxu0  ;;  %v10143_v21 = vld [vmem:[#allocation61_spill] sm:$0xff] }
 0x2d0   : > { %v4605_v41 = vrot.slane %v3051_v51, 7  ;;  %v3053_v32 = vadd.f32 %v3052_v36, %v9059_v1 }
 0x2d1   : > { %10140 = vst [vmem:[#allocation28_spill] sm:$0xff] %v9171_v23  ;;  %v9177_v6 = vadd.f32 %v4730_v37, %v3047_v43  ;;  %v9179_v14 = vpop.f32.mrf.mxu1  ;;  %v3054_v4 = vpop.f32.mrf.mxu0  ;;  %v10144_v23 = vld [vmem:[#allocation94_spill] sm:$0xff] }
 0x2d2   : > { %v4640_v7 = vsel %vm3949_vm1, %v4604_v10, %v4605_v41  ;;  %v3055_v25 = vadd.f32 %v3054_v4, %v9064_v59  ;;  %v10146_v59 = vld [vmem:[#allocation95_spill] sm:$0xff] }
 0x2d3   : > { %10142 = vst [vmem:[#allocation11_spill] sm:$0xff] %v9177_v6  ;;  %v4699_v2 = vmul.f32 %v10143_v21, %v4640_v7  ;;  %v9185_v50 = vpop.f32.mrf.mxu1  ;;  %v3056_v61 = vpop.f32.mrf.mxu0 }
 0x2d4   : > { %v4606_v63 = vrot.slane %v3055_v25, 7  ;;  %v3057_v51 = vadd.f32 %v3056_v61, %v9070_v47 }
 0x2d5   : > { %v4731_v1 = vadd.f32 %v4699_v2, %v10144_v23  ;;  %v9189_v43 = vpop.f32.mrf.mxu1  ;;  %v3060_v37 = vpop.f32.mrf.mxu0 }
 0x2d6   : > { %v4639_v36 = vsel %vm3949_vm1, %v4605_v41, %v4606_v63  ;;  %v3061_v10 = vadd.f32 %v3060_v37, %v9074_v31 }
 0x2d7   : > { %v9194_v6 = vadd.f32 %v4731_v1, %v3053_v32  ;;  %v4732_v4 = vadd.f32 %v4639_v36, %v10146_v59  ;;  %v9197_v7 = vpop.f32.mrf.mxu1  ;;  %v3062_v21 = vpop.f32.mrf.mxu0  ;;  %v10148_v32 = vld [vmem:[#allocation63_spill] sm:$0xff] }
 0x2d8   : > { %v4607_v25 = vrot.slane %v3061_v10, 7  ;;  %v3063_v47 = vadd.f32 %v3062_v21, %v9082_v57 }
 0x2d9   : > { %10145 = vst [vmem:[#allocation13_spill] sm:$0xff] %v9194_v6  ;;  %v9200_v61 = vadd.f32 %v4732_v4, %v3057_v51  ;;  %v9202_v23 = vpop.f32.mrf.mxu1  ;;  %v3064_v2 = vpop.f32.mrf.mxu0  ;;  %v10149_v6 = vld [vmem:[#allocation47_spill] sm:$0xff] }
 0x2da   : > { %v4638_v41 = vsel %vm3949_vm1, %v4606_v63, %v4607_v25  ;;  %v3065_v31 = vadd.f32 %v3064_v2, %v9087_v5  ;;  %v10151_v5 = vld [vmem:[#allocation22_spill] sm:$0xff] }
 0x2db   : > { %10147 = vst [vmem:[#allocation33_spill] sm:$0xff] %v9200_v61  ;;  %v4701_v1 = vmul.f32 %v10148_v32, %v4638_v41  ;;  %v9208_v37 = vpop.f32.mrf.mxu1  ;;  %v3066_v36 = vpop.f32.mrf.mxu0 }
 0x2dc   : > { %v4608_v59 = vrot.slane %v3065_v31, 7  ;;  %v3067_v10 = vadd.f32 %v3066_v36, %v9093_v52 }
 0x2dd   : > { %v4733_v57 = vadd.f32 %v4701_v1, %v10149_v6  ;;  %v9212_v51 = vpop.f32.mrf.mxu1  ;;  %v3070_v4 = vpop.f32.mrf.mxu0 }
 0x2de   : > { %v4637_v21 = vsel %vm3949_vm1, %v4607_v25, %v4608_v59  ;;  %v3071_v63 = vadd.f32 %v3070_v4, %v9097_v30 }
 0x2df   : > { %v9217_v61 = vadd.f32 %v4733_v57, %v3063_v47  ;;  %v4734_v2 = vadd.f32 %v4637_v21, %v10151_v5  ;;  %v9220_v41 = vpop.f32.mrf.mxu1  ;;  %v3072_v32 = vpop.f32.mrf.mxu0  ;;  %v10153_v47 = vld [vmem:[#allocation65_spill] sm:$0xff] }
 0x2e0   : > { %v4609_v31 = vrot.slane %v3071_v63, 7  ;;  %v3073_v52 = vadd.f32 %v3072_v32, %v9105_v49 }
 0x2e1   : > { %10150 = vst [vmem:[#allocation17_spill] sm:$0xff] %v9217_v61  ;;  %v9223_v36 = vadd.f32 %v4734_v2, %v3067_v10  ;;  %v9225_v6 = vpop.f32.mrf.mxu1  ;;  %v3074_v1 = vpop.f32.mrf.mxu0  ;;  %v10154_v61 = vld [vmem:[#allocation48_spill] sm:$0xff] }
 0x2e2   : > { %v4636_v25 = vsel %vm3949_vm1, %v4608_v59, %v4609_v31  ;;  %v3075_v30 = vadd.f32 %v3074_v1, %v9110_v54  ;;  %v10155_v54 = vld [vmem:[#allocation96_spill] sm:$0xff] }
 0x2e3   : > { %10152 = vst [vmem:[#allocation36_spill] sm:$0xff] %v9223_v36  ;;  %v4703_v57 = vmul.f32 %v10153_v47, %v4636_v25  ;;  %v9231_v4 = vpop.f32.mrf.mxu1  ;;  %v3076_v21 = vpop.f32.mrf.mxu0 }
 0x2e4   : > { %v4610_v5 = vrot.slane %v3075_v30, 7  ;;  %v3077_v63 = vadd.f32 %v3076_v21, %v9116_v33 }
 0x2e5   : > { %v4735_v49 = vadd.f32 %v4703_v57, %v10154_v61  ;;  %v9235_v10 = vpop.f32.mrf.mxu1  ;;  %v3080_v2 = vpop.f32.mrf.mxu0 }
 0x2e6   : > { %v4635_v32 = vsel %vm3949_vm1, %v4609_v31, %v4610_v5  ;;  %v3081_v59 = vadd.f32 %v3080_v2, %v9120_v29 }
 0x2e7   : > { %v9240_v36 = vadd.f32 %v4735_v49, %v3073_v52  ;;  %v4736_v1 = vadd.f32 %v4635_v32, %v10155_v54  ;;  %v9243_v25 = vpop.f32.mrf.mxu1  ;;  %v3082_v47 = vpop.f32.mrf.mxu0  ;;  %v10157_v52 = vld [vmem:[#allocation68_spill] sm:$0xff] }
 0x2e8   : > { %v4611_v30 = vrot.slane %v3081_v59, 7  ;;  %v3083_v33 = vadd.f32 %v3082_v47, %v9128_v35 }
 0x2e9   : > { %v9246_v21 = vadd.f32 %v4736_v1, %v3077_v63  ;;  %v9248_v61 = vpop.f32.mrf.mxu1  ;;  %v3084_v57 = vpop.f32.mrf.mxu0 }
 0x2ea   : > { %v4634_v31 = vsel %vm3949_vm1, %v4610_v5, %v4611_v30  ;;  %v3085_v29 = vadd.f32 %v3084_v57, %v9133_v28 }
 0x2eb   : > { %10156 = vst [vmem:[#allocation18_spill] sm:$0xff] %v9246_v21  ;;  %v4705_v49 = vmul.f32 %v10157_v52, %v4634_v31  ;;  %v9254_v2 = vpop.f32.mrf.mxu1  ;;  %v3086_v32 = vpop.f32.mrf.mxu0 }
 0x2ec   : > { %v4612_v54 = vrot.slane %v3085_v29, 7  ;;  %v3087_v59 = vadd.f32 %v3086_v32, %v9139_v12 }
 0x2ed   : > { %v4737_v35 = vadd.f32 %v4705_v49, %v8843_v48  ;;  %v3090_v63 = vpop.f32.mrf.mxu0  ;;  %v9258_v1 = vpop.f32.mrf.mxu1 }
 0x2ee   : > { %v4633_v47 = vsel %vm3949_vm1, %v4611_v30, %v4612_v54  ;;  %v3091_v5 = vadd.f32 %v3090_v63, %v9143_v58 }
 0x2ef   : > { %v9263_v21 = vadd.f32 %v4737_v35, %v3083_v33  ;;  %v4738_v28 = vadd.f32 %v4633_v47, %v8864_v22  ;;  %v3092_v57 = vpop.f32.mrf.mxu0  ;;  %v9266_v31 = vpop.f32.mrf.mxu1  ;;  %v10158_v33 = vld [vmem:[#allocation71_spill] sm:$0xff] }
 0x2f0   : > { %v4613_v29 = vrot.slane %v3091_v5, 7  ;;  %v3093_v12 = vadd.f32 %v3092_v57, %v9151_v0 }
 0x2f1   : > { %v9269_v52 = vadd.f32 %v4738_v28, %v3087_v59  ;;  %v3094_v48 = vpop.f32.mrf.mxu0  ;;  %v9271_v49 = vpop.f32.mrf.mxu1 }
 0x2f2   : > { %v4632_v30 = vsel %vm3949_vm1, %v4612_v54, %v4613_v29  ;;  %v3095_v58 = vadd.f32 %v3094_v48, %v9156_v44 }
 0x2f3   : > { %v4707_v32 = vmul.f32 %v10158_v33, %v4632_v30  ;;  %v3096_v35 = vpop.f32.mrf.mxu0  ;;  %v9277_v22 = vpop.f32.mrf.mxu1 }
 0x2f4   : > { %v4614_v63 = vrot.slane %v3095_v58, 7  ;;  %v3097_v47 = vadd.f32 %v3096_v35, %v9162_v39 }
 0x2f5   : > { %v4739_v0 = vadd.f32 %v4707_v32, %v8872_v18  ;;  %v3100_v59 = vpop.f32.mrf.mxu0  ;;  %v9281_v5 = vpop.f32.mrf.mxu1 }
 0x2f6   : > { %v4631_v28 = vsel %vm3949_vm1, %v4613_v29, %v4614_v63  ;;  %v3101_v54 = vadd.f32 %v3100_v59, %v9166_v53 }
 0x2f7   : > { %v9286_v57 = vadd.f32 %v4739_v0, %v3093_v12  ;;  %v4740_v44 = vadd.f32 %v4631_v28, %v8893_v26  ;;  %v3102_v48 = vpop.f32.mrf.mxu0  ;;  %v9289_v30 = vpop.f32.mrf.mxu1  ;;  %v10159_v12 = vld [vmem:[#allocation74_spill] sm:$0xff] }
 0x2f8   : > { %v4615_v58 = vrot.slane %v3101_v54, 7  ;;  %v3103_v39 = vadd.f32 %v3102_v48, %v9174_v38 }
 0x2f9   : > { %v9292_v33 = vadd.f32 %v4740_v44, %v3097_v47  ;;  %v3104_v18 = vpop.f32.mrf.mxu0  ;;  %v9294_v32 = vpop.f32.mrf.mxu1 }
 0x2fa   : > { %v4630_v29 = vsel %vm3949_vm1, %v4614_v63, %v4615_v58  ;;  %v3105_v53 = vadd.f32 %v3104_v18, %v9179_v14 }
 0x2fb   : > { %v4709_v35 = vmul.f32 %v10159_v12, %v4630_v29  ;;  %v3106_v0 = vpop.f32.mrf.mxu0  ;;  %v9300_v26 = vpop.f32.mrf.mxu1 }
 0x2fc   : > { %v4616_v59 = vrot.slane %v3105_v53, 7  ;;  %v3107_v28 = vadd.f32 %v3106_v0, %v9185_v50 }
 0x2fd   : > { %v4741_v38 = vadd.f32 %v4709_v35, %v8901_v56  ;;  %v3110_v47 = vpop.f32.mrf.mxu0  ;;  %v9304_v54 = vpop.f32.mrf.mxu1 }
 0x2fe   : > { %v4629_v44 = vsel %vm3949_vm1, %v4615_v58, %v4616_v59  ;;  %v3111_v63 = vadd.f32 %v3110_v47, %v9189_v43 }
 0x2ff   : > { %v9309_v48 = vadd.f32 %v4741_v38, %v3103_v39  ;;  %v4742_v14 = vadd.f32 %v4629_v44, %v8922_v8  ;;  %v3112_v18 = vpop.f32.mrf.mxu0  ;;  %v9312_v29 = vpop.f32.mrf.mxu1  ;;  %v10160_v39 = vld [vmem:[#allocation77_spill] sm:$0xff] }
 0x300   : > { %v4617_v53 = vrot.slane %v3111_v63, 7  ;;  %v3113_v50 = vadd.f32 %v3112_v18, %v9197_v7 }
 0x301   : > { %v9315_v12 = vadd.f32 %v4742_v14, %v3107_v28  ;;  %v3114_v56 = vpop.f32.mrf.mxu0  ;;  %v9317_v35 = vpop.f32.mrf.mxu1 }
 0x302   : > { %v4628_v58 = vsel %vm3949_vm1, %v4616_v59, %v4617_v53  ;;  %v3115_v43 = vadd.f32 %v3114_v56, %v9202_v23 }
 0x303   : > { %v4711_v0 = vmul.f32 %v10160_v39, %v4628_v58  ;;  %v3116_v38 = vpop.f32.mrf.mxu0  ;;  %v9323_v8 = vpop.f32.mrf.mxu1 }
 0x304   : > { %v4618_v47 = vrot.slane %v3115_v43, 7  ;;  %v3117_v44 = vadd.f32 %v3116_v38, %v9208_v37 }
 0x305   : > { %v4743_v7 = vadd.f32 %v4711_v0, %v8930_v15  ;;  %v3120_v28 = vpop.f32.mrf.mxu0  ;;  %v9327_v63 = vpop.f32.mrf.mxu1 }
 0x306   : > { %v4627_v14 = vsel %vm3949_vm1, %v4617_v53, %v4618_v47  ;;  %v3121_v59 = vadd.f32 %v3120_v28, %v9212_v51 }
 0x307   : > { %v9332_v18 = vadd.f32 %v4743_v7, %v3113_v50  ;;  %v4744_v23 = vadd.f32 %v4627_v14, %v8951_v60  ;;  %v3122_v56 = vpop.f32.mrf.mxu0  ;;  %v9335_v58 = vpop.f32.mrf.mxu1  ;;  %v10161_v50 = vld [vmem:[#allocation81_spill] sm:$0xff] }
 0x308   : > { %v4619_v43 = vrot.slane %v3121_v59, 7  ;;  %v3123_v37 = vadd.f32 %v3122_v56, %v9220_v41 }
 0x309   : > { %v9338_v39 = vadd.f32 %v4744_v23, %v3117_v44  ;;  %v3124_v15 = vpop.f32.mrf.mxu0  ;;  %v9340_v0 = vpop.f32.mrf.mxu1 }
 0x30a   : > { %v4626_v53 = vsel %vm3949_vm1, %v4618_v47, %v4619_v43  ;;  %v3125_v51 = vadd.f32 %v3124_v15, %v9225_v6 }
 0x30b   : > { %v4713_v38 = vmul.f32 %v10161_v50, %v4626_v53  ;;  %v3126_v7 = vpop.f32.mrf.mxu0  ;;  %v9346_v60 = vpop.f32.mrf.mxu1 }
 0x30c   : > { %v4620_v28 = vrot.slane %v3125_v51, 7  ;;  %v3127_v14 = vadd.f32 %v3126_v7, %v9231_v4 }
 0x30d   : > { %v4745_v41 = vadd.f32 %v4713_v38, %v8959_v17  ;;  %v3130_v44 = vpop.f32.mrf.mxu0  ;;  %v9350_v59 = vpop.f32.mrf.mxu1 }
 0x30e   : > { %v4625_v23 = vsel %vm3949_vm1, %v4619_v43, %v4620_v28  ;;  %v3131_v47 = vadd.f32 %v3130_v44, %v9235_v10 }
 0x30f   : > { %v9355_v56 = vadd.f32 %v4745_v41, %v3123_v37  ;;  %v4746_v6 = vadd.f32 %v4625_v23, %v8978_v42  ;;  %v3132_v15 = vpop.f32.mrf.mxu0  ;;  %v9358_v53 = vpop.f32.mrf.mxu1  ;;  %v10164_v37 = vld [vmem:[#allocation84_spill] sm:$0xff]  ;;  %v10165_v41 = vld [vmem:[#allocation87_spill] sm:$0xff] }
 0x310   : > { %v4621_v51 = vrot.slane %v3131_v47, 7  ;;  %v3133_v4 = vadd.f32 %v3132_v15, %v9243_v25  ;;  %v4685_v42 = vmul.f32 0.0, %v10165_v41  ;;  %v4781_v41 = vmul.f32 0.0, %v9014_v16 }
 0x311   : > { %10162 = vst [vmem:[#allocation20_spill] sm:$0xff] %v9355_v56  ;;  %v9361_v50 = vadd.f32 %v4746_v6, %v3127_v14  ;;  %v3134_v17 = vpop.f32.mrf.mxu0  ;;  %v9363_v38 = vpop.f32.mrf.mxu1  ;;  %v10166_v14 = vld [vmem:[#allocation25_spill] sm:$0xff]  ;;  %v10167_v56 = vrot.slane %v9000_v27, 7  ;;  %v5749_v27 = vadd.f32 %v9289_v30, %v9281_v5 }
 0x312   : > { %v4624_v43 = vsel %vm3949_vm1, %v4620_v28, %v4621_v51  ;;  %v3135_v10 = vadd.f32 %v3134_v17, %v9248_v61 }
 0x313   : > { %10163 = vst [vmem:[#allocation39_spill] sm:$0xff] %v9361_v50  ;;  %v4715_v7 = vmul.f32 %v10164_v37, %v4624_v43  ;;  %v3136_v44 = vpop.f32.mrf.mxu0  ;;  %v9370_v23 = vpop.f32.mrf.mxu1 }
 0x314   : > { %v4622_v47 = vrot.slane %v3135_v10, 7  ;;  %v3137_v25 = vadd.f32 %v3136_v44, %v9254_v2 }
 0x315   : > { %v4747_v6 = vadd.f32 %v4715_v7, %v10166_v14  ;;  %v9374_v15 = vpop.f32.mrf.mxu1  ;;  %v5873_v50 = vpop.f32.mrf.mxu0  ;;  %v5743_v7 = vadd.f32 %v9266_v31, %v9258_v1 }
 0x316   : > { %v4654_v61 = vsel %vm3949_vm1, %v4622_v47, %v10167_v56  ;;  %v4623_v28 = vsel %vm3949_vm1, %v4621_v51, %v4622_v47  ;;  %v5752_v56 = vadd.f32 %v9300_v26, %v9294_v32  ;;  %v10168_v51 = vld [vmem:[#allocation8_spill] sm:$0xff]  ;;  %v5746_v47 = vadd.f32 %v9277_v22, %v9271_v49 }
 0x317   : > { %v9382_v17 = vadd.f32 %v4747_v6, %v3133_v4  ;;  %v4717_v43 = vmul.f32 %v4685_v42, %v4654_v61  ;;  %v4748_v10 = vadd.f32 %v4623_v28, %v9005_v19  ;;  %v9385_v37 = vpop.f32.mrf.mxu1  ;;  %v3334_v2 = vpop.f32.mrf.mxu0  ;;  %v3343_v14 = vadd.f32 %v5873_v50, %v5749_v27  ;;  %v10169_v26 = vld [vmem:[#allocation16_spill] sm:$0xff] }
 0x318   : > { %v9399_v6 = vadd.f32 %v5743_v7, %v3334_v2  ;;  %v4910_v16 = vmul.f32 0.0, %v10169_v26  ;;  %v5755_v49 = vadd.f32 %v9312_v29, %v9304_v54  ;;  %v5761_v2 = vadd.f32 %v9335_v58, %v9327_v63 }
 0x319   : > { %v4749_v4 = vadd.f32 %v4717_v43, %v10168_v51  ;;  %v9395_v44 = vadd.f32 %v4748_v10, %v3137_v25  ;;  %v5774_v42 = vpop.f32.mrf.mxu1  ;;  %v5874_v19 = vpop.f32.mrf.mxu0  ;;  %v4817_v28 = vrot.slane %v3343_v14, 1  ;;  %v5758_v63 = vadd.f32 %v9323_v8, %v9317_v35 }
 0x31a   : > { %v3346_v1 = vadd.f32 %v5874_v19, %v5752_v56  ;;  %v4815_v43 = vrot.slane %v9399_v6, 1  ;;  %v5764_v56 = vadd.f32 %v9346_v60, %v9340_v0 }
 0x31b   : > { %v5775_v31 = vpop.f32.mrf.mxu1  ;;  %v3337_v5 = vpop.f32.mrf.mxu0  ;;  %v4813_v30 = vadd.f32 %v4781_v41, %v4749_v4 }
 0x31c   : > { %v3338_v32 = vadd.f32 %v5746_v47, %v3337_v5  ;;  %v4818_v10 = vrot.slane %v3346_v1, 1 }
 0x31d   : > { %v9402_v61 = vpop.f32.mrf.mxu1  ;;  %v5877_v25 = vpop.f32.mrf.mxu0 }
 0x31e   : > { %v4816_v51 = vrot.slane %v3338_v32, 1  ;;  %v4875_v58 = vsel %vm4174_vm4, %v4817_v28, %v4818_v10  ;;  %v3359_v47 = vadd.f32 %v5877_v25, %v5761_v2 }
 0x31f   : > { %v9407_v22 = vpop.f32.mrf.mxu1  ;;  %v3350_v50 = vpop.f32.mrf.mxu0  ;;  %v4943_v25 = vadd.f32 %v4875_v58, %v9056_v46 }
 0x320   : > { %v4876_v7 = vsel %vm4174_vm4, %v4816_v51, %v4817_v28  ;;  %v4877_v27 = vsel %vm4174_vm4, %v4815_v43, %v4816_v51  ;;  %v3351_v41 = vadd.f32 %v5755_v49, %v3350_v50  ;;  %v4821_v28 = vrot.slane %v3359_v47, 1  ;;  %v10170_v50 = vld [vmem:[#allocation90_spill] sm:$0xff] }
 0x321   : > { %v4941_v54 = vmul.f32 0.0, %v4877_v27  ;;  %v4942_v29 = vmul.f32 %v4910_v16, %v4876_v7  ;;  %v9420_v4 = vpop.f32.mrf.mxu1  ;;  %v5878_v19 = vpop.f32.mrf.mxu0 }
 0x322   : > { %v4819_v5 = vrot.slane %v3351_v41, 1  ;;  %v3362_v0 = vadd.f32 %v5878_v19, %v5764_v56  ;;  %v5773_v19 = vadd.f32 %v9385_v37, %v9374_v15 }
 0x323   : > { %v4973_v14 = vadd.f32 %v4941_v54, %v4813_v30  ;;  %v4974_v1 = vadd.f32 %v4942_v29, %v9043_v34  ;;  %v9429_v60 = vpop.f32.mrf.mxu1  ;;  %v3353_v32 = vpop.f32.mrf.mxu0  ;;  %v5767_v34 = vadd.f32 %v9358_v53, %v9350_v59  ;;  %v5776_v29 = vadd.f32 %v5775_v31, %v5774_v42  ;;  %v10171_v59 = vld [vmem:[#allocation51_spill] sm:$0xff] }
 0x324   : > { %v3354_v26 = vadd.f32 %v5758_v63, %v3353_v32  ;;  %v4874_v35 = vsel %vm4174_vm4, %v4818_v10, %v4819_v5  ;;  %v4822_v27 = vrot.slane %v3362_v0, 1 }
 0x325   : > { %v5005_v16 = vmax.f32 %v4973_v14, 0.0  ;;  %v5006_v51 = vmax.f32 %v4974_v1, 0.0  ;;  %v5783_v8 = vpop.f32.mrf.mxu1  ;;  %v5881_v49 = vpop.f32.mrf.mxu0  ;;  %v4912_v30 = vmul.f32 %v10170_v50, %v4874_v35  ;;  %v5770_v1 = vadd.f32 %v9370_v23, %v9363_v38 }
 0x326   : > { %v4820_v2 = vrot.slane %v3354_v26, 1  ;;  %v4871_v15 = vsel %vm4174_vm4, %v4821_v28, %v4822_v27  ;;  %v5779_v38 = vadd.f32 %v9407_v22, %v9402_v61 }
 0x327   : > { %v5708_v7 = vpack.c.bf16 %v5006_v51, %v5005_v16  ;;  %v5784_v56 = vpop.f32.mrf.mxu1  ;;  %v3366_v54 = vpop.f32.mrf.mxu0  ;;  %v4944_v41 = vadd.f32 %v4912_v30, %v9062_v45  ;;  %v4975_v45 = vmax.f32 %v4943_v25, 0.0  ;;  %v4947_v23 = vadd.f32 %v4871_v15, %v9102_v11 }
 0x328   : > { %v4872_v10 = vsel %vm4174_vm4, %v4820_v2, %v4821_v28  ;;  %v4873_v46 = vsel %vm4174_vm4, %v4819_v5, %v4820_v2  ;;  %v3367_v47 = vadd.f32 %v5767_v34, %v3366_v54  ;;  %v3375_v5 = vadd.f32 %v5881_v49, %v5773_v19  ;;  %v10172_v2 = vld [vmem:[#allocation53_spill] sm:$0xff] }
 0x329   : > { %5724 = vst [vmem:[%s9444_s26 + $0x78] sm:$0xff] %v5708_v7   ;;  %v4914_v53 = vmul.f32 %v10171_v59, %v4872_v10  ;;  %v4945_v63 = vadd.f32 %v4873_v46, %v9079_v20  ;;  %v5786_v42 = vpop.f32.mrf.mxu1  ;;  %v5882_v31 = vpop.f32.mrf.mxu0  ;;  %v4976_v58 = vmax.f32 %v4944_v41, 0.0  ;;  %v5785_v41 = vadd.f32 %v5784_v56, %v5783_v8 }
 0x32a   : > { %v3378_v14 = vadd.f32 %v5882_v31, %v5776_v29  ;;  %v4823_v20 = vrot.slane %v3367_v47, 1  ;;  %v4825_v28 = vrot.slane %v3375_v5, 1  ;;  %v4979_v31 = vmax.f32 %v4947_v23, 0.0 }
 0x32b   : > { %v4946_v37 = vadd.f32 %v4914_v53, %v9085_v3  ;;  %v5787_v0 = vpop.f32.mrf.mxu1  ;;  %v3369_v32 = vpop.f32.mrf.mxu0  ;;  %v5633_v26 = vpack.c.bf16 %v4976_v58, %v4975_v45  ;;  %v4977_v16 = vmax.f32 %v4945_v63, 0.0  ;;  %v10173_v53 = vld [vmem:[#allocation55_spill] sm:$0xff] }
 0x32c   : > { %v4826_v35 = vrot.slane %v3378_v14, 1  ;;  %v3370_v25 = vadd.f32 %v5770_v1, %v3369_v32  ;;  %v4870_v3 = vsel %vm4174_vm4, %v4822_v27, %v4823_v20  ;;  %v5788_v10 = vadd.f32 %v5787_v0, %v5786_v42 }
 0x32d   : > { %v4978_v51 = vmax.f32 %v4946_v37, 0.0  ;;  %v5789_v50 = vpop.f32.mrf.mxu1  ;;  %v5885_v30 = vpop.f32.mrf.mxu0  ;;  %5634 = vst [vmem:[%s9444_s26] sm:$0xff] %v5633_v26   ;;  %v4916_v34 = vmul.f32 %v10172_v2, %v4870_v3 }
 0x32e   : > { %v4824_v7 = vrot.slane %v3370_v25, 1  ;;  %v4867_v61 = vsel %vm4174_vm4, %v4825_v28, %v4826_v35  ;;  %v3391_v58 = vadd.f32 %v5885_v30, %v5785_v41  ;;  %v10176_v41 = vld [vmem:[#allocation28_spill] sm:$0xff] }
 0x32f   : > { %v5638_v49 = vpack.c.bf16 %v4978_v51, %v4977_v16  ;;  %v5790_v54 = vpop.f32.mrf.mxu1  ;;  %v3382_v29 = vpop.f32.mrf.mxu0  ;;  %v4948_v19 = vadd.f32 %v4916_v34, %v9108_v40  ;;  %v5782_v40 = vadd.f32 %v9429_v60, %v9420_v4  ;;  %v4951_v1 = vadd.f32 %v4867_v61, %v9148_v9 }
 0x330   : > { %v3383_v46 = vadd.f32 %v5779_v38, %v3382_v29  ;;  %v4868_v11 = vsel %vm4174_vm4, %v4824_v7, %v4825_v28  ;;  %v4869_v22 = vsel %vm4174_vm4, %v4823_v20, %v4824_v7  ;;  %v5791_v51 = vadd.f32 %v5790_v54, %v5789_v50  ;;  %v10175_v54 = vld [vmem:[#allocation15_spill] sm:$0xff] }
 0x331   : > { %5710 = vst [vmem:[%s9444_s26 + $0x8] sm:$0xff] %v5638_v49   ;;  %v5792_v27 = vpop.f32.mrf.mxu1  ;;  %v5886_v59 = vpop.f32.mrf.mxu0  ;;  %v4918_v63 = vmul.f32 %v10173_v53, %v4868_v11  ;;  %v4949_v8 = vadd.f32 %v4869_v22, %v9125_v13  ;;  %v4980_v45 = vmax.f32 %v4948_v19, 0.0  ;;  %v10174_v13 = vld [vmem:[#allocation56_spill] sm:$0xff]  ;;  %v4829_v25 = vrot.slane %v3391_v58, 1  ;;  %v10177_v53 = vld [vmem:[#allocation13_spill] sm:$0xff] }
 0x332   : > { %v4827_v56 = vrot.slane %v3383_v46, 1  ;;  %v3394_v42 = vadd.f32 %v5886_v59, %v5788_v10  ;;  %v4983_v23 = vmax.f32 %v4951_v1, 0.0 }
 0x333   : > { %v5793_v47 = vpop.f32.mrf.mxu1  ;;  %v3385_v14 = vpop.f32.mrf.mxu0  ;;  %v4950_v15 = vadd.f32 %v4918_v63, %v9131_v24  ;;  %v5643_v5 = vpack.c.bf16 %v4980_v45, %v4979_v31  ;;  %v4981_v4 = vmax.f32 %v4949_v8, 0.0  ;;  %v10178_v8 = vld [vmem:[#allocation11_spill] sm:$0xff]  ;;  %v10179_v31 = vld [vmem:[#allocation58_spill] sm:$0xff] }
 0x334   : > { %v4866_v37 = vsel %vm4174_vm4, %v4826_v35, %v4827_v56  ;;  %v4830_v32 = vrot.slane %v3394_v42, 1  ;;  %v3386_v26 = vadd.f32 %v5782_v40, %v3385_v14  ;;  %v5794_v61 = vadd.f32 %v5793_v47, %v5792_v27  ;;  %v10180_v47 = vld [vmem:[#allocation33_spill] sm:$0xff] }
 0x335   : > { %v4920_v0 = vmul.f32 %v10174_v13, %v4866_v37  ;;  %v5795_v20 = vpop.f32.mrf.mxu1  ;;  %v5889_v16 = vpop.f32.mrf.mxu0  ;;  %v4982_v60 = vmax.f32 %v4950_v15, 0.0  ;;  %5711 = vst [vmem:[%s9444_s26 + $0x10] sm:$0xff] %v5643_v5  }
 0x336   : > { %v4828_v30 = vrot.slane %v3386_v26, 1  ;;  %v4863_v2 = vsel %vm4174_vm4, %v4829_v25, %v4830_v32 }
 0x337   : > { %v4952_v9 = vadd.f32 %v4920_v0, %v9154_v62  ;;  %v5796_v24 = vpop.f32.mrf.mxu1  ;;  %v3398_v38 = vpop.f32.mrf.mxu0  ;;  %v5648_v35 = vpack.c.bf16 %v4982_v60, %v4981_v4  ;;  %v4955_v63 = vadd.f32 %v4863_v2, %v10177_v53 }
 0x338   : > { %v5797_v3 = vadd.f32 %v5796_v24, %v5795_v20  ;;  %v3399_v49 = vadd.f32 %v5791_v51, %v3398_v38  ;;  %v4864_v34 = vsel %vm4174_vm4, %v4828_v30, %v4829_v25  ;;  %v4865_v50 = vsel %vm4174_vm4, %v4827_v56, %v4828_v30  ;;  %v10181_v38 = vld [vmem:[#allocation60_spill] sm:$0xff] }
 0x339   : > { %v4984_v28 = vmax.f32 %v4952_v9, 0.0  ;;  %v5798_v7 = vpop.f32.mrf.mxu1  ;;  %v5890_v62 = vpop.f32.mrf.mxu0  ;;  %5712 = vst [vmem:[%s9444_s26 + $0x18] sm:$0xff] %v5648_v35   ;;  %v4922_v29 = vmul.f32 %v10175_v54, %v4864_v34  ;;  %v4953_v10 = vadd.f32 %v4865_v50, %v10176_v41  ;;  %v10182_v35 = vld [vmem:[#allocation17_spill] sm:$0xff]  ;;  %v10183_v50 = vld [vmem:[#allocation36_spill] sm:$0xff] }
 0x33a   : > { %v4831_v46 = vrot.slane %v3399_v49, 1  ;;  %v3407_v11 = vadd.f32 %v5889_v16, %v5797_v3  ;;  %v4987_v16 = vmax.f32 %v4955_v63, 0.0 }
 0x33b   : > { %v5653_v19 = vpack.c.bf16 %v4984_v28, %v4983_v23  ;;  %v5799_v22 = vpop.f32.mrf.mxu1  ;;  %v3401_v59 = vpop.f32.mrf.mxu0  ;;  %v4954_v42 = vadd.f32 %v4922_v29, %v10178_v8  ;;  %v4985_v15 = vmax.f32 %v4953_v10, 0.0 }
 0x33c   : > { %v4862_v56 = vsel %vm4174_vm4, %v4830_v32, %v4831_v46  ;;  %v5800_v45 = vadd.f32 %v5799_v22, %v5798_v7  ;;  %v3402_v58 = vadd.f32 %v5794_v61, %v3401_v59  ;;  %v4833_v27 = vrot.slane %v3407_v11, 1  ;;  %v10184_v11 = vld [vmem:[#allocation64_spill] sm:$0xff] }
 0x33d   : > { %5713 = vst [vmem:[%s9444_s26 + $0x20] sm:$0xff] %v5653_v19   ;;  %v4924_v40 = vmul.f32 %v10179_v31, %v4862_v56  ;;  %v5801_v14 = vpop.f32.mrf.mxu1  ;;  %v5893_v1 = vpop.f32.mrf.mxu0  ;;  %v4986_v37 = vmax.f32 %v4954_v42, 0.0  ;;  %v10185_v56 = vld [vmem:[#allocation18_spill] sm:$0xff] }
 0x33e   : > { %v3410_v13 = vadd.f32 %v5890_v62, %v5800_v45  ;;  %v4832_v0 = vrot.slane %v3402_v58, 1 }
 0x33f   : > { %v4956_v5 = vadd.f32 %v4924_v40, %v10180_v47  ;;  %v5802_v26 = vpop.f32.mrf.mxu1  ;;  %v3414_v20 = vpop.f32.mrf.mxu0  ;;  %v5658_v4 = vpack.c.bf16 %v4986_v37, %v4985_v15 }
 0x340   : > { %v5803_v32 = vadd.f32 %v5802_v26, %v5801_v14  ;;  %v4834_v51 = vrot.slane %v3410_v13, 1  ;;  %v4860_v25 = vsel %vm4174_vm4, %v4832_v0, %v4833_v27  ;;  %v4861_v9 = vsel %vm4174_vm4, %v4831_v46, %v4832_v0 }
 0x341   : > { %v4988_v60 = vmax.f32 %v4956_v5, 0.0  ;;  %v5804_v30 = vpop.f32.mrf.mxu1  ;;  %v5894_v24 = vpop.f32.mrf.mxu0  ;;  %5714 = vst [vmem:[%s9444_s26 + $0x28] sm:$0xff] %v5658_v4   ;;  %v4926_v23 = vmul.f32 %v10181_v38, %v4860_v25  ;;  %v4957_v3 = vadd.f32 %v4861_v9, %v10182_v35  ;;  %v10186_v4 = vld [vmem:[#allocation67_spill] sm:$0xff] }
 0x342   : > { %v3415_v49 = vadd.f32 %v5803_v32, %v3414_v20  ;;  %v4859_v34 = vsel %vm4174_vm4, %v4833_v27, %v4834_v51 }
 0x343   : > { %v5663_v28 = vpack.c.bf16 %v4988_v60, %v4987_v16  ;;  %v5805_v2 = vpop.f32.mrf.mxu1  ;;  %v4958_v7 = vadd.f32 %v4926_v23, %v10183_v50  ;;  %v3417_v54 = vpop.f32.mrf.mxu0  ;;  %v4989_v10 = vmax.f32 %v4957_v3, 0.0  ;;  %v4959_v61 = vadd.f32 %v4859_v34, %v9240_v36 }
 0x344   : > { %v4835_v62 = vrot.slane %v3415_v49, 1  ;;  %v5806_v29 = vadd.f32 %v5805_v2, %v5804_v30 }
 0x345   : > { %5715 = vst [vmem:[%s9444_s26 + $0x30] sm:$0xff] %v5663_v28   ;;  %v5807_v41 = vpop.f32.mrf.mxu1  ;;  %v4990_v46 = vmax.f32 %v4958_v7, 0.0  ;;  %v5897_v63 = vpop.f32.mrf.mxu0  ;;  %v4991_v14 = vmax.f32 %v4959_v61, 0.0 }
 0x346   : > { %v4858_v19 = vsel %vm4174_vm4, %v4834_v51, %v4835_v62  ;;  %v3418_v59 = vadd.f32 %v5806_v29, %v3417_v54 }
 0x347   : > { %v4928_v22 = vmul.f32 %v10184_v11, %v4858_v19  ;;  %v5808_v53 = vpop.f32.mrf.mxu1  ;;  %v5668_v8 = vpack.c.bf16 %v4990_v46, %v4989_v10  ;;  %v3430_v27 = vpop.f32.mrf.mxu0 }
 0x348   : > { %v5809_v42 = vadd.f32 %v5808_v53, %v5807_v41  ;;  %v4836_v40 = vrot.slane %v3418_v59, 1 }
 0x349   : > { %v4960_v31 = vadd.f32 %v4928_v22, %v10185_v56  ;;  %v5810_v45 = vpop.f32.mrf.mxu1  ;;  %5716 = vst [vmem:[%s9444_s26 + $0x38] sm:$0xff] %v5668_v8   ;;  %v5898_v60 = vpop.f32.mrf.mxu0 }
 0x34a   : > { %v3423_v58 = vadd.f32 %v5893_v1, %v5809_v42  ;;  %v4857_v36 = vsel %vm4174_vm4, %v4835_v62, %v4836_v40  ;;  %v10187_v62 = vld [vmem:[#allocation72_spill] sm:$0xff] }
 0x34b   : > { %v4992_v15 = vmax.f32 %v4960_v31, 0.0  ;;  %v5811_v37 = vpop.f32.mrf.mxu1  ;;  %v4961_v16 = vadd.f32 %v4857_v36, %v9263_v21  ;;  %v3433_v49 = vpop.f32.mrf.mxu0 }
 0x34c   : > { %v4837_v47 = vrot.slane %v3423_v58, 1  ;;  %v5812_v5 = vadd.f32 %v5811_v37, %v5810_v45 }
 0x34d   : > { %v5673_v13 = vpack.c.bf16 %v4992_v15, %v4991_v14  ;;  %v5813_v0 = vpop.f32.mrf.mxu1  ;;  %v4993_v23 = vmax.f32 %v4961_v16, 0.0  ;;  %v5901_v41 = vpop.f32.mrf.mxu0  ;;  %v10188_v14 = vld [vmem:[#allocation76_spill] sm:$0xff] }
 0x34e   : > { %v4856_v26 = vsel %vm4174_vm4, %v4836_v40, %v4837_v47  ;;  %v3426_v20 = vadd.f32 %v5894_v24, %v5812_v5 }
 0x34f   : > { %5717 = vst [vmem:[%s9444_s26 + $0x40] sm:$0xff] %v5673_v13   ;;  %v4930_v1 = vmul.f32 %v10186_v4, %v4856_v26  ;;  %v5814_v32 = vpop.f32.mrf.mxu1  ;;  %v3446_v8 = vpop.f32.mrf.mxu0 }
 0x350   : > { %v4838_v51 = vrot.slane %v3426_v20, 1  ;;  %v5815_v25 = vadd.f32 %v5814_v32, %v5813_v0 }
 0x351   : > { %v4962_v9 = vadd.f32 %v4930_v1, %v9269_v52  ;;  %v5816_v30 = vpop.f32.mrf.mxu1  ;;  %v5902_v37 = vpop.f32.mrf.mxu0 }
 0x352   : > { %v3431_v38 = vadd.f32 %v5815_v25, %v3430_v27  ;;  %v4855_v24 = vsel %vm4174_vm4, %v4837_v47, %v4838_v51 }
 0x353   : > { %v4994_v35 = vmax.f32 %v4962_v9, 0.0  ;;  %v5817_v3 = vpop.f32.mrf.mxu1  ;;  %v4963_v52 = vadd.f32 %v4855_v24, %v9286_v57  ;;  %v3449_v16 = vpop.f32.mrf.mxu0  ;;  %v10189_v9 = vld [vmem:[#allocation80_spill] sm:$0xff] }
 0x354   : > { %v4839_v28 = vrot.slane %v3431_v38, 1  ;;  %v5818_v21 = vadd.f32 %v5817_v3, %v5816_v30 }
 0x355   : > { %v5678_v2 = vpack.c.bf16 %v4994_v35, %v4993_v23  ;;  %v5819_v34 = vpop.f32.mrf.mxu1  ;;  %v4995_v22 = vmax.f32 %v4963_v52, 0.0 }
 0x356   : > { %v4854_v50 = vsel %vm4174_vm4, %v4838_v51, %v4839_v28  ;;  %v3434_v7 = vadd.f32 %v5818_v21, %v3433_v49 }
 0x357   : > { %5718 = vst [vmem:[%s9444_s26 + $0x48] sm:$0xff] %v5678_v2   ;;  %v4932_v54 = vmul.f32 %v10187_v62, %v4854_v50  ;;  %v5820_v29 = vpop.f32.mrf.mxu1 }
 0x358   : > { %v4840_v10 = vrot.slane %v3434_v7, 1  ;;  %v5821_v46 = vadd.f32 %v5820_v29, %v5819_v34  ;;  %v10191_v29 = vld [vmem:[#allocation83_spill] sm:$0xff] }
 0x359   : > { %v4964_v19 = vadd.f32 %v4932_v54, %v9292_v33  ;;  %v5822_v61 = vpop.f32.mrf.mxu1 }
 0x35a   : > { %v3439_v11 = vadd.f32 %v5897_v63, %v5821_v46  ;;  %v4853_v42 = vsel %vm4174_vm4, %v4839_v28, %v4840_v10  ;;  %v10192_v46 = vld [vmem:[#allocation39_spill] sm:$0xff] }
 0x35b   : > { %v4996_v59 = vmax.f32 %v4964_v19, 0.0  ;;  %v5823_v53 = vpop.f32.mrf.mxu1  ;;  %v4965_v33 = vadd.f32 %v4853_v42, %v9309_v48 }
 0x35c   : > { %v4841_v56 = vrot.slane %v3439_v11, 1  ;;  %v5824_v57 = vadd.f32 %v5823_v53, %v5822_v61  ;;  %v10193_v53 = vld [vmem:[#allocation85_spill] sm:$0xff] }
 0x35d   : > { %v5683_v31 = vpack.c.bf16 %v4996_v59, %v4995_v22  ;;  %v5825_v40 = vpop.f32.mrf.mxu1  ;;  %v4997_v0 = vmax.f32 %v4965_v33, 0.0 }
 0x35e   : > { %v4852_v45 = vsel %vm4174_vm4, %v4840_v10, %v4841_v56  ;;  %v3442_v58 = vadd.f32 %v5898_v60, %v5824_v57 }
 0x35f   : > { %5719 = vst [vmem:[%s9444_s26 + $0x50] sm:$0xff] %v5683_v31   ;;  %v4934_v63 = vmul.f32 %v10188_v14, %v4852_v45  ;;  %v5826_v15 = vpop.f32.mrf.mxu1 }
 0x360   : > { %v4842_v27 = vrot.slane %v3442_v58, 1  ;;  %v5827_v36 = vadd.f32 %v5826_v15, %v5825_v40 }
 0x361   : > { %v4966_v47 = vadd.f32 %v4934_v63, %v9315_v12  ;;  %v5828_v5 = vpop.f32.mrf.mxu1 }
 0x362   : > { %v3447_v13 = vadd.f32 %v5827_v36, %v3446_v8  ;;  %v4851_v4 = vsel %vm4174_vm4, %v4841_v56, %v4842_v27 }
 0x363   : > { %v4998_v26 = vmax.f32 %v4966_v47, 0.0  ;;  %v5829_v20 = vpop.f32.mrf.mxu1  ;;  %v4967_v12 = vadd.f32 %v4851_v4, %v9332_v18 }
 0x364   : > { %v4843_v1 = vrot.slane %v3447_v13, 1  ;;  %v5830_v48 = vadd.f32 %v5829_v20, %v5828_v5 }
 0x365   : > { %v5688_v32 = vpack.c.bf16 %v4998_v26, %v4997_v0  ;;  %v5831_v60 = vpop.f32.mrf.mxu1  ;;  %v4999_v28 = vmax.f32 %v4967_v12, 0.0 }
 0x366   : > { %v4850_v51 = vsel %vm4174_vm4, %v4842_v27, %v4843_v1  ;;  %v3450_v25 = vadd.f32 %v5830_v48, %v3449_v16 }
 0x367   : > { %5720 = vst [vmem:[%s9444_s26 + $0x58] sm:$0xff] %v5688_v32   ;;  %v4936_v30 = vmul.f32 %v10189_v9, %v4850_v51  ;;  %v5832_v38 = vpop.f32.mrf.mxu1 }
 0x368   : > { %v4844_v23 = vrot.slane %v3450_v25, 1  ;;  %v5833_v35 = vadd.f32 %v5832_v38, %v5831_v60 }
 0x369   : > { %v4968_v3 = vadd.f32 %v4936_v30, %v9338_v39  ;;  %v5834_v49 = vpop.f32.mrf.mxu1  ;;  %v10190_v39 = vld [vmem:[#allocation20_spill] sm:$0xff] }
 0x36a   : > { %v3455_v24 = vadd.f32 %v5901_v41, %v5833_v35  ;;  %v4849_v34 = vsel %vm4174_vm4, %v4843_v1, %v4844_v23 }
 0x36b   : > { %v5000_v21 = vmax.f32 %v4968_v3, 0.0  ;;  %v5835_v2 = vpop.f32.mrf.mxu1  ;;  %v4969_v54 = vadd.f32 %v4849_v34, %v10190_v39 }
 0x36c   : > { %v4845_v50 = vrot.slane %v3455_v24, 1  ;;  %v5836_v7 = vadd.f32 %v5835_v2, %v5834_v49 }
 0x36d   : > { %v5693_v52 = vpack.c.bf16 %v5000_v21, %v4999_v28  ;;  %v5001_v22 = vmax.f32 %v4969_v54, 0.0 }
 0x36e   : > { %v4848_v18 = vsel %vm4174_vm4, %v4844_v23, %v4845_v50  ;;  %v3458_v62 = vadd.f32 %v5902_v37, %v5836_v7 }
 0x36f   : > { %5721 = vst [vmem:[%s9444_s26 + $0x60] sm:$0xff] %v5693_v52   ;;  %v4938_v41 = vmul.f32 %v10191_v29, %v4848_v18 }
 0x370   : > { %v4846_v10 = vrot.slane %v3458_v62, 1 }
 0x371   : > { %v4970_v19 = vadd.f32 %v4938_v41, %v10192_v46 }
 0x372   : > { %v4847_v61 = vsel %vm4174_vm4, %v4845_v50, %v4846_v10  ;;  %v4878_v11 = vsel %vm4174_vm4, %v4846_v10, %v4815_v43 }
 0x373   : > { %v5002_v59 = vmax.f32 %v4970_v19, 0.0  ;;  %v4940_v8 = vmul.f32 %v10193_v53, %v4878_v11  ;;  %v4971_v42 = vadd.f32 %v4847_v61, %v9382_v17 }
 0x375   : > { %v5698_v56 = vpack.c.bf16 %v5002_v59, %v5001_v22  ;;  %v4972_v57 = vadd.f32 %v4940_v8, %v9395_v44  ;;  %v5003_v31 = vmax.f32 %v4971_v42, 0.0 }
 0x377   : > { %5722 = vst [vmem:[%s9444_s26 + $0x68] sm:$0xff] %v5698_v56   ;;  %v5004_v6 = vmax.f32 %v4972_v57, 0.0 }
 0x379   : > { %v5703_v55 = vpack.c.bf16 %v5004_v6, %v5003_v31 }
 0x37b   : > { %5723 = vst [vmem:[%s9444_s26 + $0x70] sm:$0xff] %v5703_v55  }
 0x37c   : > { %6247 = shalt.err (!%p6244_p3)
}
 0x37d   : > { %s6248_s10 = scalar_lea.hbm %s9568_s4, 2048  ;;  %s6252_s17 = scalar_lea.hbm %s9618_s3, 4096 }
 0x37e   : > { %p6249_p4 = scmp.ne.s32.totalorder %s9568_s4, %s6248_s10  ;;  %p6253_p9 = scmp.lt.s32.totalorder %s9568_s4, %s9618_s3 }
 0x37f   : > { %p6254_p10 = scmp.lt.s32.totalorder %s6252_s17, %s6248_s10 }
 0x380   : > { %p6250_p7 = pnand %p6249_p4, %p6359_p5 }
 0x381   : > { %p6255_p11 = por %p6254_p10, %p6253_p9 }
 0x382   : > { %p6251_p8 = pneg %p6250_p7 }
 0x384   : > { %p6256_p12 = pnand %p6255_p11, %p6251_p8 }
 0x386   : > { %6259 = shalt.err (!%p6256_p12)
}
 0x387   : > { %s6299_s24 = smov 64   ;;  %s6300_s25 = smov 4  }
 0x388   : > { %5904 = dma.vmem_to_hbm [thread:$0]  (%p6359_p5), %s9570_s28, 2048, %s9568_s4, %s9575_s5, %s6299_s24, %s6299_s24, %s6300_s25  }
 0x389 PF: > { %p5910_p13 = scmp.ge.s32.totalorder %s6294_s15, 2  ;;  %s5196_s26 = sand.u32 1, %s6282_s12  }
 0x38a   : > { %s5197_s27 = scalar_lea.sflag [#allocation3], %s5196_s26 }
 0x38b   : > { %p5907_p0 = pnand %p5910_p13, %p6363_p6 }
 0x38d   : > { %p5908_p1 = pneg %p5907_p0 }
 0x38f   : > { %6277 = dma.done.wait (%p5908_p1), %s5197_s27, 2048  }
 0x390   : > { %6279 = vsyncadd (%p5908_p1), %s5197_s27, 4294965248  ;;  %p13_p2 = scmp.ge.s32.totalorder %s6346_s18, 4   ;;  %s10194_s12 = smov %s6286_s13 }
 0x391   : > { %s10195_s13 = smov %s6290_s14  ;;  %s10196_s14 = smov %s6357_s21 }
 0x392   : > { %s10197_s15 = smov %s6346_s18  ;;  %15 = sbr.rel (!%p13_p2) target bundleno = 3 (0x3), region = 67 }
 0x397   :  { %5202 = vsyncpa [#allocation3], 1 }
 0x398   :  { %5204 = vsyncpa [#allocation3 + $0x1], 1 }

</bundles_post_ra>
